<compile_context>
chip_gen: v6e
topology: v6e:2x2x1
jax: 0.10.0
libtpu: 0.0.40
codegen_flags: <defaults>
</compile_context>

<pallas_src>
import functools

import jax
import jax.numpy as jnp
from jax.experimental import pallas as pl
from jax.experimental.pallas import tpu as pltpu

LN_EPS = 1e-5                      # PyTorch nn.LayerNorm default eps
MXU_DTYPE = jnp.bfloat16           # MXU dot inputs; accumulation always f32
_GELU_C = 0.7978845608028654       # sqrt(2/pi)
_NEG_INF = -1e30


# ----------------------------------------------------------------------------
# In-kernel math helpers (all f32)
# ----------------------------------------------------------------------------
def _layernorm(x, g, b):
    mu = jnp.mean(x, axis=-1, keepdims=True)
    var = jnp.mean(jnp.square(x - mu), axis=-1, keepdims=True)
    return (x - mu) * jax.lax.rsqrt(var + LN_EPS) * g + b


def _gelu_tanh(x):
    # tanh-form GELU: tanh runs on the EUP slot (idle otherwise), keeping the MLP
    # activation off the 4 VALU slots (perf review).  ~1e-3 abs diff vs torch's
    # exact erf GELU -- within bf16-matmul noise.
    # TODO(synk): switch to exact lax.erf once its Mosaic lowering is verified.
    return 0.5 * x * (1.0 + jnp.tanh(_GELU_C * (x + 0.044715 * x * x * x)))


def _block_diag_bias(rows, cols, rows_per_blk_r, rows_per_blk_c):
    """Additive bias masking cross-batch entries of a flattened-batch score matrix
    (0 within the same batch element, -1e30 across batch elements)."""
    ri = jax.lax.broadcasted_iota(jnp.int32, (rows, cols), 0).astype(jnp.float32)
    ci = jax.lax.broadcasted_iota(jnp.int32, (rows, cols), 1).astype(jnp.float32)
    rb = jnp.floor((ri + 0.5) * (1.0 / rows_per_blk_r))   # exact batch index
    cb = jnp.floor((ci + 0.5) * (1.0 / rows_per_blk_c))
    return jnp.where(rb == cb, 0.0, _NEG_INF)


def _mha_flat(q_all, k_all, v_all, *, heads, dim_head, scale, bias):
    """Multi-head attention on batch-flattened rows.

    q_all (Mq, H*dh) / k_all, v_all (Mk, H*dh) f32; `bias` is the block-diagonal
    batch mask.  Heads are 128-lane-aligned slices; head outputs are concatenated
    along lanes so the caller can apply ONE wide output projection.
    """
    outs = []
    for h in range(heads):                                  # static unroll
        lo, hi = h * dim_head, (h + 1) * dim_head
        qh = q_all[:, lo:hi].astype(MXU_DTYPE)
        kh = k_all[:, lo:hi].astype(MXU_DTYPE)
        vh = v_all[:, lo:hi].astype(MXU_DTYPE)
        s = jax.lax.dot_general(qh, kh, (((1,), (1,)), ((), ())),
                                preferred_element_type=jnp.float32) * scale + bias
        s = s - jnp.max(s, axis=-1, keepdims=True)
        p = jnp.exp(s)
        p = p * pl.reciprocal(jnp.sum(p, axis=-1, keepdims=True), approx=True)
        outs.append(jnp.dot(p.astype(MXU_DTYPE), vh,
                            preferred_element_type=jnp.float32))
    return jnp.concatenate(outs, axis=-1)                   # (Mq, H*dh) f32


# ----------------------------------------------------------------------------
# BlockSpec helper for the grid=(batch_block, depth) mega-kernel
# ----------------------------------------------------------------------------
def _spec(arr, kind, bblk):
    """kind: 'const' -> whole array (fetched once, resident); 'batch' -> leading
    dim blocked by bblk, indexed by grid axis 0; 'layer' -> leading dim indexed by
    grid axis 1 (ViT depth)."""
    shape = arr.shape
    nd = len(shape)
    if kind == "const":
        return pl.BlockSpec(shape, lambda b, l, _n=nd: (0,) * _n)
    if kind == "batch":
        return pl.BlockSpec((bblk,) + shape[1:],
                            lambda b, l, _n=nd: (b,) + (0,) * (_n - 1))
    return pl.BlockSpec((1,) + shape[1:],
                        lambda b, l, _n=nd: (l,) + (0,) * (_n - 1))


# ----------------------------------------------------------------------------
# The fused kernel: patch embed + ViT + final LN + enc_to_dec + CrossTransformer
# ----------------------------------------------------------------------------
def _fusion_encoder_kernel(
        patches_ref, sm_ref,
        cls_ref, pos_ref,
        pe_ln1_g, pe_ln1_b, pe_w, pe_b, pe_ln2_g, pe_ln2_b,
        aln_g, aln_b, wqkv, wo, bo,
        fln_g, fln_b, w1, b1, w2, b2,
        final_g, final_b, e2d_w, e2d_b,
        c_ln_g, c_ln_b, c_wq, c_wkv, c_wo, c_bo,
        out_ref,
        tok, ctx,
        *, bblk, n_patches, vit_heads, vit_dim_head, vit_depth,
        cross_heads, cross_dim_head, cross_depth):
    layer = pl.program_id(1)
    n1 = n_patches + 1
    m = bblk * n1                               # flattened rows per grid step
    hd = vit_heads * vit_dim_head

    # ---- layer-0 prologue: to_patch_embedding (LN -> Linear -> LN), cls, +pos ----
    @pl.when(layer == 0)
    def _():
        p = patches_ref[...].astype(jnp.float32).reshape(bblk * n_patches, -1)
        p = _layernorm(p, pe_ln1_g[...], pe_ln1_b[...])
        p = jnp.dot(p.astype(MXU_DTYPE), pe_w[...],
                    preferred_element_type=jnp.float32) + pe_b[...]
        p = _layernorm(p, pe_ln2_g[...], pe_ln2_b[...])
        pos = pos_ref[...]                                    # (N+1, D) f32
        cls_row = cls_ref[...] + pos[0:1, :]                  # (1, D)
        pos_patch = pos[1:, :]                                # (N, D)
        for b in range(bblk):                                 # layer-0 only scatter
            tok[b * n1:b * n1 + 1, :] = cls_row
            tok[b * n1 + 1:(b + 1) * n1, :] = (
                p[b * n_patches:(b + 1) * n_patches, :] + pos_patch)

    # ---- ViT layer: pre-LN MHA + residual, pre-LN MLP + residual (flattened M) ----
    x = tok[...]                                              # (M, D) f32
    bias_tt = _block_diag_bias(m, m, n1, n1)
    scale = float(vit_dim_head) ** -0.5

    xn = _layernorm(x, aln_g[0], aln_b[0])
    qkv = jnp.dot(xn.astype(MXU_DTYPE), wqkv[0],
                  preferred_element_type=jnp.float32)         # (M, 3*H*dh)
    attn = _mha_flat(qkv[:, :hd], qkv[:, hd:2 * hd], qkv[:, 2 * hd:],
                     heads=vit_heads, dim_head=vit_dim_head,
                     scale=scale, bias=bias_tt)
    x = x + jnp.dot(attn.astype(MXU_DTYPE), wo[0],
                    preferred_element_type=jnp.float32) + bo[0]

    xn = _layernorm(x, fln_g[0], fln_b[0])
    hmid = jnp.dot(xn.astype(MXU_DTYPE), w1[0],
                   preferred_element_type=jnp.float32) + b1[0]
    hmid = _gelu_tanh(hmid)
    x = x + jnp.dot(hmid.astype(MXU_DTYPE), w2[0],
                    preferred_element_type=jnp.float32) + b2[0]
    tok[...] = x

    # ---- last-layer epilogue: final LN + enc_to_dec + CrossTransformer ----
    @pl.when(layer == vit_depth - 1)
    def _():
        cam = _layernorm(x, final_g[...], final_b[...])
        cam = jnp.dot(cam.astype(MXU_DTYPE), e2d_w[...],
                      preferred_element_type=jnp.float32) + e2d_b[...]   # (M, Ddec)
        ctx[...] = cam         # rows b*n1 hold the (unused) lg cls -> reused below

        # sm (lidar/decoder) cls tokens, one per batch element of the block
        cls = jnp.concatenate(
            [sm_ref[b, 0:1, :].astype(jnp.float32) for b in range(bblk)], axis=0)

        chd = cross_heads * cross_dim_head
        c_scale = float(cross_dim_head) ** -0.5
        bias_ct = _block_diag_bias(bblk, m, 1, n1)            # (Bblk, M)

        # sm_attend_lg only: lg output is discarded by FusionEncoder.forward and
        # never feeds back into the sm stream (lg patch tokens are layer-constant).
        for l in range(cross_depth):                          # static unroll
            # PreNorm normalizes the query (cls) only; kv_include_self=True
            # prepends the normalized cls to the raw lg patch context.
            cls_n = _layernorm(cls, c_ln_g[l], c_ln_b[l])     # (Bblk, Ddec)
            for b in range(bblk):
                ctx[b * n1:b * n1 + 1, :] = cls_n[b:b + 1, :]
            q = jnp.dot(cls_n.astype(MXU_DTYPE), c_wq[l],
                        preferred_element_type=jnp.float32)   # (Bblk, H*dh)
            kv = jnp.dot(ctx[...].astype(MXU_DTYPE), c_wkv[l],
                         preferred_element_type=jnp.float32)  # (M, 2*H*dh)
            att = _mha_flat(q, kv[:, :chd], kv[:, chd:],
                            heads=cross_heads, dim_head=cross_dim_head,
                            scale=c_scale, bias=bias_ct)
            cls = cls + jnp.dot(att.astype(MXU_DTYPE), c_wo[l],
                                preferred_element_type=jnp.float32) + c_bo[l]

        # decoder_tokens: updated sm cls + untouched lidar patch tokens
        out_ref[:, 1:, :] = sm_ref[:, 1:, :].astype(out_ref.dtype)
        for b in range(bblk):
            out_ref[b, 0:1, :] = cls[b:b + 1, :].astype(out_ref.dtype)


# ----------------------------------------------------------------------------
# Forward pass (only remaining XLA glue: the einops Rearrange layout transform)
# ----------------------------------------------------------------------------
def fusion_encoder_forward(cam_img, decoder_tokens_lidar, params, cfg):
    # einops: 'b c (h p1) (w p2) -> b (h w) (p1 p2 c)'   (pure layout)
    B, C, Himg, Wimg = cam_img.shape
    ps = cfg["patch"]
    gh, gw = Himg // ps, Wimg // ps
    patches = cam_img.reshape(B, C, gh, ps, gw, ps)
    patches = jnp.transpose(patches, (0, 2, 4, 3, 5, 1)).reshape(
        B, gh * gw, ps * ps * C)

    N = gh * gw
    N1 = N + 1
    D, Ddec = cfg["vit_dim"], cfg["decoder_dim"]
    depth = cfg["vit_depth"]
    Nsm = decoder_tokens_lidar.shape[1]

    bblk = min(cfg.get("batch_block", 8), B)
    assert B % bblk == 0, "batch must be divisible by the batch block"
    # TODO(synk): pad the batch instead of asserting for ragged batch sizes.

    pe = params["patch_embed"]
    vt = params["vit_transformer"]
    cx = params["cross"]

    kern = functools.partial(
        _fusion_encoder_kernel,
        bblk=bblk, n_patches=N,
        vit_heads=cfg["vit_heads"], vit_dim_head=cfg["vit_dim_head"],
        vit_depth=depth,
        cross_heads=cfg["cross_heads"], cross_dim_head=cfg["cross_dim_head"],
        cross_depth=cfg["cross_depth"])

    inputs = [
        (patches, "batch"), (decoder_tokens_lidar, "batch"),
        (params["cls_token"], "const"), (params["pos_embedding"], "const"),
        (pe["ln1_g"], "const"), (pe["ln1_b"], "const"),
        (pe["w"], "const"), (pe["b"], "const"),
        (pe["ln2_g"], "const"), (pe["ln2_b"], "const"),
        (vt["attn_ln_g"], "layer"), (vt["attn_ln_b"], "layer"),
        (vt["wqkv"], "layer"), (vt["wo"], "layer"), (vt["bo"], "layer"),
        (vt["ff_ln_g"], "layer"), (vt["ff_ln_b"], "layer"),
        (vt["ff_w1"], "layer"), (vt["ff_b1"], "layer"),
        (vt["ff_w2"], "layer"), (vt["ff_b2"], "layer"),
        (vt["final_ln_g"], "const"), (vt["final_ln_b"], "const"),
        (params["enc_to_dec_w"], "const"), (params["enc_to_dec_b"], "const"),
        (cx["ln_g"], "const"), (cx["ln_b"], "const"),
        (cx["wq"], "const"), (cx["wkv"], "const"),
        (cx["wo"], "const"), (cx["bo"], "const"),
    ]

    return pl.pallas_call(
        kern,
        out_shape=jax.ShapeDtypeStruct((B, Nsm, Ddec), decoder_tokens_lidar.dtype),
        grid=(B // bblk, depth),
        in_specs=[_spec(a, k, bblk) for a, k in inputs],
        out_specs=pl.BlockSpec((bblk, Nsm, Ddec), lambda b, l: (b, 0, 0)),
        scratch_shapes=[
            pltpu.VMEM((bblk * N1, D), jnp.float32),     # depth-resident ViT stream
            pltpu.VMEM((bblk * N1, Ddec), jnp.float32),  # cross kv context (epilogue)
        ],
        compiler_params=pltpu.CompilerParams(
            dimension_semantics=("parallel", "arbitrary"),
            vmem_limit_bytes=32 * 1024 * 1024),          # explicit; safe on v7x 64MiB
    )(*[a for a, _ in inputs])


# ----------------------------------------------------------------------------
# Deterministic synthetic parameters (shapes follow the module's __init__;
# MXU weights stored bf16 with fused QKV / KV layouts, LN params / biases f32)
# ----------------------------------------------------------------------------
def init_params(key, cfg):
    k_iter = iter(jax.random.split(key, 64))

    def nrm(shape, scale=0.02, dtype=jnp.float32):
        return (scale * jax.random.normal(next(k_iter), shape, jnp.float32)).astype(dtype)

    D, Ddec = cfg["vit_dim"], cfg["decoder_dim"]
    H, dh = cfg["vit_heads"], cfg["vit_dim_head"]
    cH, cdh = cfg["cross_heads"], cfg["cross_dim_head"]
    mlp = cfg["vit_mlp_dim"]
    depth, cdepth = cfg["vit_depth"], cfg["cross_depth"]
    patch_dim = cfg["channels"] * cfg["patch"] * cfg["patch"]
    num_patches = (cfg["img_h"] // cfg["patch"]) * (cfg["img_w"] // cfg["patch"])
    W = MXU_DTYPE

    return {
        "patch_embed": dict(
            ln1_g=jnp.ones((1, patch_dim), jnp.float32),
            ln1_b=jnp.zeros((1, patch_dim), jnp.float32),
            w=nrm((patch_dim, D), dtype=W),
            b=jnp.zeros((1, D), jnp.float32),
            ln2_g=jnp.ones((1, D), jnp.float32),
            ln2_b=jnp.zeros((1, D), jnp.float32),
        ),
        "pos_embedding": nrm((num_patches + 1, D), scale=1.0),
        "cls_token": nrm((1, D), scale=1.0),
        "enc_to_dec_w": nrm((D, Ddec), dtype=W),
        "enc_to_dec_b": jnp.zeros((1, Ddec), jnp.float32),
        "vit_transformer": dict(
            attn_ln_g=jnp.ones((depth, 1, D), jnp.float32),
            attn_ln_b=jnp.zeros((depth, 1, D), jnp.float32),
            # fused to_qkv (no bias, lucidrains Attention); to_out Linear has bias.
            wqkv=nrm((depth, D, 3 * H * dh), dtype=W),
            wo=nrm((depth, H * dh, D), dtype=W),
            bo=jnp.zeros((depth, 1, D), jnp.float32),
            ff_ln_g=jnp.ones((depth, 1, D), jnp.float32),
            ff_ln_b=jnp.zeros((depth, 1, D), jnp.float32),
            ff_w1=nrm((depth, D, mlp), dtype=W),
            ff_b1=jnp.zeros((depth, 1, mlp), jnp.float32),
            ff_w2=nrm((depth, mlp, D), dtype=W),
            ff_b2=jnp.zeros((depth, 1, D), jnp.float32),
            final_ln_g=jnp.ones((1, D), jnp.float32),
            final_ln_b=jnp.zeros((1, D), jnp.float32),
        ),
        # CrossTransformer, sm_attend_lg direction only (lg_attend_sm never
        # influences the returned decoder_tokens and is skipped as dead code).
        "cross": dict(
            ln_g=jnp.ones((cdepth, 1, Ddec), jnp.float32),
            ln_b=jnp.zeros((cdepth, 1, Ddec), jnp.float32),
            wq=nrm((cdepth, Ddec, cH * cdh), dtype=W),
            wkv=nrm((cdepth, Ddec, 2 * cH * cdh), dtype=W),
            wo=nrm((cdepth, cH * cdh, Ddec), dtype=W),
            bo=jnp.zeros((cdepth, 1, Ddec), jnp.float32),
        ),
    }


# ----------------------------------------------------------------------------
if __name__ == "__main__":
    # Small, lane-dense configuration consistent with the module's constructor.
    cfg = dict(
        img_h=16, img_w=32, channels=3, patch=8,   # 2x4 = 8 patches, patch_dim=192
        vit_dim=256, vit_depth=2, vit_heads=2, vit_dim_head=128, vit_mlp_dim=256,
        decoder_dim=128,                            # != vit_dim -> enc_to_dec Linear
        cross_depth=2, cross_heads=2, cross_dim_head=128,
        batch_block=4,       # M = 4*(8+1) = 36 flattened rows; 2 parallel grid blocks
    )
    B = 8
    n_lidar_tokens = 9       # 1 cls + 8 lidar patch tokens

    key = jax.random.PRNGKey(0)
    kp, k1, k2 = jax.random.split(key, 3)
    params = init_params(kp, cfg)
    cam_img = jax.random.normal(
        k1, (B, cfg["channels"], cfg["img_h"], cfg["img_w"]), dtype=jnp.float32)
    decoder_tokens_lidar = jax.random.normal(
        k2, (B, n_lidar_tokens, cfg["decoder_dim"]), dtype=jnp.float32)

    fwd = jax.jit(lambda ci, dt, p: fusion_encoder_forward(ci, dt, p, cfg))
    out = fwd(cam_img, decoder_tokens_lidar, params)
    jax.block_until_ready(out)
    assert out.shape == (B, n_lidar_tokens, cfg["decoder_dim"]), out.shape
    assert bool(jnp.all(jnp.isfinite(out)))
    print("KERNEL_OK")
</pallas_src>

<mosaic_0001>
module attributes {stable_mosaic.version = 11 : i64} {
  func.func @_fusion_encoder_kernel(%arg0: i32, %arg1: i32, %arg2: memref<4x8x192xf32, #tpu.memory_space<vmem>>, %arg3: memref<4x9x128xf32, #tpu.memory_space<vmem>>, %arg4: memref<1x256xf32, #tpu.memory_space<vmem>>, %arg5: memref<9x256xf32, #tpu.memory_space<vmem>>, %arg6: memref<1x192xf32, #tpu.memory_space<vmem>>, %arg7: memref<1x192xf32, #tpu.memory_space<vmem>>, %arg8: memref<192x256xbf16, #tpu.memory_space<vmem>>, %arg9: memref<1x256xf32, #tpu.memory_space<vmem>>, %arg10: memref<1x256xf32, #tpu.memory_space<vmem>>, %arg11: memref<1x256xf32, #tpu.memory_space<vmem>>, %arg12: memref<1x1x256xf32, #tpu.memory_space<vmem>>, %arg13: memref<1x1x256xf32, #tpu.memory_space<vmem>>, %arg14: memref<1x256x768xbf16, #tpu.memory_space<vmem>>, %arg15: memref<1x256x256xbf16, #tpu.memory_space<vmem>>, %arg16: memref<1x1x256xf32, #tpu.memory_space<vmem>>, %arg17: memref<1x1x256xf32, #tpu.memory_space<vmem>>, %arg18: memref<1x1x256xf32, #tpu.memory_space<vmem>>, %arg19: memref<1x256x256xbf16, #tpu.memory_space<vmem>>, %arg20: memref<1x1x256xf32, #tpu.memory_space<vmem>>, %arg21: memref<1x256x256xbf16, #tpu.memory_space<vmem>>, %arg22: memref<1x1x256xf32, #tpu.memory_space<vmem>>, %arg23: memref<1x256xf32, #tpu.memory_space<vmem>>, %arg24: memref<1x256xf32, #tpu.memory_space<vmem>>, %arg25: memref<256x128xbf16, #tpu.memory_space<vmem>>, %arg26: memref<1x128xf32, #tpu.memory_space<vmem>>, %arg27: memref<2x1x128xf32, #tpu.memory_space<vmem>>, %arg28: memref<2x1x128xf32, #tpu.memory_space<vmem>>, %arg29: memref<2x128x256xbf16, #tpu.memory_space<vmem>>, %arg30: memref<2x128x512xbf16, #tpu.memory_space<vmem>>, %arg31: memref<2x256x128xbf16, #tpu.memory_space<vmem>>, %arg32: memref<2x1x128xf32, #tpu.memory_space<vmem>>, %arg33: memref<4x9x128xf32, #tpu.memory_space<vmem>>, %arg34: memref<36x256xf32, #tpu.memory_space<vmem>>, %arg35: memref<36x128xf32, #tpu.memory_space<vmem>>) attributes {dimension_semantics = [#tpu.dimension_semantics<parallel>, #tpu.dimension_semantics<arbitrary>], iteration_bounds = array<i64: 2, 2>, scalar_prefetch = 0 : i64, scratch_operands = 2 : i64, tpu.core_type = #tpu.core_type<tc>, window_params = [{transform_indices = @transform_0, window_bounds = array<i64: 4, 8, 192>}, {transform_indices = @transform_1, window_bounds = array<i64: 4, 9, 128>}, {pipeline_mode = #tpu.pipeline_mode<synchronous>, transform_indices = @transform_2, window_bounds = array<i64: 1, 256>}, {pipeline_mode = #tpu.pipeline_mode<synchronous>, transform_indices = @transform_3, window_bounds = array<i64: 9, 256>}, {pipeline_mode = #tpu.pipeline_mode<synchronous>, transform_indices = @transform_4, window_bounds = array<i64: 1, 192>}, {pipeline_mode = #tpu.pipeline_mode<synchronous>, transform_indices = @transform_5, window_bounds = array<i64: 1, 192>}, {pipeline_mode = #tpu.pipeline_mode<synchronous>, transform_indices = @transform_6, window_bounds = array<i64: 192, 256>}, {pipeline_mode = #tpu.pipeline_mode<synchronous>, transform_indices = @transform_7, window_bounds = array<i64: 1, 256>}, {pipeline_mode = #tpu.pipeline_mode<synchronous>, transform_indices = @transform_8, window_bounds = array<i64: 1, 256>}, {pipeline_mode = #tpu.pipeline_mode<synchronous>, transform_indices = @transform_9, window_bounds = array<i64: 1, 256>}, {transform_indices = @transform_10, window_bounds = array<i64: 1, 1, 256>}, {transform_indices = @transform_11, window_bounds = array<i64: 1, 1, 256>}, {transform_indices = @transform_12, window_bounds = array<i64: 1, 256, 768>}, {transform_indices = @transform_13, window_bounds = array<i64: 1, 256, 256>}, {transform_indices = @transform_14, window_bounds = array<i64: 1, 1, 256>}, {transform_indices = @transform_15, window_bounds = array<i64: 1, 1, 256>}, {transform_indices = @transform_16, window_bounds = array<i64: 1, 1, 256>}, {transform_indices = @transform_17, window_bounds = array<i64: 1, 256, 256>}, {transform_indices = @transform_18, window_bounds = array<i64: 1, 1, 256>}, {transform_indices = @transform_19, window_bounds = array<i64: 1, 256, 256>}, {transform_indices = @transform_20, window_bounds = array<i64: 1, 1, 256>}, {pipeline_mode = #tpu.pipeline_mode<synchronous>, transform_indices = @transform_21, window_bounds = array<i64: 1, 256>}, {pipeline_mode = #tpu.pipeline_mode<synchronous>, transform_indices = @transform_22, window_bounds = array<i64: 1, 256>}, {pipeline_mode = #tpu.pipeline_mode<synchronous>, transform_indices = @transform_23, window_bounds = array<i64: 256, 128>}, {pipeline_mode = #tpu.pipeline_mode<synchronous>, transform_indices = @transform_24, window_bounds = array<i64: 1, 128>}, {pipeline_mode = #tpu.pipeline_mode<synchronous>, transform_indices = @transform_25, window_bounds = array<i64: 2, 1, 128>}, {pipeline_mode = #tpu.pipeline_mode<synchronous>, transform_indices = @transform_26, window_bounds = array<i64: 2, 1, 128>}, {pipeline_mode = #tpu.pipeline_mode<synchronous>, transform_indices = @transform_27, window_bounds = array<i64: 2, 128, 256>}, {pipeline_mode = #tpu.pipeline_mode<synchronous>, transform_indices = @transform_28, window_bounds = array<i64: 2, 128, 512>}, {pipeline_mode = #tpu.pipeline_mode<synchronous>, transform_indices = @transform_29, window_bounds = array<i64: 2, 256, 128>}, {pipeline_mode = #tpu.pipeline_mode<synchronous>, transform_indices = @transform_30, window_bounds = array<i64: 2, 1, 128>}, {transform_indices = @transform_31, window_bounds = array<i64: 4, 9, 128>}]} {
    %c0_i32 = arith.constant 0 : i32
    %0 = arith.cmpi eq, %arg1, %c0_i32 : i32
    %1 = arith.extui %0 : i1 to i32
    %c0_i32_0 = arith.constant 0 : i32
    %2 = arith.cmpi ne, %1, %c0_i32_0 : i32
    scf.if %2 {
      %c0_71 = arith.constant 0 : index
      %c0_72 = arith.constant 0 : index
      %c0_73 = arith.constant 0 : index
      %169 = vector.load %arg2[%c0_71, %c0_72, %c0_73] : memref<4x8x192xf32, #tpu.memory_space<vmem>>, vector<4x8x192xf32>
      %170 = vector.shape_cast %169 : vector<4x8x192xf32> to vector<32x192xf32>
      %c0_74 = arith.constant 0 : index
      %c0_75 = arith.constant 0 : index
      %171 = vector.load %arg6[%c0_74, %c0_75] : memref<1x192xf32, #tpu.memory_space<vmem>>, vector<1x192xf32>
      %c0_76 = arith.constant 0 : index
      %c0_77 = arith.constant 0 : index
      %172 = vector.load %arg7[%c0_76, %c0_77] : memref<1x192xf32, #tpu.memory_space<vmem>>, vector<1x192xf32>
      %cst_78 = arith.constant dense<0.000000e+00> : vector<32xf32>
      %173 = vector.multi_reduction <add>, %170, %cst_78 [1] : vector<32x192xf32> to vector<32xf32>
      %174 = vector.shape_cast %173 : vector<32xf32> to vector<32x1xf32>
      %cst_79 = arith.constant 1.920000e+02 : f32
      %175 = vector.broadcast %cst_79 : f32 to vector<32x1xf32>
      %176 = arith.divf %174, %175 : vector<32x1xf32>
      %177 = vector.broadcast %176 : vector<32x1xf32> to vector<32x192xf32>
      %178 = arith.subf %170, %177 : vector<32x192xf32>
      %179 = arith.mulf %178, %178 : vector<32x192xf32>
      %cst_80 = arith.constant dense<0.000000e+00> : vector<32xf32>
      %180 = vector.multi_reduction <add>, %179, %cst_80 [1] : vector<32x192xf32> to vector<32xf32>
      %181 = vector.shape_cast %180 : vector<32xf32> to vector<32x1xf32>
      %cst_81 = arith.constant 1.920000e+02 : f32
      %182 = vector.broadcast %cst_81 : f32 to vector<32x1xf32>
      %183 = arith.divf %181, %182 : vector<32x1xf32>
      %184 = vector.broadcast %176 : vector<32x1xf32> to vector<32x192xf32>
      %185 = arith.subf %170, %184 : vector<32x192xf32>
      %cst_82 = arith.constant 9.99999974E-6 : f32
      %186 = vector.broadcast %cst_82 : f32 to vector<32x1xf32>
      %187 = arith.addf %183, %186 : vector<32x1xf32>
      %188 = math.rsqrt %187 : vector<32x1xf32>
      %189 = vector.broadcast %188 : vector<32x1xf32> to vector<32x192xf32>
      %190 = arith.mulf %185, %189 : vector<32x192xf32>
      %191 = vector.broadcast %171 : vector<1x192xf32> to vector<32x192xf32>
      %192 = arith.mulf %190, %191 : vector<32x192xf32>
      %193 = vector.broadcast %172 : vector<1x192xf32> to vector<32x192xf32>
      %194 = arith.addf %192, %193 : vector<32x192xf32>
      %195 = arith.truncf %194 : vector<32x192xf32> to vector<32x192xbf16>
      %c0_83 = arith.constant 0 : index
      %c0_84 = arith.constant 0 : index
      %196 = vector.load %arg8[%c0_83, %c0_84] : memref<192x256xbf16, #tpu.memory_space<vmem>>, vector<192x256xbf16>
      %cst_85 = arith.constant dense<0.000000e+00> : vector<32x256xf32>
      %197 = tpu.matmul %195, %196, %cst_85 {dimension_numbers = #tpu.dot_dimension_numbers<[1], [0], [0], [1], [0, 0, 1, 1], [], []>} : vector<32x192xbf16>, vector<192x256xbf16>, vector<32x256xf32> -> vector<32x256xf32>
      %c0_86 = arith.constant 0 : index
      %c0_87 = arith.constant 0 : index
      %198 = vector.load %arg9[%c0_86, %c0_87] : memref<1x256xf32, #tpu.memory_space<vmem>>, vector<1x256xf32>
      %199 = vector.broadcast %198 : vector<1x256xf32> to vector<32x256xf32>
      %200 = arith.addf %197, %199 : vector<32x256xf32>
      %c0_88 = arith.constant 0 : index
      %c0_89 = arith.constant 0 : index
      %201 = vector.load %arg10[%c0_88, %c0_89] : memref<1x256xf32, #tpu.memory_space<vmem>>, vector<1x256xf32>
      %c0_90 = arith.constant 0 : index
      %c0_91 = arith.constant 0 : index
      %202 = vector.load %arg11[%c0_90, %c0_91] : memref<1x256xf32, #tpu.memory_space<vmem>>, vector<1x256xf32>
      %cst_92 = arith.constant dense<0.000000e+00> : vector<32xf32>
      %203 = vector.multi_reduction <add>, %200, %cst_92 [1] : vector<32x256xf32> to vector<32xf32>
      %204 = vector.shape_cast %203 : vector<32xf32> to vector<32x1xf32>
      %cst_93 = arith.constant 2.560000e+02 : f32
      %205 = vector.broadcast %cst_93 : f32 to vector<32x1xf32>
      %206 = arith.divf %204, %205 : vector<32x1xf32>
      %207 = vector.broadcast %206 : vector<32x1xf32> to vector<32x256xf32>
      %208 = arith.subf %200, %207 : vector<32x256xf32>
      %209 = arith.mulf %208, %208 : vector<32x256xf32>
      %cst_94 = arith.constant dense<0.000000e+00> : vector<32xf32>
      %210 = vector.multi_reduction <add>, %209, %cst_94 [1] : vector<32x256xf32> to vector<32xf32>
      %211 = vector.shape_cast %210 : vector<32xf32> to vector<32x1xf32>
      %cst_95 = arith.constant 2.560000e+02 : f32
      %212 = vector.broadcast %cst_95 : f32 to vector<32x1xf32>
      %213 = arith.divf %211, %212 : vector<32x1xf32>
      %214 = vector.broadcast %206 : vector<32x1xf32> to vector<32x256xf32>
      %215 = arith.subf %200, %214 : vector<32x256xf32>
      %cst_96 = arith.constant 9.99999974E-6 : f32
      %216 = vector.broadcast %cst_96 : f32 to vector<32x1xf32>
      %217 = arith.addf %213, %216 : vector<32x1xf32>
      %218 = math.rsqrt %217 : vector<32x1xf32>
      %219 = vector.broadcast %218 : vector<32x1xf32> to vector<32x256xf32>
      %220 = arith.mulf %215, %219 : vector<32x256xf32>
      %221 = vector.broadcast %201 : vector<1x256xf32> to vector<32x256xf32>
      %222 = arith.mulf %220, %221 : vector<32x256xf32>
      %223 = vector.broadcast %202 : vector<1x256xf32> to vector<32x256xf32>
      %224 = arith.addf %222, %223 : vector<32x256xf32>
      %c0_97 = arith.constant 0 : index
      %c0_98 = arith.constant 0 : index
      %225 = vector.load %arg5[%c0_97, %c0_98] : memref<9x256xf32, #tpu.memory_space<vmem>>, vector<9x256xf32>
      %c0_99 = arith.constant 0 : index
      %c0_100 = arith.constant 0 : index
      %226 = vector.load %arg4[%c0_99, %c0_100] : memref<1x256xf32, #tpu.memory_space<vmem>>, vector<1x256xf32>
      %227 = vector.extract_strided_slice %225 {offsets = [0, 0], sizes = [1, 256], strides = [1, 1]} : vector<9x256xf32> to vector<1x256xf32>
      %228 = arith.addf %226, %227 : vector<1x256xf32>
      %229 = vector.extract_strided_slice %225 {offsets = [1, 0], sizes = [8, 256], strides = [1, 1]} : vector<9x256xf32> to vector<8x256xf32>
      %c0_101 = arith.constant 0 : index
      %c0_102 = arith.constant 0 : index
      %230 = vector.load %arg34[%c0_101, %c0_102] : memref<36x256xf32, #tpu.memory_space<vmem>>, vector<1x256xf32>
      tpu.vector_store %arg34[%c0_101, %c0_102], %228 {strides = array<i32>} : memref<36x256xf32, #tpu.memory_space<vmem>>, vector<1x256xf32>,
      %231 = vector.extract_strided_slice %224 {offsets = [0, 0], sizes = [8, 256], strides = [1, 1]} : vector<32x256xf32> to vector<8x256xf32>
      %232 = arith.addf %231, %229 : vector<8x256xf32>
      %c1 = arith.constant 1 : index
      %c0_103 = arith.constant 0 : index
      %233 = vector.load %arg34[%c1, %c0_103] : memref<36x256xf32, #tpu.memory_space<vmem>>, vector<8x256xf32>
      tpu.vector_store %arg34[%c1, %c0_103], %232 {strides = array<i32>} : memref<36x256xf32, #tpu.memory_space<vmem>>, vector<8x256xf32>,
      %c9 = arith.constant 9 : index
      %c0_104 = arith.constant 0 : index
      %234 = vector.load %arg34[%c9, %c0_104] : memref<36x256xf32, #tpu.memory_space<vmem>>, vector<1x256xf32>
      tpu.vector_store %arg34[%c9, %c0_104], %228 {strides = array<i32>} : memref<36x256xf32, #tpu.memory_space<vmem>>, vector<1x256xf32>,
      %235 = vector.extract_strided_slice %224 {offsets = [8, 0], sizes = [8, 256], strides = [1, 1]} : vector<32x256xf32> to vector<8x256xf32>
      %236 = arith.addf %235, %229 : vector<8x256xf32>
      %c10 = arith.constant 10 : index
      %c0_105 = arith.constant 0 : index
      %237 = vector.load %arg34[%c10, %c0_105] : memref<36x256xf32, #tpu.memory_space<vmem>>, vector<8x256xf32>
      tpu.vector_store %arg34[%c10, %c0_105], %236 {strides = array<i32>} : memref<36x256xf32, #tpu.memory_space<vmem>>, vector<8x256xf32>,
      %c18 = arith.constant 18 : index
      %c0_106 = arith.constant 0 : index
      %238 = vector.load %arg34[%c18, %c0_106] : memref<36x256xf32, #tpu.memory_space<vmem>>, vector<1x256xf32>
      tpu.vector_store %arg34[%c18, %c0_106], %228 {strides = array<i32>} : memref<36x256xf32, #tpu.memory_space<vmem>>, vector<1x256xf32>,
      %239 = vector.extract_strided_slice %224 {offsets = [16, 0], sizes = [8, 256], strides = [1, 1]} : vector<32x256xf32> to vector<8x256xf32>
      %240 = arith.addf %239, %229 : vector<8x256xf32>
      %c19 = arith.constant 19 : index
      %c0_107 = arith.constant 0 : index
      %241 = vector.load %arg34[%c19, %c0_107] : memref<36x256xf32, #tpu.memory_space<vmem>>, vector<8x256xf32>
      tpu.vector_store %arg34[%c19, %c0_107], %240 {strides = array<i32>} : memref<36x256xf32, #tpu.memory_space<vmem>>, vector<8x256xf32>,
      %c27 = arith.constant 27 : index
      %c0_108 = arith.constant 0 : index
      %242 = vector.load %arg34[%c27, %c0_108] : memref<36x256xf32, #tpu.memory_space<vmem>>, vector<1x256xf32>
      tpu.vector_store %arg34[%c27, %c0_108], %228 {strides = array<i32>} : memref<36x256xf32, #tpu.memory_space<vmem>>, vector<1x256xf32>,
      %243 = vector.extract_strided_slice %224 {offsets = [24, 0], sizes = [8, 256], strides = [1, 1]} : vector<32x256xf32> to vector<8x256xf32>
      %244 = arith.addf %243, %229 : vector<8x256xf32>
      %c28 = arith.constant 28 : index
      %c0_109 = arith.constant 0 : index
      %245 = vector.load %arg34[%c28, %c0_109] : memref<36x256xf32, #tpu.memory_space<vmem>>, vector<8x256xf32>
      tpu.vector_store %arg34[%c28, %c0_109], %244 {strides = array<i32>} : memref<36x256xf32, #tpu.memory_space<vmem>>, vector<8x256xf32>,
    } else {
    }
    %c0 = arith.constant 0 : index
    %c0_1 = arith.constant 0 : index
    %3 = vector.load %arg34[%c0, %c0_1] : memref<36x256xf32, #tpu.memory_space<vmem>>, vector<36x256xf32>
    %4 = tpu.iota {dimensions = array<i32: 0>} : vector<36x36xi32>
    %5 = arith.sitofp %4 : vector<36x36xi32> to vector<36x36xf32>
    %6 = tpu.iota {dimensions = array<i32: 1>} : vector<36x36xi32>
    %7 = arith.sitofp %6 : vector<36x36xi32> to vector<36x36xf32>
    %cst = arith.constant 5.000000e-01 : f32
    %8 = vector.broadcast %cst : f32 to vector<36x36xf32>
    %9 = arith.addf %5, %8 : vector<36x36xf32>
    %cst_2 = arith.constant 0.111111112 : f32
    %10 = vector.broadcast %cst_2 : f32 to vector<36x36xf32>
    %11 = arith.mulf %9, %10 : vector<36x36xf32>
    %12 = math.floor %11 : vector<36x36xf32>
    %cst_3 = arith.constant 5.000000e-01 : f32
    %13 = vector.broadcast %cst_3 : f32 to vector<36x36xf32>
    %14 = arith.addf %7, %13 : vector<36x36xf32>
    %cst_4 = arith.constant 0.111111112 : f32
    %15 = vector.broadcast %cst_4 : f32 to vector<36x36xf32>
    %16 = arith.mulf %14, %15 : vector<36x36xf32>
    %17 = math.floor %16 : vector<36x36xf32>
    %18 = arith.cmpf oeq, %12, %17 : vector<36x36xf32>
    %cst_5 = arith.constant 0.000000e+00 : f32
    %cst_6 = arith.constant -1.000000e+30 : f32
    %19 = vector.broadcast %cst_5 : f32 to vector<36x36xf32>
    %20 = vector.broadcast %cst_6 : f32 to vector<36x36xf32>
    %21 = arith.select %18, %19, %20 : vector<36x36xi1>, vector<36x36xf32>
    %c0_7 = arith.constant 0 : index
    %c0_8 = arith.constant 0 : index
    %c0_9 = arith.constant 0 : index
    %22 = vector.load %arg12[%c0_7, %c0_8, %c0_9] : memref<1x1x256xf32, #tpu.memory_space<vmem>>, vector<1x1x256xf32>
    %23 = vector.shape_cast %22 : vector<1x1x256xf32> to vector<1x256xf32>
    %c0_10 = arith.constant 0 : index
    %c0_11 = arith.constant 0 : index
    %c0_12 = arith.constant 0 : index
    %24 = vector.load %arg13[%c0_10, %c0_11, %c0_12] : memref<1x1x256xf32, #tpu.memory_space<vmem>>, vector<1x1x256xf32>
    %25 = vector.shape_cast %24 : vector<1x1x256xf32> to vector<1x256xf32>
    %cst_13 = arith.constant dense<0.000000e+00> : vector<36xf32>
    %26 = vector.multi_reduction <add>, %3, %cst_13 [1] : vector<36x256xf32> to vector<36xf32>
    %27 = vector.shape_cast %26 : vector<36xf32> to vector<36x1xf32>
    %cst_14 = arith.constant 2.560000e+02 : f32
    %28 = vector.broadcast %cst_14 : f32 to vector<36x1xf32>
    %29 = arith.divf %27, %28 : vector<36x1xf32>
    %30 = vector.broadcast %29 : vector<36x1xf32> to vector<36x256xf32>
    %31 = arith.subf %3, %30 : vector<36x256xf32>
    %32 = arith.mulf %31, %31 : vector<36x256xf32>
    %cst_15 = arith.constant dense<0.000000e+00> : vector<36xf32>
    %33 = vector.multi_reduction <add>, %32, %cst_15 [1] : vector<36x256xf32> to vector<36xf32>
    %34 = vector.shape_cast %33 : vector<36xf32> to vector<36x1xf32>
    %cst_16 = arith.constant 2.560000e+02 : f32
    %35 = vector.broadcast %cst_16 : f32 to vector<36x1xf32>
    %36 = arith.divf %34, %35 : vector<36x1xf32>
    %37 = vector.broadcast %29 : vector<36x1xf32> to vector<36x256xf32>
    %38 = arith.subf %3, %37 : vector<36x256xf32>
    %cst_17 = arith.constant 9.99999974E-6 : f32
    %39 = vector.broadcast %cst_17 : f32 to vector<36x1xf32>
    %40 = arith.addf %36, %39 : vector<36x1xf32>
    %41 = math.rsqrt %40 : vector<36x1xf32>
    %42 = vector.broadcast %41 : vector<36x1xf32> to vector<36x256xf32>
    %43 = arith.mulf %38, %42 : vector<36x256xf32>
    %44 = vector.broadcast %23 : vector<1x256xf32> to vector<36x256xf32>
    %45 = arith.mulf %43, %44 : vector<36x256xf32>
    %46 = vector.broadcast %25 : vector<1x256xf32> to vector<36x256xf32>
    %47 = arith.addf %45, %46 : vector<36x256xf32>
    %48 = arith.truncf %47 : vector<36x256xf32> to vector<36x256xbf16>
    %c0_18 = arith.constant 0 : index
    %c0_19 = arith.constant 0 : index
    %c0_20 = arith.constant 0 : index
    %49 = vector.load %arg14[%c0_18, %c0_19, %c0_20] : memref<1x256x768xbf16, #tpu.memory_space<vmem>>, vector<1x256x768xbf16>
    %50 = vector.shape_cast %49 : vector<1x256x768xbf16> to vector<256x768xbf16>
    %cst_21 = arith.constant dense<0.000000e+00> : vector<36x768xf32>
    %51 = tpu.matmul %48, %50, %cst_21 {dimension_numbers = #tpu.dot_dimension_numbers<[1], [0], [0], [1], [0, 0, 1, 1], [], []>} : vector<36x256xbf16>, vector<256x768xbf16>, vector<36x768xf32> -> vector<36x768xf32>
    %52 = vector.extract_strided_slice %51 {offsets = [0, 0], sizes = [36, 256], strides = [1, 1]} : vector<36x768xf32> to vector<36x256xf32>
    %53 = vector.extract_strided_slice %51 {offsets = [0, 256], sizes = [36, 256], strides = [1, 1]} : vector<36x768xf32> to vector<36x256xf32>
    %54 = vector.extract_strided_slice %51 {offsets = [0, 512], sizes = [36, 256], strides = [1, 1]} : vector<36x768xf32> to vector<36x256xf32>
    %55 = vector.extract_strided_slice %52 {offsets = [0, 0], sizes = [36, 128], strides = [1, 1]} : vector<36x256xf32> to vector<36x128xf32>
    %56 = arith.truncf %55 : vector<36x128xf32> to vector<36x128xbf16>
    %57 = vector.extract_strided_slice %53 {offsets = [0, 0], sizes = [36, 128], strides = [1, 1]} : vector<36x256xf32> to vector<36x128xf32>
    %58 = arith.truncf %57 : vector<36x128xf32> to vector<36x128xbf16>
    %59 = vector.extract_strided_slice %54 {offsets = [0, 0], sizes = [36, 128], strides = [1, 1]} : vector<36x256xf32> to vector<36x128xf32>
    %60 = arith.truncf %59 : vector<36x128xf32> to vector<36x128xbf16>
    %cst_22 = arith.constant dense<0.000000e+00> : vector<36x36xf32>
    %61 = tpu.matmul %56, %58, %cst_22 {dimension_numbers = #tpu.dot_dimension_numbers<[1], [1], [0], [0], [0, 0, 1, 0], [], []>} : vector<36x128xbf16>, vector<36x128xbf16>, vector<36x36xf32> -> vector<36x36xf32>
    %cst_23 = arith.constant 0.0883883461 : f32
    %62 = vector.broadcast %cst_23 : f32 to vector<36x36xf32>
    %63 = arith.mulf %61, %62 : vector<36x36xf32>
    %64 = arith.addf %63, %21 : vector<36x36xf32>
    %cst_24 = arith.constant dense<0xFF800000> : vector<36xf32>
    %65 = vector.multi_reduction <maximumf>, %64, %cst_24 [1] : vector<36x36xf32> to vector<36xf32>
    %66 = vector.shape_cast %65 : vector<36xf32> to vector<36x1xf32>
    %67 = vector.broadcast %66 : vector<36x1xf32> to vector<36x36xf32>
    %68 = arith.subf %64, %67 : vector<36x36xf32>
    %69 = math.exp %68 : vector<36x36xf32>
    %cst_25 = arith.constant dense<0.000000e+00> : vector<36xf32>
    %70 = vector.multi_reduction <add>, %69, %cst_25 [1] : vector<36x36xf32> to vector<36xf32>
    %71 = vector.shape_cast %70 : vector<36xf32> to vector<36x1xf32>
    %72 = tpu.reciprocal %71 {approx = true} : vector<36x1xf32> -> vector<36x1xf32>
    %73 = vector.broadcast %72 : vector<36x1xf32> to vector<36x36xf32>
    %74 = arith.mulf %69, %73 : vector<36x36xf32>
    %75 = arith.truncf %74 : vector<36x36xf32> to vector<36x36xbf16>
    %cst_26 = arith.constant dense<0.000000e+00> : vector<36x128xf32>
    %76 = tpu.matmul %75, %60, %cst_26 {dimension_numbers = #tpu.dot_dimension_numbers<[1], [0], [0], [1], [0, 0, 1, 1], [], []>} : vector<36x36xbf16>, vector<36x128xbf16>, vector<36x128xf32> -> vector<36x128xf32>
    %77 = vector.extract_strided_slice %52 {offsets = [0, 128], sizes = [36, 128], strides = [1, 1]} : vector<36x256xf32> to vector<36x128xf32>
    %78 = arith.truncf %77 : vector<36x128xf32> to vector<36x128xbf16>
    %79 = vector.extract_strided_slice %53 {offsets = [0, 128], sizes = [36, 128], strides = [1, 1]} : vector<36x256xf32> to vector<36x128xf32>
    %80 = arith.truncf %79 : vector<36x128xf32> to vector<36x128xbf16>
    %81 = vector.extract_strided_slice %54 {offsets = [0, 128], sizes = [36, 128], strides = [1, 1]} : vector<36x256xf32> to vector<36x128xf32>
    %82 = arith.truncf %81 : vector<36x128xf32> to vector<36x128xbf16>
    %cst_27 = arith.constant dense<0.000000e+00> : vector<36x36xf32>
    %83 = tpu.matmul %78, %80, %cst_27 {dimension_numbers = #tpu.dot_dimension_numbers<[1], [1], [0], [0], [0, 0, 1, 0], [], []>} : vector<36x128xbf16>, vector<36x128xbf16>, vector<36x36xf32> -> vector<36x36xf32>
    %cst_28 = arith.constant 0.0883883461 : f32
    %84 = vector.broadcast %cst_28 : f32 to vector<36x36xf32>
    %85 = arith.mulf %83, %84 : vector<36x36xf32>
    %86 = arith.addf %85, %21 : vector<36x36xf32>
    %cst_29 = arith.constant dense<0xFF800000> : vector<36xf32>
    %87 = vector.multi_reduction <maximumf>, %86, %cst_29 [1] : vector<36x36xf32> to vector<36xf32>
    %88 = vector.shape_cast %87 : vector<36xf32> to vector<36x1xf32>
    %89 = vector.broadcast %88 : vector<36x1xf32> to vector<36x36xf32>
    %90 = arith.subf %86, %89 : vector<36x36xf32>
    %91 = math.exp %90 : vector<36x36xf32>
    %cst_30 = arith.constant dense<0.000000e+00> : vector<36xf32>
    %92 = vector.multi_reduction <add>, %91, %cst_30 [1] : vector<36x36xf32> to vector<36xf32>
    %93 = vector.shape_cast %92 : vector<36xf32> to vector<36x1xf32>
    %94 = tpu.reciprocal %93 {approx = true} : vector<36x1xf32> -> vector<36x1xf32>
    %95 = vector.broadcast %94 : vector<36x1xf32> to vector<36x36xf32>
    %96 = arith.mulf %91, %95 : vector<36x36xf32>
    %97 = arith.truncf %96 : vector<36x36xf32> to vector<36x36xbf16>
    %cst_31 = arith.constant dense<0.000000e+00> : vector<36x128xf32>
    %98 = tpu.matmul %97, %82, %cst_31 {dimension_numbers = #tpu.dot_dimension_numbers<[1], [0], [0], [1], [0, 0, 1, 1], [], []>} : vector<36x36xbf16>, vector<36x128xbf16>, vector<36x128xf32> -> vector<36x128xf32>
    %99 = tpu.concatenate %76, %98 in 1 : vector<36x128xf32>, vector<36x128xf32> -> vector<36x256xf32>
    %100 = arith.truncf %99 : vector<36x256xf32> to vector<36x256xbf16>
    %c0_32 = arith.constant 0 : index
    %c0_33 = arith.constant 0 : index
    %c0_34 = arith.constant 0 : index
    %101 = vector.load %arg15[%c0_32, %c0_33, %c0_34] : memref<1x256x256xbf16, #tpu.memory_space<vmem>>, vector<1x256x256xbf16>
    %102 = vector.shape_cast %101 : vector<1x256x256xbf16> to vector<256x256xbf16>
    %cst_35 = arith.constant dense<0.000000e+00> : vector<36x256xf32>
    %103 = tpu.matmul %100, %102, %cst_35 {dimension_numbers = #tpu.dot_dimension_numbers<[1], [0], [0], [1], [0, 0, 1, 1], [], []>} : vector<36x256xbf16>, vector<256x256xbf16>, vector<36x256xf32> -> vector<36x256xf32>
    %104 = arith.addf %3, %103 : vector<36x256xf32>
    %c0_36 = arith.constant 0 : index
    %c0_37 = arith.constant 0 : index
    %c0_38 = arith.constant 0 : index
    %105 = vector.load %arg16[%c0_36, %c0_37, %c0_38] : memref<1x1x256xf32, #tpu.memory_space<vmem>>, vector<1x1x256xf32>
    %106 = vector.shape_cast %105 : vector<1x1x256xf32> to vector<1x256xf32>
    %107 = vector.broadcast %106 : vector<1x256xf32> to vector<36x256xf32>
    %108 = arith.addf %104, %107 : vector<36x256xf32>
    %c0_39 = arith.constant 0 : index
    %c0_40 = arith.constant 0 : index
    %c0_41 = arith.constant 0 : index
    %109 = vector.load %arg17[%c0_39, %c0_40, %c0_41] : memref<1x1x256xf32, #tpu.memory_space<vmem>>, vector<1x1x256xf32>
    %110 = vector.shape_cast %109 : vector<1x1x256xf32> to vector<1x256xf32>
    %c0_42 = arith.constant 0 : index
    %c0_43 = arith.constant 0 : index
    %c0_44 = arith.constant 0 : index
    %111 = vector.load %arg18[%c0_42, %c0_43, %c0_44] : memref<1x1x256xf32, #tpu.memory_space<vmem>>, vector<1x1x256xf32>
    %112 = vector.shape_cast %111 : vector<1x1x256xf32> to vector<1x256xf32>
    %cst_45 = arith.constant dense<0.000000e+00> : vector<36xf32>
    %113 = vector.multi_reduction <add>, %108, %cst_45 [1] : vector<36x256xf32> to vector<36xf32>
    %114 = vector.shape_cast %113 : vector<36xf32> to vector<36x1xf32>
    %cst_46 = arith.constant 2.560000e+02 : f32
    %115 = vector.broadcast %cst_46 : f32 to vector<36x1xf32>
    %116 = arith.divf %114, %115 : vector<36x1xf32>
    %117 = vector.broadcast %116 : vector<36x1xf32> to vector<36x256xf32>
    %118 = arith.subf %108, %117 : vector<36x256xf32>
    %119 = arith.mulf %118, %118 : vector<36x256xf32>
    %cst_47 = arith.constant dense<0.000000e+00> : vector<36xf32>
    %120 = vector.multi_reduction <add>, %119, %cst_47 [1] : vector<36x256xf32> to vector<36xf32>
    %121 = vector.shape_cast %120 : vector<36xf32> to vector<36x1xf32>
    %cst_48 = arith.constant 2.560000e+02 : f32
    %122 = vector.broadcast %cst_48 : f32 to vector<36x1xf32>
    %123 = arith.divf %121, %122 : vector<36x1xf32>
    %124 = vector.broadcast %116 : vector<36x1xf32> to vector<36x256xf32>
    %125 = arith.subf %108, %124 : vector<36x256xf32>
    %cst_49 = arith.constant 9.99999974E-6 : f32
    %126 = vector.broadcast %cst_49 : f32 to vector<36x1xf32>
    %127 = arith.addf %123, %126 : vector<36x1xf32>
    %128 = math.rsqrt %127 : vector<36x1xf32>
    %129 = vector.broadcast %128 : vector<36x1xf32> to vector<36x256xf32>
    %130 = arith.mulf %125, %129 : vector<36x256xf32>
    %131 = vector.broadcast %110 : vector<1x256xf32> to vector<36x256xf32>
    %132 = arith.mulf %130, %131 : vector<36x256xf32>
    %133 = vector.broadcast %112 : vector<1x256xf32> to vector<36x256xf32>
    %134 = arith.addf %132, %133 : vector<36x256xf32>
    %135 = arith.truncf %134 : vector<36x256xf32> to vector<36x256xbf16>
    %c0_50 = arith.constant 0 : index
    %c0_51 = arith.constant 0 : index
    %c0_52 = arith.constant 0 : index
    %136 = vector.load %arg19[%c0_50, %c0_51, %c0_52] : memref<1x256x256xbf16, #tpu.memory_space<vmem>>, vector<1x256x256xbf16>
    %137 = vector.shape_cast %136 : vector<1x256x256xbf16> to vector<256x256xbf16>
    %cst_53 = arith.constant dense<0.000000e+00> : vector<36x256xf32>
    %138 = tpu.matmul %135, %137, %cst_53 {dimension_numbers = #tpu.dot_dimension_numbers<[1], [0], [0], [1], [0, 0, 1, 1], [], []>} : vector<36x256xbf16>, vector<256x256xbf16>, vector<36x256xf32> -> vector<36x256xf32>
    %c0_54 = arith.constant 0 : index
    %c0_55 = arith.constant 0 : index
    %c0_56 = arith.constant 0 : index
    %139 = vector.load %arg20[%c0_54, %c0_55, %c0_56] : memref<1x1x256xf32, #tpu.memory_space<vmem>>, vector<1x1x256xf32>
    %140 = vector.shape_cast %139 : vector<1x1x256xf32> to vector<1x256xf32>
    %141 = vector.broadcast %140 : vector<1x256xf32> to vector<36x256xf32>
    %142 = arith.addf %138, %141 : vector<36x256xf32>
    %cst_57 = arith.constant 5.000000e-01 : f32
    %143 = vector.broadcast %cst_57 : f32 to vector<36x256xf32>
    %144 = arith.mulf %143, %142 : vector<36x256xf32>
    %cst_58 = arith.constant 4.471500e-02 : f32
    %145 = vector.broadcast %cst_58 : f32 to vector<36x256xf32>
    %146 = arith.mulf %145, %142 : vector<36x256xf32>
    %147 = arith.mulf %146, %142 : vector<36x256xf32>
    %148 = arith.mulf %147, %142 : vector<36x256xf32>
    %149 = arith.addf %142, %148 : vector<36x256xf32>
    %cst_59 = arith.constant 0.797884583 : f32
    %150 = vector.broadcast %cst_59 : f32 to vector<36x256xf32>
    %151 = arith.mulf %150, %149 : vector<36x256xf32>
    %152 = math.tanh %151 : vector<36x256xf32>
    %cst_60 = arith.constant 1.000000e+00 : f32
    %153 = vector.broadcast %cst_60 : f32 to vector<36x256xf32>
    %154 = arith.addf %153, %152 : vector<36x256xf32>
    %155 = arith.mulf %144, %154 : vector<36x256xf32>
    %156 = arith.truncf %155 : vector<36x256xf32> to vector<36x256xbf16>
    %c0_61 = arith.constant 0 : index
    %c0_62 = arith.constant 0 : index
    %c0_63 = arith.constant 0 : index
    %157 = vector.load %arg21[%c0_61, %c0_62, %c0_63] : memref<1x256x256xbf16, #tpu.memory_space<vmem>>, vector<1x256x256xbf16>
    %158 = vector.shape_cast %157 : vector<1x256x256xbf16> to vector<256x256xbf16>
    %cst_64 = arith.constant dense<0.000000e+00> : vector<36x256xf32>
    %159 = tpu.matmul %156, %158, %cst_64 {dimension_numbers = #tpu.dot_dimension_numbers<[1], [0], [0], [1], [0, 0, 1, 1], [], []>} : vector<36x256xbf16>, vector<256x256xbf16>, vector<36x256xf32> -> vector<36x256xf32>
    %160 = arith.addf %108, %159 : vector<36x256xf32>
    %c0_65 = arith.constant 0 : index
    %c0_66 = arith.constant 0 : index
    %c0_67 = arith.constant 0 : index
    %161 = vector.load %arg22[%c0_65, %c0_66, %c0_67] : memref<1x1x256xf32, #tpu.memory_space<vmem>>, vector<1x1x256xf32>
    %162 = vector.shape_cast %161 : vector<1x1x256xf32> to vector<1x256xf32>
    %163 = vector.broadcast %162 : vector<1x256xf32> to vector<36x256xf32>
    %164 = arith.addf %160, %163 : vector<36x256xf32>
    %c0_68 = arith.constant 0 : index
    %c0_69 = arith.constant 0 : index
    %165 = vector.load %arg34[%c0_68, %c0_69] : memref<36x256xf32, #tpu.memory_space<vmem>>, vector<36x256xf32>
    tpu.vector_store %arg34[%c0_68, %c0_69], %164 {strides = array<i32>} : memref<36x256xf32, #tpu.memory_space<vmem>>, vector<36x256xf32>,
    %c1_i32 = arith.constant 1 : i32
    %166 = arith.cmpi eq, %arg1, %c1_i32 : i32
    %167 = arith.extui %166 : i1 to i32
    %c0_i32_70 = arith.constant 0 : i32
    %168 = arith.cmpi ne, %167, %c0_i32_70 : i32
    scf.if %168 {
      %c0_71 = arith.constant 0 : index
      %c0_72 = arith.constant 0 : index
      %169 = vector.load %arg23[%c0_71, %c0_72] : memref<1x256xf32, #tpu.memory_space<vmem>>, vector<1x256xf32>
      %c0_73 = arith.constant 0 : index
      %c0_74 = arith.constant 0 : index
      %170 = vector.load %arg24[%c0_73, %c0_74] : memref<1x256xf32, #tpu.memory_space<vmem>>, vector<1x256xf32>
      %cst_75 = arith.constant dense<0.000000e+00> : vector<36xf32>
      %171 = vector.multi_reduction <add>, %164, %cst_75 [1] : vector<36x256xf32> to vector<36xf32>
      %172 = vector.shape_cast %171 : vector<36xf32> to vector<36x1xf32>
      %cst_76 = arith.constant 2.560000e+02 : f32
      %173 = vector.broadcast %cst_76 : f32 to vector<36x1xf32>
      %174 = arith.divf %172, %173 : vector<36x1xf32>
      %175 = vector.broadcast %174 : vector<36x1xf32> to vector<36x256xf32>
      %176 = arith.subf %164, %175 : vector<36x256xf32>
      %177 = arith.mulf %176, %176 : vector<36x256xf32>
      %cst_77 = arith.constant dense<0.000000e+00> : vector<36xf32>
      %178 = vector.multi_reduction <add>, %177, %cst_77 [1] : vector<36x256xf32> to vector<36xf32>
      %179 = vector.shape_cast %178 : vector<36xf32> to vector<36x1xf32>
      %cst_78 = arith.constant 2.560000e+02 : f32
      %180 = vector.broadcast %cst_78 : f32 to vector<36x1xf32>
      %181 = arith.divf %179, %180 : vector<36x1xf32>
      %182 = vector.broadcast %174 : vector<36x1xf32> to vector<36x256xf32>
      %183 = arith.subf %164, %182 : vector<36x256xf32>
      %cst_79 = arith.constant 9.99999974E-6 : f32
      %184 = vector.broadcast %cst_79 : f32 to vector<36x1xf32>
      %185 = arith.addf %181, %184 : vector<36x1xf32>
      %186 = math.rsqrt %185 : vector<36x1xf32>
      %187 = vector.broadcast %186 : vector<36x1xf32> to vector<36x256xf32>
      %188 = arith.mulf %183, %187 : vector<36x256xf32>
      %189 = vector.broadcast %169 : vector<1x256xf32> to vector<36x256xf32>
      %190 = arith.mulf %188, %189 : vector<36x256xf32>
      %191 = vector.broadcast %170 : vector<1x256xf32> to vector<36x256xf32>
      %192 = arith.addf %190, %191 : vector<36x256xf32>
      %193 = arith.truncf %192 : vector<36x256xf32> to vector<36x256xbf16>
      %c0_80 = arith.constant 0 : index
      %c0_81 = arith.constant 0 : index
      %194 = vector.load %arg25[%c0_80, %c0_81] : memref<256x128xbf16, #tpu.memory_space<vmem>>, vector<256x128xbf16>
      %cst_82 = arith.constant dense<0.000000e+00> : vector<36x128xf32>
      %195 = tpu.matmul %193, %194, %cst_82 {dimension_numbers = #tpu.dot_dimension_numbers<[1], [0], [0], [1], [0, 0, 1, 1], [], []>} : vector<36x256xbf16>, vector<256x128xbf16>, vector<36x128xf32> -> vector<36x128xf32>
      %c0_83 = arith.constant 0 : index
      %c0_84 = arith.constant 0 : index
      %196 = vector.load %arg26[%c0_83, %c0_84] : memref<1x128xf32, #tpu.memory_space<vmem>>, vector<1x128xf32>
      %197 = vector.broadcast %196 : vector<1x128xf32> to vector<36x128xf32>
      %198 = arith.addf %195, %197 : vector<36x128xf32>
      %c0_85 = arith.constant 0 : index
      %c0_86 = arith.constant 0 : index
      %199 = vector.load %arg35[%c0_85, %c0_86] : memref<36x128xf32, #tpu.memory_space<vmem>>, vector<36x128xf32>
      tpu.vector_store %arg35[%c0_85, %c0_86], %198 {strides = array<i32>} : memref<36x128xf32, #tpu.memory_space<vmem>>, vector<36x128xf32>,
      %c0_87 = arith.constant 0 : index
      %c0_88 = arith.constant 0 : index
      %c0_89 = arith.constant 0 : index
      %200 = vector.load %arg3[%c0_87, %c0_88, %c0_89] : memref<4x9x128xf32, #tpu.memory_space<vmem>>, vector<1x1x128xf32>
      %201 = vector.shape_cast %200 : vector<1x1x128xf32> to vector<1x128xf32>
      %c1 = arith.constant 1 : index
      %c0_90 = arith.constant 0 : index
      %c0_91 = arith.constant 0 : index
      %202 = vector.load %arg3[%c1, %c0_90, %c0_91] : memref<4x9x128xf32, #tpu.memory_space<vmem>>, vector<1x1x128xf32>
      %203 = vector.shape_cast %202 : vector<1x1x128xf32> to vector<1x128xf32>
      %c2 = arith.constant 2 : index
      %c0_92 = arith.constant 0 : index
      %c0_93 = arith.constant 0 : index
      %204 = vector.load %arg3[%c2, %c0_92, %c0_93] : memref<4x9x128xf32, #tpu.memory_space<vmem>>, vector<1x1x128xf32>
      %205 = vector.shape_cast %204 : vector<1x1x128xf32> to vector<1x128xf32>
      %c3 = arith.constant 3 : index
      %c0_94 = arith.constant 0 : index
      %c0_95 = arith.constant 0 : index
      %206 = vector.load %arg3[%c3, %c0_94, %c0_95] : memref<4x9x128xf32, #tpu.memory_space<vmem>>, vector<1x1x128xf32>
      %207 = vector.shape_cast %206 : vector<1x1x128xf32> to vector<1x128xf32>
      %208 = tpu.concatenate %201, %203, %205, %207 in 0 : vector<1x128xf32>, vector<1x128xf32>, vector<1x128xf32>, vector<1x128xf32> -> vector<4x128xf32>
      %209 = tpu.iota {dimensions = array<i32: 0>} : vector<4x36xi32>
      %210 = arith.sitofp %209 : vector<4x36xi32> to vector<4x36xf32>
      %211 = tpu.iota {dimensions = array<i32: 1>} : vector<4x36xi32>
      %212 = arith.sitofp %211 : vector<4x36xi32> to vector<4x36xf32>
      %cst_96 = arith.constant 5.000000e-01 : f32
      %213 = vector.broadcast %cst_96 : f32 to vector<4x36xf32>
      %214 = arith.addf %210, %213 : vector<4x36xf32>
      %cst_97 = arith.constant 1.000000e+00 : f32
      %215 = vector.broadcast %cst_97 : f32 to vector<4x36xf32>
      %216 = arith.mulf %214, %215 : vector<4x36xf32>
      %217 = math.floor %216 : vector<4x36xf32>
      %cst_98 = arith.constant 5.000000e-01 : f32
      %218 = vector.broadcast %cst_98 : f32 to vector<4x36xf32>
      %219 = arith.addf %212, %218 : vector<4x36xf32>
      %cst_99 = arith.constant 0.111111112 : f32
      %220 = vector.broadcast %cst_99 : f32 to vector<4x36xf32>
      %221 = arith.mulf %219, %220 : vector<4x36xf32>
      %222 = math.floor %221 : vector<4x36xf32>
      %223 = arith.cmpf oeq, %217, %222 : vector<4x36xf32>
      %cst_100 = arith.constant 0.000000e+00 : f32
      %cst_101 = arith.constant -1.000000e+30 : f32
      %224 = vector.broadcast %cst_100 : f32 to vector<4x36xf32>
      %225 = vector.broadcast %cst_101 : f32 to vector<4x36xf32>
      %226 = arith.select %223, %224, %225 : vector<4x36xi1>, vector<4x36xf32>
      %c0_102 = arith.constant 0 : index
      %c0_103 = arith.constant 0 : index
      %c0_104 = arith.constant 0 : index
      %227 = vector.load %arg27[%c0_102, %c0_103, %c0_104] : memref<2x1x128xf32, #tpu.memory_space<vmem>>, vector<1x1x128xf32>
      %228 = vector.shape_cast %227 : vector<1x1x128xf32> to vector<1x128xf32>
      %c0_105 = arith.constant 0 : index
      %c0_106 = arith.constant 0 : index
      %c0_107 = arith.constant 0 : index
      %229 = vector.load %arg28[%c0_105, %c0_106, %c0_107] : memref<2x1x128xf32, #tpu.memory_space<vmem>>, vector<1x1x128xf32>
      %230 = vector.shape_cast %229 : vector<1x1x128xf32> to vector<1x128xf32>
      %cst_108 = arith.constant dense<0.000000e+00> : vector<4xf32>
      %231 = vector.multi_reduction <add>, %208, %cst_108 [1] : vector<4x128xf32> to vector<4xf32>
      %232 = vector.shape_cast %231 : vector<4xf32> to vector<4x1xf32>
      %cst_109 = arith.constant 1.280000e+02 : f32
      %233 = vector.broadcast %cst_109 : f32 to vector<4x1xf32>
      %234 = arith.divf %232, %233 : vector<4x1xf32>
      %235 = vector.broadcast %234 : vector<4x1xf32> to vector<4x128xf32>
      %236 = arith.subf %208, %235 : vector<4x128xf32>
      %237 = arith.mulf %236, %236 : vector<4x128xf32>
      %cst_110 = arith.constant dense<0.000000e+00> : vector<4xf32>
      %238 = vector.multi_reduction <add>, %237, %cst_110 [1] : vector<4x128xf32> to vector<4xf32>
      %239 = vector.shape_cast %238 : vector<4xf32> to vector<4x1xf32>
      %cst_111 = arith.constant 1.280000e+02 : f32
      %240 = vector.broadcast %cst_111 : f32 to vector<4x1xf32>
      %241 = arith.divf %239, %240 : vector<4x1xf32>
      %242 = vector.broadcast %234 : vector<4x1xf32> to vector<4x128xf32>
      %243 = arith.subf %208, %242 : vector<4x128xf32>
      %cst_112 = arith.constant 9.99999974E-6 : f32
      %244 = vector.broadcast %cst_112 : f32 to vector<4x1xf32>
      %245 = arith.addf %241, %244 : vector<4x1xf32>
      %246 = math.rsqrt %245 : vector<4x1xf32>
      %247 = vector.broadcast %246 : vector<4x1xf32> to vector<4x128xf32>
      %248 = arith.mulf %243, %247 : vector<4x128xf32>
      %249 = vector.broadcast %228 : vector<1x128xf32> to vector<4x128xf32>
      %250 = arith.mulf %248, %249 : vector<4x128xf32>
      %251 = vector.broadcast %230 : vector<1x128xf32> to vector<4x128xf32>
      %252 = arith.addf %250, %251 : vector<4x128xf32>
      %253 = vector.extract_strided_slice %252 {offsets = [0, 0], sizes = [1, 128], strides = [1, 1]} : vector<4x128xf32> to vector<1x128xf32>
      %c0_113 = arith.constant 0 : index
      %c0_114 = arith.constant 0 : index
      %254 = vector.load %arg35[%c0_113, %c0_114] : memref<36x128xf32, #tpu.memory_space<vmem>>, vector<1x128xf32>
      tpu.vector_store %arg35[%c0_113, %c0_114], %253 {strides = array<i32>} : memref<36x128xf32, #tpu.memory_space<vmem>>, vector<1x128xf32>,
      %255 = vector.extract_strided_slice %252 {offsets = [1, 0], sizes = [1, 128], strides = [1, 1]} : vector<4x128xf32> to vector<1x128xf32>
      %c9 = arith.constant 9 : index
      %c0_115 = arith.constant 0 : index
      %256 = vector.load %arg35[%c9, %c0_115] : memref<36x128xf32, #tpu.memory_space<vmem>>, vector<1x128xf32>
      tpu.vector_store %arg35[%c9, %c0_115], %255 {strides = array<i32>} : memref<36x128xf32, #tpu.memory_space<vmem>>, vector<1x128xf32>,
      %257 = vector.extract_strided_slice %252 {offsets = [2, 0], sizes = [1, 128], strides = [1, 1]} : vector<4x128xf32> to vector<1x128xf32>
      %c18 = arith.constant 18 : index
      %c0_116 = arith.constant 0 : index
      %258 = vector.load %arg35[%c18, %c0_116] : memref<36x128xf32, #tpu.memory_space<vmem>>, vector<1x128xf32>
      tpu.vector_store %arg35[%c18, %c0_116], %257 {strides = array<i32>} : memref<36x128xf32, #tpu.memory_space<vmem>>, vector<1x128xf32>,
      %259 = vector.extract_strided_slice %252 {offsets = [3, 0], sizes = [1, 128], strides = [1, 1]} : vector<4x128xf32> to vector<1x128xf32>
      %c27 = arith.constant 27 : index
      %c0_117 = arith.constant 0 : index
      %260 = vector.load %arg35[%c27, %c0_117] : memref<36x128xf32, #tpu.memory_space<vmem>>, vector<1x128xf32>
      tpu.vector_store %arg35[%c27, %c0_117], %259 {strides = array<i32>} : memref<36x128xf32, #tpu.memory_space<vmem>>, vector<1x128xf32>,
      %261 = arith.truncf %252 : vector<4x128xf32> to vector<4x128xbf16>
      %c0_118 = arith.constant 0 : index
      %c0_119 = arith.constant 0 : index
      %c0_120 = arith.constant 0 : index
      %262 = vector.load %arg29[%c0_118, %c0_119, %c0_120] : memref<2x128x256xbf16, #tpu.memory_space<vmem>>, vector<1x128x256xbf16>
      %263 = vector.shape_cast %262 : vector<1x128x256xbf16> to vector<128x256xbf16>
      %cst_121 = arith.constant dense<0.000000e+00> : vector<4x256xf32>
      %264 = tpu.matmul %261, %263, %cst_121 {dimension_numbers = #tpu.dot_dimension_numbers<[1], [0], [0], [1], [0, 0, 1, 1], [], []>} : vector<4x128xbf16>, vector<128x256xbf16>, vector<4x256xf32> -> vector<4x256xf32>
      %c0_122 = arith.constant 0 : index
      %c0_123 = arith.constant 0 : index
      %265 = vector.load %arg35[%c0_122, %c0_123] : memref<36x128xf32, #tpu.memory_space<vmem>>, vector<36x128xf32>
      %266 = arith.truncf %265 : vector<36x128xf32> to vector<36x128xbf16>
      %c0_124 = arith.constant 0 : index
      %c0_125 = arith.constant 0 : index
      %c0_126 = arith.constant 0 : index
      %267 = vector.load %arg30[%c0_124, %c0_125, %c0_126] : memref<2x128x512xbf16, #tpu.memory_space<vmem>>, vector<1x128x512xbf16>
      %268 = vector.shape_cast %267 : vector<1x128x512xbf16> to vector<128x512xbf16>
      %cst_127 = arith.constant dense<0.000000e+00> : vector<36x512xf32>
      %269 = tpu.matmul %266, %268, %cst_127 {dimension_numbers = #tpu.dot_dimension_numbers<[1], [0], [0], [1], [0, 0, 1, 1], [], []>} : vector<36x128xbf16>, vector<128x512xbf16>, vector<36x512xf32> -> vector<36x512xf32>
      %270 = vector.extract_strided_slice %269 {offsets = [0, 0], sizes = [36, 256], strides = [1, 1]} : vector<36x512xf32> to vector<36x256xf32>
      %271 = vector.extract_strided_slice %269 {offsets = [0, 256], sizes = [36, 256], strides = [1, 1]} : vector<36x512xf32> to vector<36x256xf32>
      %272 = vector.extract_strided_slice %264 {offsets = [0, 0], sizes = [4, 128], strides = [1, 1]} : vector<4x256xf32> to vector<4x128xf32>
      %273 = arith.truncf %272 : vector<4x128xf32> to vector<4x128xbf16>
      %274 = vector.extract_strided_slice %270 {offsets = [0, 0], sizes = [36, 128], strides = [1, 1]} : vector<36x256xf32> to vector<36x128xf32>
      %275 = arith.truncf %274 : vector<36x128xf32> to vector<36x128xbf16>
      %276 = vector.extract_strided_slice %271 {offsets = [0, 0], sizes = [36, 128], strides = [1, 1]} : vector<36x256xf32> to vector<36x128xf32>
      %277 = arith.truncf %276 : vector<36x128xf32> to vector<36x128xbf16>
      %cst_128 = arith.constant dense<0.000000e+00> : vector<4x36xf32>
      %278 = tpu.matmul %273, %275, %cst_128 {dimension_numbers = #tpu.dot_dimension_numbers<[1], [1], [0], [0], [0, 0, 1, 0], [], []>} : vector<4x128xbf16>, vector<36x128xbf16>, vector<4x36xf32> -> vector<4x36xf32>
      %cst_129 = arith.constant 0.0883883461 : f32
      %279 = vector.broadcast %cst_129 : f32 to vector<4x36xf32>
      %280 = arith.mulf %278, %279 : vector<4x36xf32>
      %281 = arith.addf %280, %226 : vector<4x36xf32>
      %cst_130 = arith.constant dense<0xFF800000> : vector<4xf32>
      %282 = vector.multi_reduction <maximumf>, %281, %cst_130 [1] : vector<4x36xf32> to vector<4xf32>
      %283 = vector.shape_cast %282 : vector<4xf32> to vector<4x1xf32>
      %284 = vector.broadcast %283 : vector<4x1xf32> to vector<4x36xf32>
      %285 = arith.subf %281, %284 : vector<4x36xf32>
      %286 = math.exp %285 : vector<4x36xf32>
      %cst_131 = arith.constant dense<0.000000e+00> : vector<4xf32>
      %287 = vector.multi_reduction <add>, %286, %cst_131 [1] : vector<4x36xf32> to vector<4xf32>
      %288 = vector.shape_cast %287 : vector<4xf32> to vector<4x1xf32>
      %289 = tpu.reciprocal %288 {approx = true} : vector<4x1xf32> -> vector<4x1xf32>
      %290 = vector.broadcast %289 : vector<4x1xf32> to vector<4x36xf32>
      %291 = arith.mulf %286, %290 : vector<4x36xf32>
      %292 = arith.truncf %291 : vector<4x36xf32> to vector<4x36xbf16>
      %cst_132 = arith.constant dense<0.000000e+00> : vector<4x128xf32>
      %293 = tpu.matmul %292, %277, %cst_132 {dimension_numbers = #tpu.dot_dimension_numbers<[1], [0], [0], [1], [0, 0, 1, 1], [], []>} : vector<4x36xbf16>, vector<36x128xbf16>, vector<4x128xf32> -> vector<4x128xf32>
      %294 = vector.extract_strided_slice %264 {offsets = [0, 128], sizes = [4, 128], strides = [1, 1]} : vector<4x256xf32> to vector<4x128xf32>
      %295 = arith.truncf %294 : vector<4x128xf32> to vector<4x128xbf16>
      %296 = vector.extract_strided_slice %270 {offsets = [0, 128], sizes = [36, 128], strides = [1, 1]} : vector<36x256xf32> to vector<36x128xf32>
      %297 = arith.truncf %296 : vector<36x128xf32> to vector<36x128xbf16>
      %298 = vector.extract_strided_slice %271 {offsets = [0, 128], sizes = [36, 128], strides = [1, 1]} : vector<36x256xf32> to vector<36x128xf32>
      %299 = arith.truncf %298 : vector<36x128xf32> to vector<36x128xbf16>
      %cst_133 = arith.constant dense<0.000000e+00> : vector<4x36xf32>
      %300 = tpu.matmul %295, %297, %cst_133 {dimension_numbers = #tpu.dot_dimension_numbers<[1], [1], [0], [0], [0, 0, 1, 0], [], []>} : vector<4x128xbf16>, vector<36x128xbf16>, vector<4x36xf32> -> vector<4x36xf32>
      %cst_134 = arith.constant 0.0883883461 : f32
      %301 = vector.broadcast %cst_134 : f32 to vector<4x36xf32>
      %302 = arith.mulf %300, %301 : vector<4x36xf32>
      %303 = arith.addf %302, %226 : vector<4x36xf32>
      %cst_135 = arith.constant dense<0xFF800000> : vector<4xf32>
      %304 = vector.multi_reduction <maximumf>, %303, %cst_135 [1] : vector<4x36xf32> to vector<4xf32>
      %305 = vector.shape_cast %304 : vector<4xf32> to vector<4x1xf32>
      %306 = vector.broadcast %305 : vector<4x1xf32> to vector<4x36xf32>
      %307 = arith.subf %303, %306 : vector<4x36xf32>
      %308 = math.exp %307 : vector<4x36xf32>
      %cst_136 = arith.constant dense<0.000000e+00> : vector<4xf32>
      %309 = vector.multi_reduction <add>, %308, %cst_136 [1] : vector<4x36xf32> to vector<4xf32>
      %310 = vector.shape_cast %309 : vector<4xf32> to vector<4x1xf32>
      %311 = tpu.reciprocal %310 {approx = true} : vector<4x1xf32> -> vector<4x1xf32>
      %312 = vector.broadcast %311 : vector<4x1xf32> to vector<4x36xf32>
      %313 = arith.mulf %308, %312 : vector<4x36xf32>
      %314 = arith.truncf %313 : vector<4x36xf32> to vector<4x36xbf16>
      %cst_137 = arith.constant dense<0.000000e+00> : vector<4x128xf32>
      %315 = tpu.matmul %314, %299, %cst_137 {dimension_numbers = #tpu.dot_dimension_numbers<[1], [0], [0], [1], [0, 0, 1, 1], [], []>} : vector<4x36xbf16>, vector<36x128xbf16>, vector<4x128xf32> -> vector<4x128xf32>
      %316 = tpu.concatenate %293, %315 in 1 : vector<4x128xf32>, vector<4x128xf32> -> vector<4x256xf32>
      %317 = arith.truncf %316 : vector<4x256xf32> to vector<4x256xbf16>
      %c0_138 = arith.constant 0 : index
      %c0_139 = arith.constant 0 : index
      %c0_140 = arith.constant 0 : index
      %318 = vector.load %arg31[%c0_138, %c0_139, %c0_140] : memref<2x256x128xbf16, #tpu.memory_space<vmem>>, vector<1x256x128xbf16>
      %319 = vector.shape_cast %318 : vector<1x256x128xbf16> to vector<256x128xbf16>
      %cst_141 = arith.constant dense<0.000000e+00> : vector<4x128xf32>
      %320 = tpu.matmul %317, %319, %cst_141 {dimension_numbers = #tpu.dot_dimension_numbers<[1], [0], [0], [1], [0, 0, 1, 1], [], []>} : vector<4x256xbf16>, vector<256x128xbf16>, vector<4x128xf32> -> vector<4x128xf32>
      %321 = arith.addf %208, %320 : vector<4x128xf32>
      %c0_142 = arith.constant 0 : index
      %c0_143 = arith.constant 0 : index
      %c0_144 = arith.constant 0 : index
      %322 = vector.load %arg32[%c0_142, %c0_143, %c0_144] : memref<2x1x128xf32, #tpu.memory_space<vmem>>, vector<1x1x128xf32>
      %323 = vector.shape_cast %322 : vector<1x1x128xf32> to vector<1x128xf32>
      %324 = vector.broadcast %323 : vector<1x128xf32> to vector<4x128xf32>
      %325 = arith.addf %321, %324 : vector<4x128xf32>
      %c1_145 = arith.constant 1 : index
      %c0_146 = arith.constant 0 : index
      %c0_147 = arith.constant 0 : index
      %326 = vector.load %arg27[%c1_145, %c0_146, %c0_147] : memref<2x1x128xf32, #tpu.memory_space<vmem>>, vector<1x1x128xf32>
      %327 = vector.shape_cast %326 : vector<1x1x128xf32> to vector<1x128xf32>
      %c1_148 = arith.constant 1 : index
      %c0_149 = arith.constant 0 : index
      %c0_150 = arith.constant 0 : index
      %328 = vector.load %arg28[%c1_148, %c0_149, %c0_150] : memref<2x1x128xf32, #tpu.memory_space<vmem>>, vector<1x1x128xf32>
      %329 = vector.shape_cast %328 : vector<1x1x128xf32> to vector<1x128xf32>
      %cst_151 = arith.constant dense<0.000000e+00> : vector<4xf32>
      %330 = vector.multi_reduction <add>, %325, %cst_151 [1] : vector<4x128xf32> to vector<4xf32>
      %331 = vector.shape_cast %330 : vector<4xf32> to vector<4x1xf32>
      %cst_152 = arith.constant 1.280000e+02 : f32
      %332 = vector.broadcast %cst_152 : f32 to vector<4x1xf32>
      %333 = arith.divf %331, %332 : vector<4x1xf32>
      %334 = vector.broadcast %333 : vector<4x1xf32> to vector<4x128xf32>
      %335 = arith.subf %325, %334 : vector<4x128xf32>
      %336 = arith.mulf %335, %335 : vector<4x128xf32>
      %cst_153 = arith.constant dense<0.000000e+00> : vector<4xf32>
      %337 = vector.multi_reduction <add>, %336, %cst_153 [1] : vector<4x128xf32> to vector<4xf32>
      %338 = vector.shape_cast %337 : vector<4xf32> to vector<4x1xf32>
      %cst_154 = arith.constant 1.280000e+02 : f32
      %339 = vector.broadcast %cst_154 : f32 to vector<4x1xf32>
      %340 = arith.divf %338, %339 : vector<4x1xf32>
      %341 = vector.broadcast %333 : vector<4x1xf32> to vector<4x128xf32>
      %342 = arith.subf %325, %341 : vector<4x128xf32>
      %cst_155 = arith.constant 9.99999974E-6 : f32
      %343 = vector.broadcast %cst_155 : f32 to vector<4x1xf32>
      %344 = arith.addf %340, %343 : vector<4x1xf32>
      %345 = math.rsqrt %344 : vector<4x1xf32>
      %346 = vector.broadcast %345 : vector<4x1xf32> to vector<4x128xf32>
      %347 = arith.mulf %342, %346 : vector<4x128xf32>
      %348 = vector.broadcast %327 : vector<1x128xf32> to vector<4x128xf32>
      %349 = arith.mulf %347, %348 : vector<4x128xf32>
      %350 = vector.broadcast %329 : vector<1x128xf32> to vector<4x128xf32>
      %351 = arith.addf %349, %350 : vector<4x128xf32>
      %352 = vector.extract_strided_slice %351 {offsets = [0, 0], sizes = [1, 128], strides = [1, 1]} : vector<4x128xf32> to vector<1x128xf32>
      %c0_156 = arith.constant 0 : index
      %c0_157 = arith.constant 0 : index
      %353 = vector.load %arg35[%c0_156, %c0_157] : memref<36x128xf32, #tpu.memory_space<vmem>>, vector<1x128xf32>
      tpu.vector_store %arg35[%c0_156, %c0_157], %352 {strides = array<i32>} : memref<36x128xf32, #tpu.memory_space<vmem>>, vector<1x128xf32>,
      %354 = vector.extract_strided_slice %351 {offsets = [1, 0], sizes = [1, 128], strides = [1, 1]} : vector<4x128xf32> to vector<1x128xf32>
      %c9_158 = arith.constant 9 : index
      %c0_159 = arith.constant 0 : index
      %355 = vector.load %arg35[%c9_158, %c0_159] : memref<36x128xf32, #tpu.memory_space<vmem>>, vector<1x128xf32>
      tpu.vector_store %arg35[%c9_158, %c0_159], %354 {strides = array<i32>} : memref<36x128xf32, #tpu.memory_space<vmem>>, vector<1x128xf32>,
      %356 = vector.extract_strided_slice %351 {offsets = [2, 0], sizes = [1, 128], strides = [1, 1]} : vector<4x128xf32> to vector<1x128xf32>
      %c18_160 = arith.constant 18 : index
      %c0_161 = arith.constant 0 : index
      %357 = vector.load %arg35[%c18_160, %c0_161] : memref<36x128xf32, #tpu.memory_space<vmem>>, vector<1x128xf32>
      tpu.vector_store %arg35[%c18_160, %c0_161], %356 {strides = array<i32>} : memref<36x128xf32, #tpu.memory_space<vmem>>, vector<1x128xf32>,
      %358 = vector.extract_strided_slice %351 {offsets = [3, 0], sizes = [1, 128], strides = [1, 1]} : vector<4x128xf32> to vector<1x128xf32>
      %c27_162 = arith.constant 27 : index
      %c0_163 = arith.constant 0 : index
      %359 = vector.load %arg35[%c27_162, %c0_163] : memref<36x128xf32, #tpu.memory_space<vmem>>, vector<1x128xf32>
      tpu.vector_store %arg35[%c27_162, %c0_163], %358 {strides = array<i32>} : memref<36x128xf32, #tpu.memory_space<vmem>>, vector<1x128xf32>,
      %360 = arith.truncf %351 : vector<4x128xf32> to vector<4x128xbf16>
      %c1_164 = arith.constant 1 : index
      %c0_165 = arith.constant 0 : index
      %c0_166 = arith.constant 0 : index
      %361 = vector.load %arg29[%c1_164, %c0_165, %c0_166] : memref<2x128x256xbf16, #tpu.memory_space<vmem>>, vector<1x128x256xbf16>
      %362 = vector.shape_cast %361 : vector<1x128x256xbf16> to vector<128x256xbf16>
      %cst_167 = arith.constant dense<0.000000e+00> : vector<4x256xf32>
      %363 = tpu.matmul %360, %362, %cst_167 {dimension_numbers = #tpu.dot_dimension_numbers<[1], [0], [0], [1], [0, 0, 1, 1], [], []>} : vector<4x128xbf16>, vector<128x256xbf16>, vector<4x256xf32> -> vector<4x256xf32>
      %c0_168 = arith.constant 0 : index
      %c0_169 = arith.constant 0 : index
      %364 = vector.load %arg35[%c0_168, %c0_169] : memref<36x128xf32, #tpu.memory_space<vmem>>, vector<36x128xf32>
      %365 = arith.truncf %364 : vector<36x128xf32> to vector<36x128xbf16>
      %c1_170 = arith.constant 1 : index
      %c0_171 = arith.constant 0 : index
      %c0_172 = arith.constant 0 : index
      %366 = vector.load %arg30[%c1_170, %c0_171, %c0_172] : memref<2x128x512xbf16, #tpu.memory_space<vmem>>, vector<1x128x512xbf16>
      %367 = vector.shape_cast %366 : vector<1x128x512xbf16> to vector<128x512xbf16>
      %cst_173 = arith.constant dense<0.000000e+00> : vector<36x512xf32>
      %368 = tpu.matmul %365, %367, %cst_173 {dimension_numbers = #tpu.dot_dimension_numbers<[1], [0], [0], [1], [0, 0, 1, 1], [], []>} : vector<36x128xbf16>, vector<128x512xbf16>, vector<36x512xf32> -> vector<36x512xf32>
      %369 = vector.extract_strided_slice %368 {offsets = [0, 0], sizes = [36, 256], strides = [1, 1]} : vector<36x512xf32> to vector<36x256xf32>
      %370 = vector.extract_strided_slice %368 {offsets = [0, 256], sizes = [36, 256], strides = [1, 1]} : vector<36x512xf32> to vector<36x256xf32>
      %371 = vector.extract_strided_slice %363 {offsets = [0, 0], sizes = [4, 128], strides = [1, 1]} : vector<4x256xf32> to vector<4x128xf32>
      %372 = arith.truncf %371 : vector<4x128xf32> to vector<4x128xbf16>
      %373 = vector.extract_strided_slice %369 {offsets = [0, 0], sizes = [36, 128], strides = [1, 1]} : vector<36x256xf32> to vector<36x128xf32>
      %374 = arith.truncf %373 : vector<36x128xf32> to vector<36x128xbf16>
      %375 = vector.extract_strided_slice %370 {offsets = [0, 0], sizes = [36, 128], strides = [1, 1]} : vector<36x256xf32> to vector<36x128xf32>
      %376 = arith.truncf %375 : vector<36x128xf32> to vector<36x128xbf16>
      %cst_174 = arith.constant dense<0.000000e+00> : vector<4x36xf32>
      %377 = tpu.matmul %372, %374, %cst_174 {dimension_numbers = #tpu.dot_dimension_numbers<[1], [1], [0], [0], [0, 0, 1, 0], [], []>} : vector<4x128xbf16>, vector<36x128xbf16>, vector<4x36xf32> -> vector<4x36xf32>
      %cst_175 = arith.constant 0.0883883461 : f32
      %378 = vector.broadcast %cst_175 : f32 to vector<4x36xf32>
      %379 = arith.mulf %377, %378 : vector<4x36xf32>
      %380 = arith.addf %379, %226 : vector<4x36xf32>
      %cst_176 = arith.constant dense<0xFF800000> : vector<4xf32>
      %381 = vector.multi_reduction <maximumf>, %380, %cst_176 [1] : vector<4x36xf32> to vector<4xf32>
      %382 = vector.shape_cast %381 : vector<4xf32> to vector<4x1xf32>
      %383 = vector.broadcast %382 : vector<4x1xf32> to vector<4x36xf32>
      %384 = arith.subf %380, %383 : vector<4x36xf32>
      %385 = math.exp %384 : vector<4x36xf32>
      %cst_177 = arith.constant dense<0.000000e+00> : vector<4xf32>
      %386 = vector.multi_reduction <add>, %385, %cst_177 [1] : vector<4x36xf32> to vector<4xf32>
      %387 = vector.shape_cast %386 : vector<4xf32> to vector<4x1xf32>
      %388 = tpu.reciprocal %387 {approx = true} : vector<4x1xf32> -> vector<4x1xf32>
      %389 = vector.broadcast %388 : vector<4x1xf32> to vector<4x36xf32>
      %390 = arith.mulf %385, %389 : vector<4x36xf32>
      %391 = arith.truncf %390 : vector<4x36xf32> to vector<4x36xbf16>
      %cst_178 = arith.constant dense<0.000000e+00> : vector<4x128xf32>
      %392 = tpu.matmul %391, %376, %cst_178 {dimension_numbers = #tpu.dot_dimension_numbers<[1], [0], [0], [1], [0, 0, 1, 1], [], []>} : vector<4x36xbf16>, vector<36x128xbf16>, vector<4x128xf32> -> vector<4x128xf32>
      %393 = vector.extract_strided_slice %363 {offsets = [0, 128], sizes = [4, 128], strides = [1, 1]} : vector<4x256xf32> to vector<4x128xf32>
      %394 = arith.truncf %393 : vector<4x128xf32> to vector<4x128xbf16>
      %395 = vector.extract_strided_slice %369 {offsets = [0, 128], sizes = [36, 128], strides = [1, 1]} : vector<36x256xf32> to vector<36x128xf32>
      %396 = arith.truncf %395 : vector<36x128xf32> to vector<36x128xbf16>
      %397 = vector.extract_strided_slice %370 {offsets = [0, 128], sizes = [36, 128], strides = [1, 1]} : vector<36x256xf32> to vector<36x128xf32>
      %398 = arith.truncf %397 : vector<36x128xf32> to vector<36x128xbf16>
      %cst_179 = arith.constant dense<0.000000e+00> : vector<4x36xf32>
      %399 = tpu.matmul %394, %396, %cst_179 {dimension_numbers = #tpu.dot_dimension_numbers<[1], [1], [0], [0], [0, 0, 1, 0], [], []>} : vector<4x128xbf16>, vector<36x128xbf16>, vector<4x36xf32> -> vector<4x36xf32>
      %cst_180 = arith.constant 0.0883883461 : f32
      %400 = vector.broadcast %cst_180 : f32 to vector<4x36xf32>
      %401 = arith.mulf %399, %400 : vector<4x36xf32>
      %402 = arith.addf %401, %226 : vector<4x36xf32>
      %cst_181 = arith.constant dense<0xFF800000> : vector<4xf32>
      %403 = vector.multi_reduction <maximumf>, %402, %cst_181 [1] : vector<4x36xf32> to vector<4xf32>
      %404 = vector.shape_cast %403 : vector<4xf32> to vector<4x1xf32>
      %405 = vector.broadcast %404 : vector<4x1xf32> to vector<4x36xf32>
      %406 = arith.subf %402, %405 : vector<4x36xf32>
      %407 = math.exp %406 : vector<4x36xf32>
      %cst_182 = arith.constant dense<0.000000e+00> : vector<4xf32>
      %408 = vector.multi_reduction <add>, %407, %cst_182 [1] : vector<4x36xf32> to vector<4xf32>
      %409 = vector.shape_cast %408 : vector<4xf32> to vector<4x1xf32>
      %410 = tpu.reciprocal %409 {approx = true} : vector<4x1xf32> -> vector<4x1xf32>
      %411 = vector.broadcast %410 : vector<4x1xf32> to vector<4x36xf32>
      %412 = arith.mulf %407, %411 : vector<4x36xf32>
      %413 = arith.truncf %412 : vector<4x36xf32> to vector<4x36xbf16>
      %cst_183 = arith.constant dense<0.000000e+00> : vector<4x128xf32>
      %414 = tpu.matmul %413, %398, %cst_183 {dimension_numbers = #tpu.dot_dimension_numbers<[1], [0], [0], [1], [0, 0, 1, 1], [], []>} : vector<4x36xbf16>, vector<36x128xbf16>, vector<4x128xf32> -> vector<4x128xf32>
      %415 = tpu.concatenate %392, %414 in 1 : vector<4x128xf32>, vector<4x128xf32> -> vector<4x256xf32>
      %416 = arith.truncf %415 : vector<4x256xf32> to vector<4x256xbf16>
      %c1_184 = arith.constant 1 : index
      %c0_185 = arith.constant 0 : index
      %c0_186 = arith.constant 0 : index
      %417 = vector.load %arg31[%c1_184, %c0_185, %c0_186] : memref<2x256x128xbf16, #tpu.memory_space<vmem>>, vector<1x256x128xbf16>
      %418 = vector.shape_cast %417 : vector<1x256x128xbf16> to vector<256x128xbf16>
      %cst_187 = arith.constant dense<0.000000e+00> : vector<4x128xf32>
      %419 = tpu.matmul %416, %418, %cst_187 {dimension_numbers = #tpu.dot_dimension_numbers<[1], [0], [0], [1], [0, 0, 1, 1], [], []>} : vector<4x256xbf16>, vector<256x128xbf16>, vector<4x128xf32> -> vector<4x128xf32>
      %420 = arith.addf %325, %419 : vector<4x128xf32>
      %c1_188 = arith.constant 1 : index
      %c0_189 = arith.constant 0 : index
      %c0_190 = arith.constant 0 : index
      %421 = vector.load %arg32[%c1_188, %c0_189, %c0_190] : memref<2x1x128xf32, #tpu.memory_space<vmem>>, vector<1x1x128xf32>
      %422 = vector.shape_cast %421 : vector<1x1x128xf32> to vector<1x128xf32>
      %423 = vector.broadcast %422 : vector<1x128xf32> to vector<4x128xf32>
      %424 = arith.addf %420, %423 : vector<4x128xf32>
      %c0_191 = arith.constant 0 : index
      %c1_192 = arith.constant 1 : index
      %c0_193 = arith.constant 0 : index
      %425 = vector.load %arg3[%c0_191, %c1_192, %c0_193] : memref<4x9x128xf32, #tpu.memory_space<vmem>>, vector<4x8x128xf32>
      %c0_194 = arith.constant 0 : index
      %c1_195 = arith.constant 1 : index
      %c0_196 = arith.constant 0 : index
      %426 = vector.load %arg33[%c0_194, %c1_195, %c0_196] : memref<4x9x128xf32, #tpu.memory_space<vmem>>, vector<4x8x128xf32>
      tpu.vector_store %arg33[%c0_194, %c1_195, %c0_196], %425 {strides = array<i32>} : memref<4x9x128xf32, #tpu.memory_space<vmem>>, vector<4x8x128xf32>,
      %427 = vector.extract_strided_slice %424 {offsets = [0, 0], sizes = [1, 128], strides = [1, 1]} : vector<4x128xf32> to vector<1x128xf32>
      %c0_197 = arith.constant 0 : index
      %c0_198 = arith.constant 0 : index
      %c0_199 = arith.constant 0 : index
      %428 = vector.load %arg33[%c0_197, %c0_198, %c0_199] : memref<4x9x128xf32, #tpu.memory_space<vmem>>, vector<1x1x128xf32>
      %429 = vector.shape_cast %428 : vector<1x1x128xf32> to vector<1x128xf32>
      %430 = vector.shape_cast %427 : vector<1x128xf32> to vector<1x1x128xf32>
      tpu.vector_store %arg33[%c0_197, %c0_198, %c0_199], %430 {strides = array<i32>} : memref<4x9x128xf32, #tpu.memory_space<vmem>>, vector<1x1x128xf32>,
      %431 = vector.extract_strided_slice %424 {offsets = [1, 0], sizes = [1, 128], strides = [1, 1]} : vector<4x128xf32> to vector<1x128xf32>
      %c1_200 = arith.constant 1 : index
      %c0_201 = arith.constant 0 : index
      %c0_202 = arith.constant 0 : index
      %432 = vector.load %arg33[%c1_200, %c0_201, %c0_202] : memref<4x9x128xf32, #tpu.memory_space<vmem>>, vector<1x1x128xf32>
      %433 = vector.shape_cast %432 : vector<1x1x128xf32> to vector<1x128xf32>
      %434 = vector.shape_cast %431 : vector<1x128xf32> to vector<1x1x128xf32>
      tpu.vector_store %arg33[%c1_200, %c0_201, %c0_202], %434 {strides = array<i32>} : memref<4x9x128xf32, #tpu.memory_space<vmem>>, vector<1x1x128xf32>,
      %435 = vector.extract_strided_slice %424 {offsets = [2, 0], sizes = [1, 128], strides = [1, 1]} : vector<4x128xf32> to vector<1x128xf32>
      %c2_203 = arith.constant 2 : index
      %c0_204 = arith.constant 0 : index
      %c0_205 = arith.constant 0 : index
      %436 = vector.load %arg33[%c2_203, %c0_204, %c0_205] : memref<4x9x128xf32, #tpu.memory_space<vmem>>, vector<1x1x128xf32>
      %437 = vector.shape_cast %436 : vector<1x1x128xf32> to vector<1x128xf32>
      %438 = vector.shape_cast %435 : vector<1x128xf32> to vector<1x1x128xf32>
      tpu.vector_store %arg33[%c2_203, %c0_204, %c0_205], %438 {strides = array<i32>} : memref<4x9x128xf32, #tpu.memory_space<vmem>>, vector<1x1x128xf32>,
      %439 = vector.extract_strided_slice %424 {offsets = [3, 0], sizes = [1, 128], strides = [1, 1]} : vector<4x128xf32> to vector<1x128xf32>
      %c3_206 = arith.constant 3 : index
      %c0_207 = arith.constant 0 : index
      %c0_208 = arith.constant 0 : index
      %440 = vector.load %arg33[%c3_206, %c0_207, %c0_208] : memref<4x9x128xf32, #tpu.memory_space<vmem>>, vector<1x1x128xf32>
      %441 = vector.shape_cast %440 : vector<1x1x128xf32> to vector<1x128xf32>
      %442 = vector.shape_cast %439 : vector<1x128xf32> to vector<1x1x128xf32>
      tpu.vector_store %arg33[%c3_206, %c0_207, %c0_208], %442 {strides = array<i32>} : memref<4x9x128xf32, #tpu.memory_space<vmem>>, vector<1x1x128xf32>,
    } else {
    }
    return
  }
  func.func @transform_0(%arg0: i32, %arg1: i32) -> (i32, i32, i32) {
    %c0_i32 = arith.constant 0 : i32
    %c0_i32_0 = arith.constant 0 : i32
    %c0_i32_1 = arith.constant 0 : i32
    return %arg0, %c0_i32, %c0_i32_0 : i32, i32, i32
  }
  func.func @transform_1(%arg0: i32, %arg1: i32) -> (i32, i32, i32) {
    %c0_i32 = arith.constant 0 : i32
    %c0_i32_0 = arith.constant 0 : i32
    %c0_i32_1 = arith.constant 0 : i32
    return %arg0, %c0_i32, %c0_i32_0 : i32, i32, i32
  }
  func.func @transform_2(%arg0: i32, %arg1: i32) -> (i32, i32) {
    %c0_i32 = arith.constant 0 : i32
    %c0_i32_0 = arith.constant 0 : i32
    %c0_i32_1 = arith.constant 0 : i32
    return %c0_i32, %c0_i32_0 : i32, i32
  }
  func.func @transform_3(%arg0: i32, %arg1: i32) -> (i32, i32) {
    %c0_i32 = arith.constant 0 : i32
    %c0_i32_0 = arith.constant 0 : i32
    %c0_i32_1 = arith.constant 0 : i32
    return %c0_i32, %c0_i32_0 : i32, i32
  }
  func.func @transform_4(%arg0: i32, %arg1: i32) -> (i32, i32) {
    %c0_i32 = arith.constant 0 : i32
    %c0_i32_0 = arith.constant 0 : i32
    %c0_i32_1 = arith.constant 0 : i32
    return %c0_i32, %c0_i32_0 : i32, i32
  }
  func.func @transform_5(%arg0: i32, %arg1: i32) -> (i32, i32) {
    %c0_i32 = arith.constant 0 : i32
    %c0_i32_0 = arith.constant 0 : i32
    %c0_i32_1 = arith.constant 0 : i32
    return %c0_i32, %c0_i32_0 : i32, i32
  }
  func.func @transform_6(%arg0: i32, %arg1: i32) -> (i32, i32) {
    %c0_i32 = arith.constant 0 : i32
    %c0_i32_0 = arith.constant 0 : i32
    %c0_i32_1 = arith.constant 0 : i32
    return %c0_i32, %c0_i32_0 : i32, i32
  }
  func.func @transform_7(%arg0: i32, %arg1: i32) -> (i32, i32) {
    %c0_i32 = arith.constant 0 : i32
    %c0_i32_0 = arith.constant 0 : i32
    %c0_i32_1 = arith.constant 0 : i32
    return %c0_i32, %c0_i32_0 : i32, i32
  }
  func.func @transform_8(%arg0: i32, %arg1: i32) -> (i32, i32) {
    %c0_i32 = arith.constant 0 : i32
    %c0_i32_0 = arith.constant 0 : i32
    %c0_i32_1 = arith.constant 0 : i32
    return %c0_i32, %c0_i32_0 : i32, i32
  }
  func.func @transform_9(%arg0: i32, %arg1: i32) -> (i32, i32) {
    %c0_i32 = arith.constant 0 : i32
    %c0_i32_0 = arith.constant 0 : i32
    %c0_i32_1 = arith.constant 0 : i32
    return %c0_i32, %c0_i32_0 : i32, i32
  }
  func.func @transform_10(%arg0: i32, %arg1: i32) -> (i32, i32, i32) {
    %c0_i32 = arith.constant 0 : i32
    %c0_i32_0 = arith.constant 0 : i32
    %c0_i32_1 = arith.constant 0 : i32
    return %arg1, %c0_i32, %c0_i32_0 : i32, i32, i32
  }
  func.func @transform_11(%arg0: i32, %arg1: i32) -> (i32, i32, i32) {
    %c0_i32 = arith.constant 0 : i32
    %c0_i32_0 = arith.constant 0 : i32
    %c0_i32_1 = arith.constant 0 : i32
    return %arg1, %c0_i32, %c0_i32_0 : i32, i32, i32
  }
  func.func @transform_12(%arg0: i32, %arg1: i32) -> (i32, i32, i32) {
    %c0_i32 = arith.constant 0 : i32
    %c0_i32_0 = arith.constant 0 : i32
    %c0_i32_1 = arith.constant 0 : i32
    return %arg1, %c0_i32, %c0_i32_0 : i32, i32, i32
  }
  func.func @transform_13(%arg0: i32, %arg1: i32) -> (i32, i32, i32) {
    %c0_i32 = arith.constant 0 : i32
    %c0_i32_0 = arith.constant 0 : i32
    %c0_i32_1 = arith.constant 0 : i32
    return %arg1, %c0_i32, %c0_i32_0 : i32, i32, i32
  }
  func.func @transform_14(%arg0: i32, %arg1: i32) -> (i32, i32, i32) {
    %c0_i32 = arith.constant 0 : i32
    %c0_i32_0 = arith.constant 0 : i32
    %c0_i32_1 = arith.constant 0 : i32
    return %arg1, %c0_i32, %c0_i32_0 : i32, i32, i32
  }
  func.func @transform_15(%arg0: i32, %arg1: i32) -> (i32, i32, i32) {
    %c0_i32 = arith.constant 0 : i32
    %c0_i32_0 = arith.constant 0 : i32
    %c0_i32_1 = arith.constant 0 : i32
    return %arg1, %c0_i32, %c0_i32_0 : i32, i32, i32
  }
  func.func @transform_16(%arg0: i32, %arg1: i32) -> (i32, i32, i32) {
    %c0_i32 = arith.constant 0 : i32
    %c0_i32_0 = arith.constant 0 : i32
    %c0_i32_1 = arith.constant 0 : i32
    return %arg1, %c0_i32, %c0_i32_0 : i32, i32, i32
  }
  func.func @transform_17(%arg0: i32, %arg1: i32) -> (i32, i32, i32) {
    %c0_i32 = arith.constant 0 : i32
    %c0_i32_0 = arith.constant 0 : i32
    %c0_i32_1 = arith.constant 0 : i32
    return %arg1, %c0_i32, %c0_i32_0 : i32, i32, i32
  }
  func.func @transform_18(%arg0: i32, %arg1: i32) -> (i32, i32, i32) {
    %c0_i32 = arith.constant 0 : i32
    %c0_i32_0 = arith.constant 0 : i32
    %c0_i32_1 = arith.constant 0 : i32
    return %arg1, %c0_i32, %c0_i32_0 : i32, i32, i32
  }
  func.func @transform_19(%arg0: i32, %arg1: i32) -> (i32, i32, i32) {
    %c0_i32 = arith.constant 0 : i32
    %c0_i32_0 = arith.constant 0 : i32
    %c0_i32_1 = arith.constant 0 : i32
    return %arg1, %c0_i32, %c0_i32_0 : i32, i32, i32
  }
  func.func @transform_20(%arg0: i32, %arg1: i32) -> (i32, i32, i32) {
    %c0_i32 = arith.constant 0 : i32
    %c0_i32_0 = arith.constant 0 : i32
    %c0_i32_1 = arith.constant 0 : i32
    return %arg1, %c0_i32, %c0_i32_0 : i32, i32, i32
  }
  func.func @transform_21(%arg0: i32, %arg1: i32) -> (i32, i32) {
    %c0_i32 = arith.constant 0 : i32
    %c0_i32_0 = arith.constant 0 : i32
    %c0_i32_1 = arith.constant 0 : i32
    return %c0_i32, %c0_i32_0 : i32, i32
  }
  func.func @transform_22(%arg0: i32, %arg1: i32) -> (i32, i32) {
    %c0_i32 = arith.constant 0 : i32
    %c0_i32_0 = arith.constant 0 : i32
    %c0_i32_1 = arith.constant 0 : i32
    return %c0_i32, %c0_i32_0 : i32, i32
  }
  func.func @transform_23(%arg0: i32, %arg1: i32) -> (i32, i32) {
    %c0_i32 = arith.constant 0 : i32
    %c0_i32_0 = arith.constant 0 : i32
    %c0_i32_1 = arith.constant 0 : i32
    return %c0_i32, %c0_i32_0 : i32, i32
  }
  func.func @transform_24(%arg0: i32, %arg1: i32) -> (i32, i32) {
    %c0_i32 = arith.constant 0 : i32
    %c0_i32_0 = arith.constant 0 : i32
    %c0_i32_1 = arith.constant 0 : i32
    return %c0_i32, %c0_i32_0 : i32, i32
  }
  func.func @transform_25(%arg0: i32, %arg1: i32) -> (i32, i32, i32) {
    %c0_i32 = arith.constant 0 : i32
    %c0_i32_0 = arith.constant 0 : i32
    %c0_i32_1 = arith.constant 0 : i32
    %c0_i32_2 = arith.constant 0 : i32
    return %c0_i32, %c0_i32_0, %c0_i32_1 : i32, i32, i32
  }
  func.func @transform_26(%arg0: i32, %arg1: i32) -> (i32, i32, i32) {
    %c0_i32 = arith.constant 0 : i32
    %c0_i32_0 = arith.constant 0 : i32
    %c0_i32_1 = arith.constant 0 : i32
    %c0_i32_2 = arith.constant 0 : i32
    return %c0_i32, %c0_i32_0, %c0_i32_1 : i32, i32, i32
  }
  func.func @transform_27(%arg0: i32, %arg1: i32) -> (i32, i32, i32) {
    %c0_i32 = arith.constant 0 : i32
    %c0_i32_0 = arith.constant 0 : i32
    %c0_i32_1 = arith.constant 0 : i32
    %c0_i32_2 = arith.constant 0 : i32
    return %c0_i32, %c0_i32_0, %c0_i32_1 : i32, i32, i32
  }
  func.func @transform_28(%arg0: i32, %arg1: i32) -> (i32, i32, i32) {
    %c0_i32 = arith.constant 0 : i32
    %c0_i32_0 = arith.constant 0 : i32
    %c0_i32_1 = arith.constant 0 : i32
    %c0_i32_2 = arith.constant 0 : i32
    return %c0_i32, %c0_i32_0, %c0_i32_1 : i32, i32, i32
  }
  func.func @transform_29(%arg0: i32, %arg1: i32) -> (i32, i32, i32) {
    %c0_i32 = arith.constant 0 : i32
    %c0_i32_0 = arith.constant 0 : i32
    %c0_i32_1 = arith.constant 0 : i32
    %c0_i32_2 = arith.constant 0 : i32
    return %c0_i32, %c0_i32_0, %c0_i32_1 : i32, i32, i32
  }
  func.func @transform_30(%arg0: i32, %arg1: i32) -> (i32, i32, i32) {
    %c0_i32 = arith.constant 0 : i32
    %c0_i32_0 = arith.constant 0 : i32
    %c0_i32_1 = arith.constant 0 : i32
    %c0_i32_2 = arith.constant 0 : i32
    return %c0_i32, %c0_i32_0, %c0_i32_1 : i32, i32, i32
  }
  func.func @transform_31(%arg0: i32, %arg1: i32) -> (i32, i32, i32) {
    %c0_i32 = arith.constant 0 : i32
    %c0_i32_0 = arith.constant 0 : i32
    %c0_i32_1 = arith.constant 0 : i32
    return %arg0, %c0_i32, %c0_i32_0 : i32, i32, i32
  }
}

</mosaic_0001>

<bundles_post_ra>
// kernel: _lambda_.1
= control target key start
LH: loop header
LB: loop body
LE: loop exit
PB: predicated region body
PF: predicated region fallthrough
CT: control target
= control target key end

     0   :  { %s8171_s6 = smov 1   ;;  %s8172_s10 = smov 2   ;;  %s9675_s0 = inlined_call_operand.smem [shape: u32[32], index: -1, kind: input, shape index: {}] }
   0x1   :  { %s8218_s5 = sld [smem:[%s9675_s0]]   ;;  %s8173_s14 = smov 3  }
   0x2   :  { %s8223_s9 = sld [smem:[%s9675_s0 + %s8171_s6]]   ;;  %s8174_s18 = smov 4  }
   0x3   :  { %s8228_s13 = sld [smem:[%s9675_s0 + %s8172_s10]]   ;;  %s8175_s22 = smov 5  }
   0x4   :  { %s8233_s17 = sld [smem:[%s9675_s0 + %s8173_s14]]   ;;  %s8176_s26 = smov 6  }
   0x5   :  { %s8238_s21 = sld [smem:[%s9675_s0 + %s8174_s18]]   ;;  %s8177_s30 = smov 7  }
   0x6   :  { %s8243_s25 = sld [smem:[%s9675_s0 + %s8175_s22]]   ;;  %s8178_s4 = smov 8  }
   0x7   :  { %9689 = sst [smem:[#allocation4_spill]] %s8218_s5  ;;  %s8179_s10 = smov 9  }
   0x8   :  { %s8248_s29 = sld [smem:[%s9675_s0 + %s8176_s26]]   ;;  %s8180_s15 = smov 10  }
   0x9   :  { %9690 = sst [smem:[#allocation5_spill]] %s8228_s13  ;;  %s8181_s20 = smov 11  }
   0xa   :  { %9691 = sst [smem:[#allocation6_spill]] %s8233_s17  ;;  %s8182_s26 = smov 12  }
   0xb   :  { %9692 = sst [smem:[#allocation7_spill]] %s8238_s21  ;;  %s8183_s1 = smov 13  }
   0xc   :  { %9693 = sst [smem:[#allocation8_spill]] %s8243_s25  ;;  %s8184_s7 = smov 14  }
   0xd   :  { %s8253_s3 = sld [smem:[%s9675_s0 + %s8177_s30]]   ;;  %s8186_s22 = smov 16  }
   0xe   :  { %9694 = sst [smem:[#allocation9_spill]] %s8248_s29  ;;  %s8187_s28 = smov 17  }
   0xf   :  { %s8258_s8 = sld [smem:[%s9675_s0 + %s8178_s4]]   ;;  %s8377_s23 = smov 0  }
  0x10   :  { %s8263_s14 = sld [smem:[%s9675_s0 + %s8179_s10]]  }
  0x11   :  { %s8268_s19 = sld [smem:[%s9675_s0 + %s8180_s15]]   ;;  %s8185_s15 = smov 15  }
  0x12   :  { %s8273_s24 = sld [smem:[%s9675_s0 + %s8181_s20]]  }
  0x13   :  { %9695 = sst [smem:[#allocation10_spill]] %s8253_s3 }
  0x14   :  { %s8278_s30 = sld [smem:[%s9675_s0 + %s8182_s26]]   ;;  %s8379_s26 = smov 0  }
  0x15   :  { %9696 = sst [smem:[#allocation11_spill]] %s8258_s8 }
  0x16   :  { %9697 = sst [smem:[#allocation12_spill]] %s8263_s14 }
  0x17   :  { %9698 = sst [smem:[#allocation13_spill]] %s8268_s19 }
  0x18   :  { %s8283_s6 = sld [smem:[%s9675_s0 + %s8183_s1]]   ;;  %s8383_s1 = smov 0  }
  0x19   :  { %s8288_s12 = sld [smem:[%s9675_s0 + %s8184_s7]]   ;;  %s8188_s7 = smov 18  }
  0x1a   :  { %s8293_s20 = sld [smem:[%s9675_s0 + %s8185_s15]]   ;;  %s8189_s15 = smov 19  }
  0x1b   :  { %s8298_s27 = sld [smem:[%s9675_s0 + %s8186_s22]]   ;;  %s8190_s22 = smov 20  }
  0x1c   :  { %s8303_s4 = sld [smem:[%s9675_s0 + %s8187_s28]]   ;;  %s8191_s28 = smov 21  }
  0x1d   :  { %s8308_s14 = sld [smem:[%s9675_s0 + %s8188_s7]]   ;;  %s8192_s7 = smov 22  }
  0x1e   :  { %s8313_s8 = sld [smem:[%s9675_s0 + %s8189_s15]]   ;;  %s8193_s15 = smov 23  }
  0x1f   :  { %s8318_s13 = sld [smem:[%s9675_s0 + %s8190_s22]]   ;;  %s8194_s22 = smov 24  }
  0x20   :  { %s8323_s17 = sld [smem:[%s9675_s0 + %s8191_s28]]   ;;  %s8195_s28 = smov 25  }
  0x21   :  { %s8328_s3 = sld [smem:[%s9675_s0 + %s8192_s7]]   ;;  %s8196_s7 = smov 26  }
  0x22   :  { %s8333_s25 = sld [smem:[%s9675_s0 + %s8193_s15]]   ;;  %s8197_s15 = smov 27  }
  0x23   :  { %s8338_s21 = sld [smem:[%s9675_s0 + %s8194_s22]]   ;;  %s8198_s22 = smov 28  }
  0x26   :  { %9699 = sst [smem:[#allocation14_spill]] %s8323_s17 }
  0x27   :  { %9700 = sst [smem:[#allocation15_spill]] %s8328_s3 }
  0x28   :  { %9701 = sst [smem:[#allocation16_spill]] %s8333_s25 }
  0x29   :  { %9702 = sst [smem:[#allocation17_spill]] %s8338_s21 }
  0x2a   :  { %s8343_s17 = sld [smem:[%s9675_s0 + %s8195_s28]]   ;;  %s8199_s28 = smov 29  }
  0x2b   :  { %s8348_s3 = sld [smem:[%s9675_s0 + %s8196_s7]]   ;;  %s8200_s7 = smov 30  }
  0x2c   :  { %s8353_s25 = sld [smem:[%s9675_s0 + %s8197_s15]]   ;;  %s8201_s15 = smov 31  }
  0x2d   :  { %s8358_s21 = sld [smem:[%s9675_s0 + %s8198_s22]]   ;;  %s8375_s22 = smov 0  }
  0x30   :  { %9703 = sst [smem:[#allocation18_spill]] %s8343_s17 }
  0x31   :  { %9704 = sst [smem:[#allocation19_spill]] %s8348_s3 }
  0x32   :  { %9705 = sst [smem:[#allocation20_spill]] %s8353_s25 }
  0x33   :  { %9706 = sst [smem:[#allocation21_spill]] %s8358_s21 }
  0x34   :  { %s8363_s17 = sld [smem:[%s9675_s0 + %s8199_s28]]   ;;  %s8381_s28 = smov 0  }
  0x35   :  { %s8368_s3 = sld [smem:[%s9675_s0 + %s8200_s7]]  }
  0x36   :  { %s8373_s25 = sld [smem:[%s9675_s0 + %s8201_s15]]  }
  0x3a   :  { %9707 = sst [smem:[#allocation22_spill]] %s8363_s17 }
  0x3b   :  { %9708 = sst [smem:[#allocation23_spill]] %s8368_s3 }
  0x3c LB: > { %9709 = sst [smem:[#allocation24_spill]] %s8153_s22  ;;  %s82_s0 = sadd.s32 1, %s8161_s26  ;;  %s8169_s1 = sphi %s8383_s1, %s73_s1   ;;  %s8165_s28 = sphi %s8381_s28, %s9746_s28   ;;  %s8161_s26 = sphi %s8379_s26, %s9745_s26   ;;  %s8157_s23 = sphi %s8377_s23, %s9744_s23   ;;  %s8153_s22 = sphi %s8375_s22, %s9743_s22  }
  0x3d   : > { %9710 = sst [smem:[#allocation25_spill]] %s8161_s26  ;;  %s85_s2 = sadd.s32 1, %s8165_s28 }
  0x3e   : > { %9711 = sst [smem:[#allocation26_spill]] %s8165_s28  ;;  %p83_p0 = scmp.ge.s32.totalorder %s82_s0, 2 }
  0x3f   : > { %9712 = sst [smem:[#allocation27_spill]] %s8169_s1  ;;  %p6586_p1 = scmp.ge.s32.totalorder %s8169_s1, 1 }
  0x40   : > { %p998_p2 = scmp.lt.s32.totalorder %s8169_s1, 5  ;;  %s9748_s0 = smov (%p83_p0, %s82_s0), 0 }
  0x41   : > { %9713 = sst [smem:[#allocation28_spill]] %s9748_s0  ;;  %s9750_s2 = smov (!%p83_p0, %s85_s2), %s8165_s28 }
  0x42   : > { %p999_p3 = pnand %p6586_p1, %p998_p2  ;;  %p87_p4 = scmp.ge.s32.totalorder %s9750_s2, 2 }
  0x43   : > { %s6587_s7 = sshll.u32 (!%p999_p3), %s8157_s23, 2  ;;  %s9716_s5 = sld [smem:[#allocation4_spill]] (!%p999_p3) }
  0x44   : > { %s9752_s2 = smov (%p87_p4, %s9750_s2), 0  ;;  %1002 = sbr.rel (%p999_p3) target bundleno = 6880 (0x1ae0), region = 144 }
  0x45   : > { %9714 = sst [smem:[#allocation29_spill]] %s9752_s2  ;;  %p1148_p5 = scmp.lt.s32.totalorder (!%p999_p3), %s8153_s22, 1 }
  0x46   : > { %p1135_p6 = scmp.lt.s32.totalorder (!%p999_p3), %s6587_s7, 7 }
  0x49   : > { %s1149_s10 = scalar_select %p1148_p5, %s8153_s22, 1 }
  0x4a   : > { %s9754_s7 = smov (!%p1135_p6, %s6587_s7), 7 }
  0x4b   : > { %s8409_s11 = sshll.u32 %s1149_s10, 1  ;;  %s7398_s15 = smul.u32 768, %s1149_s10 }
  0x4c   : > { %s7082_s16 = sshll.u32 %s9754_s7, 4  ;;  %s1155_s0 = scalar_lea.vmem %s8273_s24, %s8409_s11 }
  0x4d   : > { %s1139_s23 = scalar_lea.vmem %s9716_s5, %s7082_s16  ;;  %s8415_s2 = scalar_lea.vmem %s8223_s9, %s7082_s16 }
  0x4e   : > { %s8420_s28 = scalar_lea.vmem %s8278_s30, %s7398_s15  ;;  %s7084_s26 = sshll.u32 %s1149_s10, 8 }
  0x4f   : > { %s1169_s1 = scalar_lea.vmem %s8288_s12, %s8409_s11  ;;  %s8425_s3 = scalar_lea.vmem %s8283_s6, %s7084_s26 }
  0x50   : > { %s1173_s17 = scalar_lea.vmem %s8293_s20, %s8409_s11  ;;  %s1177_s21 = scalar_lea.vmem %s8298_s27, %s8409_s11 }
  0x51   : > { %s8432_s29 = scalar_lea.vmem %s8303_s4, %s7084_s26  ;;  %s1186_s22 = scalar_lea.vmem %s8308_s14, %s8409_s11 }
  0x52   : > { %s8437_s7 = scalar_lea.vmem %s8313_s8, %s7084_s26  ;;  %s1195_s18 = scalar_lea.vmem %s8318_s13, %s8409_s11 }
  0x53   : > { %s8442_s19 = scalar_lea.vmem %s8373_s25, %s7082_s16  ;;  %s9717_s5 = sld [smem:[#allocation24_spill]] }
  0x59   : > { %p6610_p7 = scmp.ne.s32.totalorder %s9717_s5, 0 }
  0x5a   : > { %s9718_s10 = sld [smem:[#allocation9_spill]] (!%p6610_p7) }
  0x5b   : > { %1207 = sbr.rel (%p6610_p7) target bundleno = 936 (0x3a8), region = 148  ;;  %s9719_s5 = sld [smem:[#allocation7_spill]] (!%p6610_p7) }
  0x5c   : > { %s9720_s26 = sld [smem:[#allocation8_spill]] (!%p6610_p7) }
  0x5d   : > { %s9721_s15 = sld [smem:[#allocation10_spill]] (!%p6610_p7) }
  0x5e   : > { %s9722_s16 = sld [smem:[#allocation6_spill]] (!%p6610_p7) }
  0x60   : > { %v1208_v0 = vld [vmem:[%s1139_s23] sm:$0xff]  ;;  %v1209_v1 = vld [vmem:[%s1139_s23 + $0x8] sm:$0xff]  ;;  %vm1218_vm0 = vcmask 523264   ;;  %v1210_v5 = vld [vmem:[%s1139_s23 + $0x10] sm:$0xff]  ;;  %vm1686_vm2 = vcmask 1046528  }
  0x61   : > { %v1212_v2 = vld [vmem:[%s1139_s23 + $0x20] sm:$0xff]  ;;  %v1219_v3 = vsel %vm1218_vm0, %v1209_v1, 0.0  ;;  %v1213_v4 = vld [vmem:[%s1139_s23 + $0x28] sm:$0xff]  ;;  %v1211_v6 = vld [vmem:[%s1139_s23 + $0x18] sm:$0xff] }
  0x62   : > { %v1220_v7 = vadd.f32 %v1219_v3, %v1208_v0  ;;  %v1227_v8 = vsel %vm1218_vm0, %v1213_v4, 0.0  ;;  %v1223_v9 = vsel %vm1218_vm0, %v1211_v6, 0.0  ;;  %v1214_v10 = vld [vmem:[%s1139_s23 + $0x30] sm:$0xff]  ;;  %v1215_v11 = vld [vmem:[%s1139_s23 + $0x38] sm:$0xff]  ;;  %v7481_v18 = vld [vmem:[%s9718_s10 + $0x64] ss:$8 sps:$4 sm:$0xff]  }
  0x63   : > { %v1228_v12 = vadd.f32 %v1227_v8, %v1212_v2  ;;  %v1231_v13 = vsel %vm1218_vm0, %v1215_v11, 0.0  ;;  %v1224_v14 = vadd.f32 %v1223_v9, %v1210_v5  ;;  %v7478_v16 = vld [vmem:[%s9718_s10 + $0x74] ss:$8 sps:$4 sm:$0xff]   ;;  %v7480_v17 = vld [vmem:[%s9718_s10 + $0x70] ss:$8 sps:$4 sm:$0xff]   ;;  %s9723_s23 = sld [smem:[#allocation5_spill]] }
  0x64   : > { %1221 = vadd.xlane.f32.xlu0 %v1220_v7  ;;  %v1232_v15 = vadd.f32 %v1231_v13, %v1214_v10  ;;  %1496 = vmatprep.subr.bf16.mxu0 %v7478_v16  ;;  %v7483_v19 = vld [vmem:[%s9718_s10 + $0x60] ss:$8 sps:$4 sm:$0xff]   ;;  %v7484_v20 = vld [vmem:[%s9718_s10 + $0x54] ss:$8 sps:$4 sm:$0xff]   ;;  %v7486_v21 = vld [vmem:[%s9718_s10 + $0x50] ss:$8 sps:$4 sm:$0xff]  }
  0x65   : > { %1229 = vadd.xlane.f32.xlu1 %v1228_v12  ;;  %7374 = vmatprep.subr.bf16.mxu1 %v7478_v16  ;;  %v7487_v22 = vld [vmem:[%s9718_s10 + $0x44] ss:$8 sps:$4 sm:$0xff]   ;;  %v7489_v23 = vld [vmem:[%s9718_s10 + $0x40] ss:$8 sps:$4 sm:$0xff]   ;;  %v7490_v24 = vld [vmem:[%s9718_s10 + $0x34] ss:$8 sps:$4 sm:$0xff]  }
  0x66   : > { %1497 = vmatpush1.bf16.msra.mxu0 %v7480_v17  ;;  %7386 = vmatpush1.bf16.msra.mxu1 %v7480_v17  ;;  %v7492_v57 = vld [vmem:[%s9718_s10 + $0x30] ss:$8 sps:$4 sm:$0xff]   ;;  %v7493_v58 = vld [vmem:[%s9718_s10 + $0x24] ss:$8 sps:$4 sm:$0xff]   ;;  %v7495_v59 = vld [vmem:[%s9718_s10 + $0x20] ss:$8 sps:$4 sm:$0xff]  }
  0x67   : > { %1498 = vmatprep.subr.bf16.mxu0 %v7481_v18  ;;  %7375 = vmatprep.subr.bf16.mxu1 %v7481_v18  ;;  %v7496_v60 = vld [vmem:[%s9718_s10 + $0x14] ss:$8 sps:$4 sm:$0xff]   ;;  %v7498_v61 = vld [vmem:[%s9718_s10 + $0x10] ss:$8 sps:$4 sm:$0xff]   ;;  %v7499_v62 = vld [vmem:[%s9718_s10 + $0x4] ss:$8 sps:$4 sm:$0xff]  }
  0x68   : > { %1225 = vadd.xlane.f32.xlu0 %v1224_v14  ;;  %v7501_v63 = vld [vmem:[%s9718_s10] ss:$8 sps:$4 sm:$0xff]  }
  0x69   : > { %1233 = vadd.xlane.f32.xlu1 %v1232_v15  ;;  %v7507_v3 = vld [vmem:[%s9718_s10 + $0xa0] ss:$8 sps:$4 sm:$0xff]   ;;  %v1293_v15 = vlaneseq }
  0x6a   : > { %1499 = vmatpush1.bf16.msra.mxu0 %v7483_v19  ;;  %7387 = vmatpush1.bf16.msra.mxu1 %v7483_v19  ;;  %v7513_v7 = vld [vmem:[%s9718_s10 + $0x80] ss:$8 sps:$4 sm:$0xff]  }
  0x6b   : > { %1500 = vmatprep.subr.bf16.mxu0 %v7484_v20  ;;  %7376 = vmatprep.subr.bf16.mxu1 %v7484_v20  ;;  %v8510_v20 = vshrl.u32 %v1293_v15, 7  ;;  %vm1680_vm1 = vcmp.lt.s32.totalorder %v1293_v15, 256 }
  0x6e   : > { %1501 = vmatpush1.bf16.msra.mxu0 %v7486_v21  ;;  %7388 = vmatpush1.bf16.msra.mxu1 %v7486_v21 }
  0x6f   : > { %1502 = vmatprep.subr.bf16.mxu0 %v7487_v22  ;;  %7377 = vmatprep.subr.bf16.mxu1 %v7487_v22  ;;  %v8513_v22 = vsub.s32 0, %v8510_v20 }
  0x72   : > { %1503 = vmatpush1.bf16.msra.mxu0 %v7489_v23  ;;  %7389 = vmatpush1.bf16.msra.mxu1 %v7489_v23  ;;  %v8516_v23 = vsub.s32 1, %v8510_v20 }
  0x73   : > { %1504 = vmatprep.subr.bf16.mxu0 %v7490_v24  ;;  %7378 = vmatprep.subr.bf16.mxu1 %v7490_v24  ;;  %v1216_v24 = vld [vmem:[%s9719_s5] sm:$0x3]  ;;  %s9724_s5 = sld [smem:[#allocation11_spill]] }
  0x76   : > { %1505 = vmatpush1.bf16.msra.mxu0 %v7492_v57  ;;  %7390 = vmatpush1.bf16.msra.mxu1 %v7492_v57 }
  0x77   : > { %1506 = vmatprep.subr.bf16.mxu0 %v7493_v58  ;;  %7379 = vmatprep.subr.bf16.mxu1 %v7493_v58 }
  0x7a   : > { %1507 = vmatpush1.bf16.msra.mxu0 %v7495_v59  ;;  %7391 = vmatpush1.bf16.msra.mxu1 %v7495_v59 }
  0x7b   : > { %1508 = vmatprep.subr.bf16.mxu0 %v7496_v60  ;;  %7380 = vmatprep.subr.bf16.mxu1 %v7496_v60 }
  0x7e   : > { %1509 = vmatpush1.bf16.msra.mxu0 %v7498_v61  ;;  %7392 = vmatpush1.bf16.msra.mxu1 %v7498_v61 }
  0x7f   : > { %1510 = vmatprep.subr.bf16.mxu0 %v7499_v62  ;;  %7381 = vmatprep.subr.bf16.mxu1 %v7499_v62 }
  0x82   : > { %1511 = vmatpush1.bf16.msra.mxu0 %v7501_v63  ;;  %7393 = vmatpush1.bf16.msra.mxu1 %v7501_v63 }
  0xed   : > { %v1222_v25 = vpop.xlane.xlu0 %1221 }
  0xee   : > { %v1236_v26 = vmul.f32 0.0052083335, %v1222_v25  ;;  %v1230_v27 = vpop.xlane.xlu1 %1229 }
  0xef   : > { %v1238_v28 = vmul.f32 0.0052083335, %v1230_v27  ;;  %v1300_v27 = vrot.slane %v1216_v24, %v8516_v23 }
  0xf0   : > { %v8458_v29 = vsub.f32 %v1208_v0, %v1236_v26  ;;  %v8460_v30 = vsub.f32 %v1209_v1, %v1236_v26  ;;  %v7502_v0 = vld [vmem:[%s9718_s10 + $0xb4] ss:$8 sps:$4 sm:$0xff]   ;;  %v7504_v1 = vld [vmem:[%s9718_s10 + $0xb0] ss:$8 sps:$4 sm:$0xff]   ;;  %v1296_v26 = vrot.slane %v1216_v24, %v8513_v22 }
  0xf1   : > { %v8462_v31 = vsub.f32 %v1212_v2, %v1238_v28  ;;  %v8464_v32 = vsub.f32 %v1213_v4, %v1238_v28  ;;  %v1226_v33 = vpop.xlane.xlu0 %1225  ;;  %1520 = vmatprep.subr.bf16.mxu0 %v7502_v0  ;;  %7382 = vmatprep.subr.bf16.mxu1 %v7502_v0  ;;  %v7505_v2 = vld [vmem:[%s9718_s10 + $0xa4] ss:$8 sps:$4 sm:$0xff]   ;;  %v7508_v4 = vld [vmem:[%s9718_s10 + $0x94] ss:$8 sps:$4 sm:$0xff]   ;;  %v1217_v28 = vld [vmem:[%s9720_s26] sm:$0x3] }
  0xf2   : > { %v1237_v34 = vmul.f32 0.0052083335, %v1226_v33  ;;  %v1234_v35 = vpop.xlane.xlu1 %1233  ;;  %v1248_v36 = vmul.f32 %v8458_v29, %v8458_v29  ;;  %v1249_v37 = vmul.f32 %v8460_v30, %v8460_v30  ;;  %1521 = vmatpush2.bf16.msra.mxu0 %v7504_v1  ;;  %7394 = vmatpush2.bf16.msra.mxu1 %v7504_v1  ;;  %s9725_s26 = sld [smem:[#allocation12_spill]] }
  0xf3   : > { %v1239_v38 = vmul.f32 0.0052083335, %v1234_v35  ;;  %v1252_v39 = vmul.f32 %v8462_v31, %v8462_v31  ;;  %v1253_v40 = vmul.f32 %v8464_v32, %v8464_v32  ;;  %1522 = vmatprep.subr.bf16.mxu0 %v7505_v2  ;;  %7383 = vmatprep.subr.bf16.mxu1 %v7505_v2 }
  0xf4   : > { %v8474_v41 = vsub.f32 %v1210_v5, %v1237_v34  ;;  %v8476_v42 = vsub.f32 %v1211_v6, %v1237_v34  ;;  %v1256_v43 = vsel %vm1218_vm0, %v1249_v37, 0.0  ;;  %v7510_v5 = vld [vmem:[%s9718_s10 + $0x90] ss:$8 sps:$4 sm:$0xff]   ;;  %v7511_v6 = vld [vmem:[%s9718_s10 + $0x84] ss:$8 sps:$4 sm:$0xff]   ;;  %v1315_v37 = vrot.slane %v1217_v28, %v8513_v22 }
  0xf5   : > { %v8479_v44 = vsub.f32 %v1214_v10, %v1239_v38  ;;  %v8481_v45 = vsub.f32 %v1215_v11, %v1239_v38  ;;  %v1257_v46 = vadd.f32 %v1256_v43, %v1248_v36  ;;  %v1264_v47 = vsel %vm1218_vm0, %v1253_v40, 0.0 }
  0xf6   : > { %v1250_v48 = vmul.f32 %v8474_v41, %v8474_v41  ;;  %v1251_v49 = vmul.f32 %v8476_v42, %v8476_v42  ;;  %v1265_v50 = vadd.f32 %v1264_v47, %v1252_v39  ;;  %1523 = vmatpush2.bf16.msra.mxu0 %v7507_v3  ;;  %7395 = vmatpush2.bf16.msra.mxu1 %v7507_v3 }
  0xf7   : > { %1258 = vadd.xlane.f32.xlu0 %v1257_v46  ;;  %v1254_v51 = vmul.f32 %v8479_v44, %v8479_v44  ;;  %v1255_v52 = vmul.f32 %v8481_v45, %v8481_v45  ;;  %1524 = vmatprep.subr.bf16.mxu0 %v7508_v4  ;;  %v1319_v38 = vrot.slane %v1217_v28, %v8516_v23 }
  0xf8   : > { %v1260_v53 = vsel %vm1218_vm0, %v1251_v49, 0.0  ;;  %7384 = vmatprep.subr.bf16.mxu1 %v7508_v4 }
  0xf9   : > { %v1261_v54 = vadd.f32 %v1260_v53, %v1250_v48  ;;  %v1268_v55 = vsel %vm1218_vm0, %v1255_v52, 0.0 }
  0xfa   : > { %v1269_v56 = vadd.f32 %v1268_v55, %v1254_v51  ;;  %1525 = vmatpush2.bf16.msra.mxu0 %v7510_v5  ;;  %7396 = vmatpush2.bf16.msra.mxu1 %v7510_v5 }
  0xfb   : > { %1266 = vadd.xlane.f32.xlu0 %v1265_v50  ;;  %1262 = vadd.xlane.f32.xlu1 %v1261_v54 }
  0xfc   : > { %1526 = vmatprep.subr.bf16.mxu0 %v7511_v6  ;;  %7385 = vmatprep.subr.bf16.mxu1 %v7511_v6 }
  0xfe   : > { %1527 = vmatpush2.bf16.msra.mxu0 %v7513_v7  ;;  %7397 = vmatpush2.bf16.msra.mxu1 %v7513_v7 }
  0xff   : > { %1270 = vadd.xlane.f32.xlu1 %v1269_v56 }
 0x180   : > { %v1259_v8 = vpop.xlane.xlu0 %1258 }
 0x181   : > { %v1272_v9 = vmul.f32 0.0052083335, %v1259_v8 }
 0x183   : > { %v1276_v10 = vadd.f32 1e-05, %v1272_v9 }
 0x184   : > { %v1263_v11 = vpop.xlane.xlu1 %1262  ;;  %v1267_v12 = vpop.xlane.xlu0 %1266 }
 0x185   : > { %7515 = vrsqrt.f32 %v1276_v10  ;;  %v1273_v13 = vmul.f32 0.0052083335, %v1263_v11  ;;  %v1274_v14 = vmul.f32 0.0052083335, %v1267_v12 }
 0x187   : > { %v1277_v16 = vadd.f32 1e-05, %v1273_v13  ;;  %v1278_v17 = vadd.f32 1e-05, %v1274_v14 }
 0x188   : > { %v1271_v18 = vpop.xlane.xlu1 %1270 }
 0x189   : > { %7517 = vrsqrt.f32 %v1277_v16  ;;  %v1275_v19 = vmul.f32 0.0052083335, %v1271_v18 }
 0x18a   : > { %7519 = vrsqrt.f32 %v1278_v17 }
 0x18b   : > { %v1279_v21 = vadd.f32 1e-05, %v1275_v19 }
 0x18d   : > { %7521 = vrsqrt.f32 %v1279_v21 }
 0x192   : > { %v7516_v25 = vpop.eup %7515 }
 0x193   : > { %v1285_v33 = vmul.f32 %v7516_v25, %v8460_v30  ;;  %v1284_v34 = vmul.f32 %v7516_v25, %v8458_v29  ;;  %v8202_v25 = vmov 1966171168  }
 0x195   : > { %v1304_v36 = vmul.f32 %v1300_v27, %v1285_v33  ;;  %v1303_v39 = vmul.f32 %v1296_v26, %v1284_v34  ;;  %v8539_v33 = vld [vmem:[%s9722_s16] sm:$0xff]  ;;  %v8542_v34 = vld [vmem:[%s9722_s16 + $0x8] sm:$0xff] }
 0x196   : > { %v7518_v35 = vpop.eup %7517 }
 0x197   : > { %v7520_v40 = vpop.eup %7519  ;;  %v1287_v43 = vmul.f32 %v7518_v35, %v8476_v42  ;;  %v1286_v46 = vmul.f32 %v7518_v35, %v8474_v41  ;;  %v1323_v29 = vadd.f32 %v1319_v38, %v1304_v36  ;;  %v1322_v51 = vadd.f32 %v1315_v37, %v1303_v39 }
 0x198   : > { %v1289_v47 = vmul.f32 %v7520_v40, %v8464_v32  ;;  %v1288_v48 = vmul.f32 %v7520_v40, %v8462_v31  ;;  %v1661_v35 = vcombine.low %v8539_v33, %v8542_v34 }
 0x199   : > { %v1306_v49 = vmul.f32 %v1300_v27, %v1287_v43  ;;  %v1305_v30 = vmul.f32 %v1296_v26, %v1286_v46 }
 0x19a   : > { %v7522_v50 = vpop.eup %7521  ;;  %v1308_v52 = vmul.f32 %v1300_v27, %v1289_v47  ;;  %v1307_v53 = vmul.f32 %v1296_v26, %v1288_v48 }
 0x19b   : > { %v1325_v54 = vadd.f32 %v1319_v38, %v1306_v49  ;;  %v1324_v55 = vadd.f32 %v1315_v37, %v1305_v30  ;;  %v1291_v56 = vmul.f32 %v7522_v50, %v8481_v45  ;;  %v1290_v42 = vmul.f32 %v7522_v50, %v8479_v44  ;;  %v1358_v45 = vld [vmem:[%s9721_s15] sm:$0x3] }
 0x19c   : > { %v1327_v31 = vadd.f32 %v1319_v38, %v1308_v52  ;;  %v1326_v60 = vadd.f32 %v1315_v37, %v1307_v53  ;;  %v1363_v0 = vrot.slane %v1358_v45, %v8513_v22  ;;  %v1367_v44 = vrot.slane %v1358_v45, %v8516_v23 }
 0x19d   : > { %v1331_v57 = vpack.c.bf16 %v1325_v54, %v1323_v29  ;;  %v1330_v41 = vpack.c.bf16 %v1324_v55, %v1322_v51  ;;  %v1310_v58 = vmul.f32 %v1300_v27, %v1291_v56  ;;  %v1309_v32 = vmul.f32 %v1296_v26, %v1290_v42 }
 0x19e   : > { %v1663_v26 = vunpack.c.l.s4 %v8202_v25 }
 0x19f   : > { %6635 = vmatprep.mubr.msk.bf16.mxu0 %vm1218_vm0, %v1331_v57  ;;  %v1329_v59 = vadd.f32 %v1319_v38, %v1310_v58  ;;  %v1328_v61 = vadd.f32 %v1315_v37, %v1309_v32  ;;  %v1658_v37 = vld [vmem:[%s9723_s23] sm:$0x3] }
 0x1a0   : > { %1529 = vmatmul.mubr.bf16.vlgmr.msra.gmra.mxu0 %v1330_v41  ;;  %v1664_v27 = vunpack.c.0.s8 %v1663_v26 }
 0x1a1   : > { %v1333_v62 = vpack.c.bf16 %v1329_v59, %v1327_v31  ;;  %v1332_v63 = vpack.c.bf16 %v1328_v61, %v1326_v60 }
 0x1a2   : > { %v1667_v28 = vsub.s32 %v1664_v27, %v8510_v20 }
 0x1a3   : > { %6636 = vmatprep.mubr.msk.bf16.mxu1 %vm1218_vm0, %v1333_v62 }
 0x1a4   : > { %1539 = vmatmul.mubr.bf16.vlgmr.msra.gmra.mxu1 %v1332_v63  ;;  %v1668_v36 = vrot.slane %v1661_v35, %v1667_v28 }
 0x1a6   : > { %v1675_v38 = vrot.slane %v1668_v36, %v1667_v28 }
 0x1a8   : > { %v1677_v39 = vadd.f32 %v1675_v38, %v1658_v37 }
 0x1aa   : > { %1682 = vst.msk [vmem:[#allocation2] ss:$8 sm:$0x3] %vm1680_vm1, %v1677_v39  ;;  %1708 = vst.msk [vmem:[#allocation2 + $0x11] ss:$8 sm:$0x3] %vm1680_vm1, %v1677_v39 }
 0x1ab   : > { %1723 = vst.msk [vmem:[#allocation2 + $0x22] ss:$8 sm:$0x3] %vm1680_vm1, %v1677_v39  ;;  %1738 = vst.msk [vmem:[#allocation2 + $0x33] ss:$8 sm:$0x3] %vm1680_vm1, %v1677_v39 }
 0x260   : > { %v1530_v1 = vpop.f32.mrf.mxu0 }
 0x261   : > { %v1531_v3 = vadd.f32 %v1530_v1, %v1363_v0 }
 0x262   : > { %v1532_v2 = vpop.f32.mrf.mxu0 }
 0x263   : > { %v1533_v4 = vadd.f32 %v1532_v2, %v1367_v44 }
 0x264   : > { %v1534_v5 = vpop.f32.mrf.mxu0  ;;  %v1540_v6 = vpop.f32.mrf.mxu1 }
 0x265   : > { %v1551_v7 = vadd.f32 %v1533_v4, %v1531_v3  ;;  %v1535_v10 = vadd.f32 %v1534_v5, %v1363_v0  ;;  %v1541_v11 = vadd.f32 %v1540_v6, %v1363_v0 }
 0x266   : > { %v1536_v8 = vpop.f32.mrf.mxu0  ;;  %v1542_v9 = vpop.f32.mrf.mxu1 }
 0x267   : > { %v1537_v12 = vadd.f32 %v1536_v8, %v1367_v44  ;;  %v1543_v13 = vadd.f32 %v1542_v9, %v1367_v44  ;;  %1552 = vadd.xlane.f32.xlu0 %v1551_v7 }
 0x268   : > { %v1544_v14 = vpop.f32.mrf.mxu1 }
 0x269   : > { %v1554_v16 = vadd.f32 %v1537_v12, %v1535_v10  ;;  %v1557_v17 = vadd.f32 %v1543_v13, %v1541_v11  ;;  %v1545_v19 = vadd.f32 %v1544_v14, %v1363_v0 }
 0x26a   : > { %v1546_v18 = vpop.f32.mrf.mxu1 }
 0x26b   : > { %v1547_v21 = vadd.f32 %v1546_v18, %v1367_v44  ;;  %1555 = vadd.xlane.f32.xlu1 %v1554_v16  ;;  %1558 = vadd.xlane.f32.xlu0 %v1557_v17  ;;  %v1687_v18 = vrot.slane %v8539_v33, 1 }
 0x26d   : > { %v1560_v24 = vadd.f32 %v1547_v21, %v1545_v19 }
 0x26f   : > { %1561 = vadd.xlane.f32.xlu1 %v1560_v24 }
 0x2f0   : > { %v1553_v40 = vpop.xlane.xlu0 %1552 }
 0x2f1   : > { %v1564_v43 = vmul.f32 0.00390625, %v1553_v40 }
 0x2f3   : > { %v1568_v20 = vsub.f32 %v1531_v3, %v1564_v43  ;;  %v1569_v46 = vsub.f32 %v1533_v4, %v1564_v43 }
 0x2f4   : > { %v1556_v47 = vpop.xlane.xlu1 %1555  ;;  %v1559_v48 = vpop.xlane.xlu0 %1558 }
 0x2f5   : > { %v1565_v49 = vmul.f32 0.00390625, %v1556_v47  ;;  %v1566_v30 = vmul.f32 0.00390625, %v1559_v48  ;;  %v1576_v50 = vmul.f32 %v1568_v20, %v1568_v20  ;;  %v1577_v29 = vmul.f32 %v1569_v46, %v1569_v46 }
 0x2f7   : > { %v1570_v51 = vsub.f32 %v1535_v10, %v1565_v49  ;;  %v1571_v52 = vsub.f32 %v1537_v12, %v1565_v49  ;;  %v1572_v53 = vsub.f32 %v1541_v11, %v1566_v30  ;;  %v1573_v54 = vsub.f32 %v1543_v13, %v1566_v30  ;;  %v1549_v10 = vld [vmem:[%s9724_s5] sm:$0x3]  ;;  %v1656_v11 = vld [vmem:[%s9722_s16 + $0x10] sm:$0x1]  ;;  %v1657_v12 = vld [vmem:[%s9722_s16 + $0x18] sm:$0x1] }
 0x2f8   : > { %v1562_v15 = vpop.xlane.xlu1 %1561  ;;  %v1584_v55 = vadd.f32 %v1577_v29, %v1576_v50  ;;  %v1550_v13 = vld [vmem:[%s9725_s26] sm:$0x3]  ;;  %v1620_v14 = vrot.slane %v1549_v10, %v8513_v22  ;;  %v1624_v16 = vrot.slane %v1549_v10, %v8516_v23  ;;  %v1691_v24 = vrot.slane %v1657_v12, 1 }
 0x2f9   : > { %v1567_v56 = vmul.f32 0.00390625, %v1562_v15  ;;  %v1578_v42 = vmul.f32 %v1570_v51, %v1570_v51  ;;  %v1579_v57 = vmul.f32 %v1571_v52, %v1571_v52  ;;  %v1580_v41 = vmul.f32 %v1572_v53, %v1572_v53 }
 0x2fa   : > { %1585 = vadd.xlane.f32.xlu0 %v1584_v55  ;;  %v1581_v58 = vmul.f32 %v1573_v54, %v1573_v54  ;;  %v1639_v25 = vrot.slane %v1550_v13, %v8513_v22  ;;  %v1643_v26 = vrot.slane %v1550_v13, %v8516_v23 }
 0x2fb   : > { %v8548_v32 = vsub.f32 %v1545_v19, %v1567_v56  ;;  %v8550_v31 = vsub.f32 %v1547_v21, %v1567_v56  ;;  %v1587_v59 = vadd.f32 %v1579_v57, %v1578_v42  ;;  %v1688_v19 = vrot.slane %v1656_v11, 1 }
 0x2fc   : > { %v1590_v60 = vadd.f32 %v1581_v58, %v1580_v41  ;;  %v1690_v21 = vrot.slane %v8542_v34, 1 }
 0x2fd   : > { %1588 = vadd.xlane.f32.xlu1 %v1587_v59  ;;  %v1582_v61 = vmul.f32 %v8548_v32, %v8548_v32  ;;  %v1583_v62 = vmul.f32 %v8550_v31, %v8550_v31  ;;  %v1689_v39 = vsel %vm1686_vm2, %v1687_v18, %v1688_v19 }
 0x2fe   : > { %1591 = vadd.xlane.f32.xlu0 %v1590_v60  ;;  %v1692_v40 = vsel %vm1686_vm2, %v1690_v21, %v1691_v24 }
 0x2ff   : > { %v1593_v63 = vadd.f32 %v1583_v62, %v1582_v61 }
 0x301   : > { %1594 = vadd.xlane.f32.xlu1 %v1593_v63 }
 0x383   : > { %v1586_v45 = vpop.xlane.xlu0 %1585 }
 0x384   : > { %v1596_v0 = vmul.f32 0.00390625, %v1586_v45 }
 0x386   : > { %v1600_v44 = vadd.f32 1e-05, %v1596_v0  ;;  %v1589_v1 = vpop.xlane.xlu1 %1588 }
 0x387   : > { %v1597_v2 = vmul.f32 0.00390625, %v1589_v1  ;;  %v1592_v3 = vpop.xlane.xlu0 %1591 }
 0x388   : > { %7523 = vrsqrt.f32 %v1600_v44  ;;  %v1598_v4 = vmul.f32 0.00390625, %v1592_v3 }
 0x389   : > { %v1601_v5 = vadd.f32 1e-05, %v1597_v2 }
 0x38a   : > { %v1602_v6 = vadd.f32 1e-05, %v1598_v4  ;;  %v1595_v7 = vpop.xlane.xlu1 %1594 }
 0x38b   : > { %7525 = vrsqrt.f32 %v1601_v5  ;;  %v1599_v8 = vmul.f32 0.00390625, %v1595_v7 }
 0x38c   : > { %7527 = vrsqrt.f32 %v1602_v6 }
 0x38d   : > { %v1603_v9 = vadd.f32 1e-05, %v1599_v8 }
 0x38f   : > { %7529 = vrsqrt.f32 %v1603_v9 }
 0x395   : > { %v7524_v17 = vpop.eup %7523 }
 0x396   : > { %v1608_v27 = vmul.f32 %v7524_v17, %v1568_v20  ;;  %v1609_v28 = vmul.f32 %v7524_v17, %v1569_v46 }
 0x398   : > { %v7526_v35 = vpop.eup %7525  ;;  %v1627_v36 = vmul.f32 %v1620_v14, %v1608_v27  ;;  %v1628_v37 = vmul.f32 %v1624_v16, %v1609_v28 }
 0x399   : > { %v7528_v38 = vpop.eup %7527  ;;  %v1610_v43 = vmul.f32 %v7526_v35, %v1570_v51  ;;  %v1611_v47 = vmul.f32 %v7526_v35, %v1571_v52 }
 0x39a   : > { %v1646_v48 = vadd.f32 %v1639_v25, %v1627_v36  ;;  %v1647_v33 = vadd.f32 %v1643_v26, %v1628_v37  ;;  %v1612_v49 = vmul.f32 %v7528_v38, %v1572_v53  ;;  %v1613_v30 = vmul.f32 %v7528_v38, %v1573_v54 }
 0x39b   : > { %v1629_v34 = vmul.f32 %v1620_v14, %v1610_v43  ;;  %v1630_v50 = vmul.f32 %v1624_v16, %v1611_v47 }
 0x39c   : > { %v7530_v29 = vpop.eup %7529  ;;  %v1695_v22 = vadd.f32 %v1689_v39, %v1646_v48  ;;  %v1696_v15 = vadd.f32 %v1692_v40, %v1647_v33  ;;  %v1631_v23 = vmul.f32 %v1620_v14, %v1612_v49  ;;  %v1632_v20 = vmul.f32 %v1624_v16, %v1613_v30 }
 0x39d   : > { %v1648_v46 = vadd.f32 %v1639_v25, %v1629_v34  ;;  %v1649_v55 = vadd.f32 %v1643_v26, %v1630_v50  ;;  %v1614_v56 = vmul.f32 %v7530_v29, %v8548_v32  ;;  %v1615_v42 = vmul.f32 %v7530_v29, %v8550_v31 }
 0x39e   : > { %v1699_v57 = vrot.slane %v1695_v22, 7  ;;  %v1700_v51 = vrot.slane %v1696_v15, 7  ;;  %v1650_v52 = vadd.f32 %v1639_v25, %v1631_v23  ;;  %v1651_v41 = vadd.f32 %v1643_v26, %v1632_v20 }
 0x39f   : > { %v1710_v58 = vadd.f32 %v1689_v39, %v1648_v46  ;;  %v1711_v53 = vadd.f32 %v1692_v40, %v1649_v55  ;;  %v1633_v54 = vmul.f32 %v1620_v14, %v1614_v56  ;;  %v1634_v59 = vmul.f32 %v1624_v16, %v1615_v42 }
 0x3a0   : > { %1703 = vst [vmem:[#allocation2] sm:$0xfe] %v1699_v57  ;;  %1704 = vst [vmem:[#allocation2 + $0x8] sm:$0xfe] %v1700_v51  ;;  %v1725_v60 = vadd.f32 %v1689_v39, %v1650_v52  ;;  %v1726_v61 = vadd.f32 %v1692_v40, %v1651_v41 }
 0x3a1   : > { %1705 = vst [vmem:[#allocation2 + $0x10] sm:$0x1] %v1699_v57  ;;  %1706 = vst [vmem:[#allocation2 + $0x18] sm:$0x1] %v1700_v51  ;;  %v1714_v62 = vrot.slane %v1710_v58, 6  ;;  %v1715_v63 = vrot.slane %v1711_v53, 6  ;;  %v1652_v45 = vadd.f32 %v1639_v25, %v1633_v54  ;;  %v1653_v32 = vadd.f32 %v1643_v26, %v1634_v59 }
 0x3a2   : > { %v1729_v0 = vrot.slane %v1725_v60, 5  ;;  %v1730_v31 = vrot.slane %v1726_v61, 5 }
 0x3a3   : > { %1718 = vst [vmem:[#allocation2 + $0x10] sm:$0xfc] %v1714_v62  ;;  %1719 = vst [vmem:[#allocation2 + $0x18] sm:$0xfc] %v1715_v63  ;;  %v1740_v44 = vadd.f32 %v1689_v39, %v1652_v45  ;;  %v1741_v1 = vadd.f32 %v1692_v40, %v1653_v32 }
 0x3a4   : > { %1720 = vst [vmem:[#allocation2 + $0x20] sm:$0x3] %v1714_v62  ;;  %1721 = vst [vmem:[#allocation2 + $0x28] sm:$0x3] %v1715_v63 }
 0x3a5   : > { %1733 = vst [vmem:[#allocation2 + $0x20] sm:$0xf8] %v1729_v0  ;;  %1734 = vst [vmem:[#allocation2 + $0x28] sm:$0xf8] %v1730_v31  ;;  %v1744_v2 = vrot.slane %v1740_v44, 4  ;;  %v1745_v3 = vrot.slane %v1741_v1, 4 }
 0x3a6   : > { %1735 = vst [vmem:[#allocation2 + $0x30] sm:$0x7] %v1729_v0  ;;  %1736 = vst [vmem:[#allocation2 + $0x38] sm:$0x7] %v1730_v31 }
 0x3a7   : > { %1748 = vst [vmem:[#allocation2 + $0x40] ss:$-12 sps:$4 sm:$0xff] %v1744_v2   ;;  %1749 = vst [vmem:[#allocation2 + $0x48] ss:$-12 sps:$4 sm:$0xff] %v1745_v3  }
 0x3a8 PF: > { %v8568_v4 = vld [vmem:[#allocation2] sm:$0xff]  ;;  %v8570_v5 = vld [vmem:[#allocation2 + $0x8] sm:$0xff]  ;;  %vm1818_vm3 = vcmask 1043456   ;;  %v7534_v27 = vld [vmem:[%s8420_s28 + $0x15c] ss:$24 sps:$4 sm:$0xff]   ;;  %s9726_s15 = sld [smem:[#allocation13_spill]] }
 0x3a9   : > { %v1806_v7 = vadd.f32 %v8570_v5, %v8568_v4  ;;  %v7531_v25 = vld [vmem:[%s8420_s28 + $0x154] ss:$24 sps:$4 sm:$0xff]   ;;  %v7533_v26 = vld [vmem:[%s8420_s28 + $0x150] ss:$24 sps:$4 sm:$0xff]   ;;  %v7537_v35 = vld [vmem:[%s8420_s28 + $0x124] ss:$24 sps:$4 sm:$0xff]   ;;  %2577 = vmatprep.subr.bf16.mxu1 %v7534_v27 }
 0x3aa   : > { %v8578_v9 = vld [vmem:[#allocation2 + $0x10] sm:$0xff]  ;;  %v8580_v10 = vld [vmem:[#allocation2 + $0x18] sm:$0xff]  ;;  %2516 = vmatprep.subr.bf16.mxu0 %v7531_v25  ;;  %v7540_v36 = vld [vmem:[%s8420_s28 + $0x12c] ss:$24 sps:$4 sm:$0xff]   ;;  %vm8204_vm4 = vmmov 0   ;;  %vm2843_vm5 = vcmask 1041408  }
 0x3ab   : > { %1807 = vadd.xlane.f32.xlu0 %v1806_v7  ;;  %v1809_v16 = vadd.f32 %v8580_v10, %v8578_v9  ;;  %v7536_v28 = vld [vmem:[%s8420_s28 + $0x158] ss:$24 sps:$4 sm:$0xff]   ;;  %2517 = vmatpush1.bf16.msra.mxu0 %v7533_v26  ;;  %v7542_v38 = vld [vmem:[%s8420_s28 + $0x128] ss:$24 sps:$4 sm:$0xff]   ;;  %v7543_v39 = vld [vmem:[%s8420_s28 + $0xf4] ss:$24 sps:$4 sm:$0xff]  }
 0x3ac   : > { %v8572_v6 = vld [vmem:[#allocation2 + $0x20] sm:$0xff]  ;;  %v8576_v8 = vld [vmem:[#allocation2 + $0x28] sm:$0xff]  ;;  %2578 = vmatpush1.bf16.msra.mxu1 %v7536_v28  ;;  %2518 = vmatprep.subr.bf16.mxu0 %v7537_v35  ;;  %v7546_v40 = vld [vmem:[%s8420_s28 + $0xfc] ss:$24 sps:$4 sm:$0xff]   ;;  %vm2774_vm8 = vcmask 293888   ;;  %vm2787_vm12 = vcmask 289792  }
 0x3ad   : > { %v1812_v11 = vadd.f32 %v8576_v8, %v8572_v6  ;;  %v7539_v37 = vld [vmem:[%s8420_s28 + $0x120] ss:$24 sps:$4 sm:$0xff]   ;;  %2579 = vmatprep.subr.bf16.mxu1 %v7540_v36  ;;  %v7545_v43 = vld [vmem:[%s8420_s28 + $0xf0] ss:$24 sps:$4 sm:$0xff]   ;;  %v7549_v48 = vld [vmem:[%s8420_s28 + $0xc4] ss:$24 sps:$4 sm:$0xff]  }
 0x3ae   : > { %v8584_v12 = vld [vmem:[#allocation2 + $0x30] sm:$0xff]  ;;  %v8586_v13 = vld [vmem:[#allocation2 + $0x38] sm:$0xff]  ;;  %v8588_v14 = vld [vmem:[#allocation2 + $0x40] sm:$0xf]  ;;  %s9727_s23 = scalar_lea.vmem %s9726_s15, %s8409_s11 }
 0x3af   : > { %v8592_v17 = vld [vmem:[#allocation2 + $0x48] sm:$0xf]  ;;  %1813 = vadd.xlane.f32.xlu1 %v1812_v11  ;;  %v1815_v18 = vadd.f32 %v8586_v13, %v8584_v12  ;;  %v1819_v19 = vsel %vm1818_vm3, %v8588_v14, 0.0  ;;  %1810 = vadd.xlane.f32.xlu0 %v1809_v16  ;;  %v7548_v47 = vld [vmem:[%s8420_s28 + $0xf8] ss:$24 sps:$4 sm:$0xff]  }
 0x3b0   : > { %v1820_v21 = vsel %vm1818_vm3, %v8592_v17, 0.0  ;;  %2519 = vmatpush1.bf16.msra.mxu0 %v7539_v37  ;;  %2580 = vmatpush1.bf16.msra.mxu1 %v7542_v38  ;;  %v7552_v33 = vld [vmem:[%s8420_s28 + $0xcc] ss:$24 sps:$4 sm:$0xff]   ;;  %v7551_v49 = vld [vmem:[%s8420_s28 + $0xc0] ss:$24 sps:$4 sm:$0xff]  }
 0x3b1   : > { %v1821_v24 = vadd.f32 %v1820_v21, %v1819_v19  ;;  %2520 = vmatprep.subr.bf16.mxu0 %v7543_v39  ;;  %2581 = vmatprep.subr.bf16.mxu1 %v7546_v40  ;;  %v7554_v30 = vld [vmem:[%s8420_s28 + $0xc8] ss:$24 sps:$4 sm:$0xff]   ;;  %v7555_v34 = vld [vmem:[%s8420_s28 + $0x94] ss:$24 sps:$4 sm:$0xff]   ;;  %v7560_v22 = vld [vmem:[%s8420_s28 + $0x98] ss:$24 sps:$4 sm:$0xff]  }
 0x3b2   : > { %v7558_v50 = vld [vmem:[%s8420_s28 + $0x9c] ss:$24 sps:$4 sm:$0xff]   ;;  %v7557_v29 = vld [vmem:[%s8420_s28 + $0x90] ss:$24 sps:$4 sm:$0xff]   ;;  %v7564_v23 = vld [vmem:[%s8420_s28 + $0x6c] ss:$24 sps:$4 sm:$0xff]  }
 0x3b3   : > { %1816 = vadd.xlane.f32.xlu1 %v1815_v18  ;;  %1822 = vadd.xlane.f32.xlu0 %v1821_v24  ;;  %v7561_v15 = vld [vmem:[%s8420_s28 + $0x64] ss:$24 sps:$4 sm:$0xff]   ;;  %v7563_v20 = vld [vmem:[%s8420_s28 + $0x60] ss:$24 sps:$4 sm:$0xff]   ;;  %v7567_v55 = vld [vmem:[%s8420_s28 + $0x34] ss:$24 sps:$4 sm:$0xff]  }
 0x3b4   : > { %2521 = vmatpush1.bf16.msra.mxu0 %v7545_v43  ;;  %2582 = vmatpush1.bf16.msra.mxu1 %v7548_v47  ;;  %v7566_v46 = vld [vmem:[%s8420_s28 + $0x68] ss:$24 sps:$4 sm:$0xff]   ;;  %v7570_v56 = vld [vmem:[%s8420_s28 + $0x3c] ss:$24 sps:$4 sm:$0xff]   ;;  %v7572_v57 = vld [vmem:[%s8420_s28 + $0x38] ss:$24 sps:$4 sm:$0xff]  }
 0x3b5   : > { %2522 = vmatprep.subr.bf16.mxu0 %v7549_v48  ;;  %2583 = vmatprep.subr.bf16.mxu1 %v7552_v33  ;;  %v7569_v42 = vld [vmem:[%s8420_s28 + $0x30] ss:$24 sps:$4 sm:$0xff]   ;;  %v7573_v51 = vld [vmem:[%s8420_s28 + $0x4] ss:$24 sps:$4 sm:$0xff]   ;;  %v7575_v41 = vld [vmem:[%s8420_s28] ss:$24 sps:$4 sm:$0xff]  }
 0x3b6   : > { %v7576_v52 = vld [vmem:[%s8420_s28 + $0xc] ss:$24 sps:$4 sm:$0xff]   ;;  %v7578_v58 = vld [vmem:[%s8420_s28 + $0x8] ss:$24 sps:$4 sm:$0xff]   ;;  %v7582_v54 = vld [vmem:[%s8420_s28 + $0x2dc] ss:$24 sps:$4 sm:$0xff]  }
 0x3b7   : > { %v7579_v53 = vld [vmem:[%s8420_s28 + $0x2d4] ss:$24 sps:$4 sm:$0xff]   ;;  %v7581_v59 = vld [vmem:[%s8420_s28 + $0x2d0] ss:$24 sps:$4 sm:$0xff]   ;;  %v7585_v40 = vld [vmem:[%s8420_s28 + $0x2a4] ss:$24 sps:$4 sm:$0xff]  }
 0x3b8   : > { %2523 = vmatpush1.bf16.msra.mxu0 %v7551_v49  ;;  %2584 = vmatpush1.bf16.msra.mxu1 %v7554_v30  ;;  %v7584_v39 = vld [vmem:[%s8420_s28 + $0x2d8] ss:$24 sps:$4 sm:$0xff]   ;;  %v7588_v47 = vld [vmem:[%s8420_s28 + $0x2ac] ss:$24 sps:$4 sm:$0xff]   ;;  %v7590_v48 = vld [vmem:[%s8420_s28 + $0x2a8] ss:$24 sps:$4 sm:$0xff]  }
 0x3b9   : > { %2524 = vmatprep.subr.bf16.mxu0 %v7555_v34  ;;  %2585 = vmatprep.subr.bf16.mxu1 %v7558_v50  ;;  %v7587_v43 = vld [vmem:[%s8420_s28 + $0x2a0] ss:$24 sps:$4 sm:$0xff]   ;;  %v7591_v33 = vld [vmem:[%s8420_s28 + $0x274] ss:$24 sps:$4 sm:$0xff]   ;;  %v7593_v49 = vld [vmem:[%s8420_s28 + $0x270] ss:$24 sps:$4 sm:$0xff]  }
 0x3ba   : > { %v7594_v30 = vld [vmem:[%s8420_s28 + $0x27c] ss:$24 sps:$4 sm:$0xff]   ;;  %v7596_v34 = vld [vmem:[%s8420_s28 + $0x278] ss:$24 sps:$4 sm:$0xff]  }
 0x3bb   : > { %v7597_v50 = vld [vmem:[%s8420_s28 + $0x244] ss:$24 sps:$4 sm:$0xff]  }
 0x3bc   : > { %2525 = vmatpush1.bf16.msra.mxu0 %v7557_v29  ;;  %2586 = vmatpush1.bf16.msra.mxu1 %v7560_v22  ;;  %v7599_v29 = vld [vmem:[%s8420_s28 + $0x240] ss:$24 sps:$4 sm:$0xff]   ;;  %v7600_v22 = vld [vmem:[%s8420_s28 + $0x24c] ss:$24 sps:$4 sm:$0xff]  }
 0x3bd   : > { %2526 = vmatprep.subr.bf16.mxu0 %v7561_v15  ;;  %2587 = vmatprep.subr.bf16.mxu1 %v7564_v23  ;;  %v7602_v15 = vld [vmem:[%s8420_s28 + $0x248] ss:$24 sps:$4 sm:$0xff]   ;;  %v7603_v23 = vld [vmem:[%s8420_s28 + $0x214] ss:$24 sps:$4 sm:$0xff]  }
 0x3c0   : > { %2527 = vmatpush1.bf16.msra.mxu0 %v7563_v20  ;;  %2588 = vmatpush1.bf16.msra.mxu1 %v7566_v46  ;;  %v7605_v20 = vld [vmem:[%s8420_s28 + $0x210] ss:$24 sps:$4 sm:$0xff]   ;;  %v7606_v46 = vld [vmem:[%s8420_s28 + $0x21c] ss:$24 sps:$4 sm:$0xff]  }
 0x3c1   : > { %2528 = vmatprep.subr.bf16.mxu0 %v7567_v55  ;;  %2589 = vmatprep.subr.bf16.mxu1 %v7570_v56  ;;  %v7608_v55 = vld [vmem:[%s8420_s28 + $0x218] ss:$24 sps:$4 sm:$0xff]   ;;  %v7609_v56 = vld [vmem:[%s8420_s28 + $0x1e4] ss:$24 sps:$4 sm:$0xff]  }
 0x3c4   : > { %2529 = vmatpush1.bf16.msra.mxu0 %v7569_v42  ;;  %2590 = vmatpush1.bf16.msra.mxu1 %v7572_v57  ;;  %v7612_v42 = vld [vmem:[%s8420_s28 + $0x1ec] ss:$24 sps:$4 sm:$0xff]   ;;  %v7611_v57 = vld [vmem:[%s8420_s28 + $0x1e0] ss:$24 sps:$4 sm:$0xff]  }
 0x3c5   : > { %2530 = vmatprep.subr.bf16.mxu0 %v7573_v51  ;;  %2591 = vmatprep.subr.bf16.mxu1 %v7576_v52  ;;  %v7614_v51 = vld [vmem:[%s8420_s28 + $0x1e8] ss:$24 sps:$4 sm:$0xff]   ;;  %v7615_v52 = vld [vmem:[%s8420_s28 + $0x1b4] ss:$24 sps:$4 sm:$0xff]  }
 0x3c8   : > { %2531 = vmatpush1.bf16.msra.mxu0 %v7575_v41  ;;  %2592 = vmatpush1.bf16.msra.mxu1 %v7578_v58  ;;  %v7618_v41 = vld [vmem:[%s8420_s28 + $0x1bc] ss:$24 sps:$4 sm:$0xff]   ;;  %v7617_v58 = vld [vmem:[%s8420_s28 + $0x1b0] ss:$24 sps:$4 sm:$0xff]  }
 0x3c9   : > { %2532 = vmatprep.subr.bf16.mxu0 %v7579_v53  ;;  %2593 = vmatprep.subr.bf16.mxu1 %v7582_v54  ;;  %v7620_v53 = vld [vmem:[%s8420_s28 + $0x1b8] ss:$24 sps:$4 sm:$0xff]   ;;  %v7621_v54 = vld [vmem:[%s8420_s28 + $0x184] ss:$24 sps:$4 sm:$0xff]  }
 0x3cc   : > { %2533 = vmatpush2.bf16.msra.mxu0 %v7581_v59  ;;  %2594 = vmatpush2.bf16.msra.mxu1 %v7584_v39  ;;  %v7624_v59 = vld [vmem:[%s8420_s28 + $0x18c] ss:$24 sps:$4 sm:$0xff]  }
 0x3cd   : > { %2534 = vmatprep.subr.bf16.mxu0 %v7585_v40  ;;  %2595 = vmatprep.subr.bf16.mxu1 %v7588_v47 }
 0x3d0   : > { %2535 = vmatpush2.bf16.msra.mxu0 %v7587_v43  ;;  %2596 = vmatpush2.bf16.msra.mxu1 %v7590_v48 }
 0x3d1   : > { %2536 = vmatprep.subr.bf16.mxu0 %v7591_v33  ;;  %2597 = vmatprep.subr.bf16.mxu1 %v7594_v30 }
 0x3d4   : > { %2537 = vmatpush2.bf16.msra.mxu0 %v7593_v49  ;;  %2598 = vmatpush2.bf16.msra.mxu1 %v7596_v34 }
 0x3d5   : > { %2538 = vmatprep.subr.bf16.mxu0 %v7597_v50  ;;  %2599 = vmatprep.subr.bf16.mxu1 %v7600_v22 }
 0x3d8   : > { %2539 = vmatpush2.bf16.msra.mxu0 %v7599_v29  ;;  %2600 = vmatpush2.bf16.msra.mxu1 %v7602_v15 }
 0x3d9   : > { %2540 = vmatprep.subr.bf16.mxu0 %v7603_v23  ;;  %2601 = vmatprep.subr.bf16.mxu1 %v7606_v46 }
 0x3dc   : > { %2541 = vmatpush2.bf16.msra.mxu0 %v7605_v20  ;;  %2602 = vmatpush2.bf16.msra.mxu1 %v7608_v55 }
 0x3dd   : > { %2542 = vmatprep.subr.bf16.mxu0 %v7609_v56  ;;  %2603 = vmatprep.subr.bf16.mxu1 %v7612_v42 }
 0x3e0   : > { %2543 = vmatpush2.bf16.msra.mxu0 %v7611_v57  ;;  %2604 = vmatpush2.bf16.msra.mxu1 %v7614_v51 }
 0x3e1   : > { %2544 = vmatprep.subr.bf16.mxu0 %v7615_v52  ;;  %2605 = vmatprep.subr.bf16.mxu1 %v7618_v41  ;;  %v7627_v52 = vld [vmem:[%s8420_s28 + $0x160] ss:$24 sps:$4 sm:$0xff]  }
 0x3e4   : > { %2545 = vmatpush2.bf16.msra.mxu0 %v7617_v58  ;;  %2606 = vmatpush2.bf16.msra.mxu1 %v7620_v53 }
 0x3e5   : > { %2546 = vmatprep.subr.bf16.mxu0 %v7621_v54  ;;  %2607 = vmatprep.subr.bf16.mxu1 %v7624_v59  ;;  %v7630_v59 = vld [vmem:[%s8420_s28 + $0x130] ss:$24 sps:$4 sm:$0xff]  }
 0x434   : > { %v1808_v60 = vpop.xlane.xlu0 %1807 }
 0x435   : > { %v1825_v61 = vmul.f32 0.00390625, %v1808_v60  ;;  %v7623_v60 = vld [vmem:[%s8420_s28 + $0x180] ss:$24 sps:$4 sm:$0xff]  }
 0x436   : > { %2547 = vmatpush2.bf16.msra.mxu0 %v7623_v60  ;;  %v7635_v60 = vld [vmem:[%s8420_s28 + $0x104] ss:$24 sps:$4 sm:$0xff]  }
 0x437   : > { %v8636_v45 = vsub.f32 %v8568_v4, %v1825_v61  ;;  %v8639_v32 = vsub.f32 %v8570_v5, %v1825_v61  ;;  %v7626_v61 = vld [vmem:[%s8420_s28 + $0x188] ss:$24 sps:$4 sm:$0xff]  }
 0x438   : > { %v1814_v62 = vpop.xlane.xlu1 %1813  ;;  %v1811_v44 = vpop.xlane.xlu0 %1810  ;;  %2608 = vmatpush2.bf16.msra.mxu1 %v7626_v61 }
 0x439   : > { %v1827_v63 = vmul.f32 0.00390625, %v1814_v62  ;;  %v1826_v1 = vmul.f32 0.00390625, %v1811_v44  ;;  %v1840_v3 = vmul.f32 %v8636_v45, %v8636_v45  ;;  %v1841_v7 = vmul.f32 %v8639_v32, %v8639_v32  ;;  %v7629_v62 = vld [vmem:[%s8420_s28 + $0x164] ss:$24 sps:$4 sm:$0xff]  }
 0x43a   : > { %2638 = vmatprep.subr.bf16.mxu0 %v7629_v62 }
 0x43b   : > { %v8642_v0 = vsub.f32 %v8572_v6, %v1827_v63  ;;  %v8645_v31 = vsub.f32 %v8576_v8, %v1827_v63  ;;  %v8656_v11 = vsub.f32 %v8578_v9, %v1826_v1  ;;  %v8659_v8 = vsub.f32 %v8580_v10, %v1826_v1 }
 0x43c   : > { %v1817_v2 = vpop.xlane.xlu1 %1816  ;;  %v1850_v16 = vadd.f32 %v1841_v7, %v1840_v3  ;;  %v1823_v21 = vpop.xlane.xlu0 %1822 }
 0x43d   : > { %v1828_v4 = vmul.f32 0.00390625, %v1817_v2  ;;  %v1844_v5 = vmul.f32 %v8642_v0, %v8642_v0  ;;  %v1845_v6 = vmul.f32 %v8645_v31, %v8645_v31  ;;  %v1829_v24 = vmul.f32 0.00390625, %v1823_v21 }
 0x43e   : > { %1851 = vadd.xlane.f32.xlu1 %v1850_v16  ;;  %v1842_v26 = vmul.f32 %v8656_v11, %v8656_v11  ;;  %v1843_v9 = vmul.f32 %v8659_v8, %v8659_v8  ;;  %v1762_v16 = vlaneseq }
 0x43f   : > { %v8662_v18 = vsub.f32 %v8584_v12, %v1828_v4  ;;  %v8665_v19 = vsub.f32 %v8586_v13, %v1828_v4  ;;  %v1856_v25 = vadd.f32 %v1845_v6, %v1844_v5  ;;  %v8676_v13 = vsub.f32 %v8588_v14, %v1829_v24 }
 0x440   : > { %v8679_v27 = vsub.f32 %v8592_v17, %v1829_v24  ;;  %v1853_v28 = vadd.f32 %v1843_v9, %v1842_v26 }
 0x441   : > { %v1846_v10 = vmul.f32 %v8662_v18, %v8662_v18  ;;  %v1847_v12 = vmul.f32 %v8665_v19, %v8665_v19  ;;  %v1848_v36 = vmul.f32 %v8676_v13, %v8676_v13 }
 0x442   : > { %1857 = vadd.xlane.f32.xlu1 %v1856_v25  ;;  %1854 = vadd.xlane.f32.xlu0 %v1853_v28  ;;  %v1849_v37 = vmul.f32 %v8679_v27, %v8679_v27 }
 0x443   : > { %v1859_v35 = vadd.f32 %v1847_v12, %v1846_v10  ;;  %v1862_v14 = vsel %vm1818_vm3, %v1848_v36, 0.0  ;;  %v8718_v10 = vshrl.u32 %v1762_v16, 7 }
 0x444   : > { %v1863_v38 = vsel %vm1818_vm3, %v1849_v37, 0.0 }
 0x445   : > { %v1864_v17 = vadd.f32 %v1863_v38, %v1862_v14  ;;  %v8721_v28 = vsub.s32 1, %v8718_v10  ;;  %v8727_v36 = vsub.s32 0, %v8718_v10 }
 0x446   : > { %1860 = vadd.xlane.f32.xlu0 %v1859_v35  ;;  %v1804_v35 = vld [vmem:[%s9727_s23] sm:$0x3] }
 0x447   : > { %1865 = vadd.xlane.f32.xlu1 %v1864_v17  ;;  %v1900_v38 = vrot.slane %v1804_v35, %v8721_v28  ;;  %v1805_v17 = vld [vmem:[%s1155_s0] sm:$0x3]  ;;  %v1896_v40 = vrot.slane %v1804_v35, %v8727_v36  ;;  %v7650_v35 = vld [vmem:[%s8420_s28 + $0x14] ss:$24 sps:$4 sm:$0xff]  }
 0x448   : > { %v1921_v33 = vrot.slane %v1805_v17, %v8721_v28  ;;  %v1917_v50 = vrot.slane %v1805_v17, %v8727_v36  ;;  %v7656_v17 = vld [vmem:[%s8420_s28 + $0x2b4] ss:$24 sps:$4 sm:$0xff]  }
 0x4c7   : > { %v1852_v63 = vpop.xlane.xlu1 %1851 }
 0x4c8   : > { %v1867_v44 = vmul.f32 0.00390625, %v1852_v63 }
 0x4ca   : > { %v1872_v1 = vadd.f32 1e-05, %v1867_v44 }
 0x4cb   : > { %v1858_v2 = vpop.xlane.xlu1 %1857  ;;  %v1855_v3 = vpop.xlane.xlu0 %1854 }
 0x4cc   : > { %7819 = vrsqrt.f32 %v1872_v1  ;;  %v1869_v7 = vmul.f32 0.00390625, %v1858_v2  ;;  %v1868_v4 = vmul.f32 0.00390625, %v1855_v3  ;;  %v7633_v1 = vld [vmem:[%s8420_s28 + $0x100] ss:$24 sps:$4 sm:$0xff]   ;;  %v7638_v3 = vld [vmem:[%s8420_s28 + $0xd4] ss:$24 sps:$4 sm:$0xff]  }
 0x4ce   : > { %v1874_v5 = vadd.f32 1e-05, %v1869_v7  ;;  %v1873_v6 = vadd.f32 1e-05, %v1868_v4 }
 0x4cf   : > { %v1861_v21 = vpop.xlane.xlu0 %1860 }
 0x4d0   : > { %7821 = vrsqrt.f32 %v1874_v5  ;;  %v1870_v24 = vmul.f32 0.00390625, %v1861_v21  ;;  %v1866_v25 = vpop.xlane.xlu1 %1865  ;;  %v7641_v5 = vld [vmem:[%s8420_s28 + $0xa4] ss:$24 sps:$4 sm:$0xff]   ;;  %v7639_v21 = vld [vmem:[%s8420_s28 + $0xa0] ss:$24 sps:$4 sm:$0xff]  }
 0x4d1   : > { %7823 = vrsqrt.f32 %v1873_v6  ;;  %v1871_v26 = vmul.f32 0.00390625, %v1866_v25  ;;  %v7644_v25 = vld [vmem:[%s8420_s28 + $0x74] ss:$24 sps:$4 sm:$0xff]  }
 0x4d2   : > { %v1875_v9 = vadd.f32 1e-05, %v1870_v24 }
 0x4d3   : > { %v1876_v12 = vadd.f32 1e-05, %v1871_v26  ;;  %v7642_v26 = vld [vmem:[%s8420_s28 + $0x70] ss:$24 sps:$4 sm:$0xff]  }
 0x4d4   : > { %7825 = vrsqrt.f32 %v1875_v9  ;;  %v7647_v9 = vld [vmem:[%s8420_s28 + $0x44] ss:$24 sps:$4 sm:$0xff]  }
 0x4d5   : > { %7827 = vrsqrt.f32 %v1876_v12  ;;  %v7645_v12 = vld [vmem:[%s8420_s28 + $0x40] ss:$24 sps:$4 sm:$0xff]  }
 0x4d9   : > { %v7820_v37 = vpop.eup %7819 }
 0x4da   : > { %v1883_v14 = vmul.f32 %v7820_v37, %v8639_v32  ;;  %v1882_v39 = vmul.f32 %v7820_v37, %v8636_v45  ;;  %v7648_v37 = vld [vmem:[%s8420_s28 + $0x10] ss:$24 sps:$4 sm:$0xff]  }
 0x4dc   : > { %v1904_v48 = vmul.f32 %v1900_v38, %v1883_v14  ;;  %v1903_v32 = vmul.f32 %v1896_v40, %v1882_v39  ;;  %v7653_v14 = vld [vmem:[%s8420_s28 + $0x2e4] ss:$24 sps:$4 sm:$0xff]   ;;  %v7654_v39 = vld [vmem:[%s8420_s28 + $0x2b0] ss:$24 sps:$4 sm:$0xff]  }
 0x4dd   : > { %v7822_v43 = vpop.eup %7821 }
 0x4de   : > { %v7824_v47 = vpop.eup %7823  ;;  %v1887_v49 = vmul.f32 %v7822_v43, %v8645_v31  ;;  %v1925_v23 = vadd.f32 %v1921_v33, %v1904_v48  ;;  %v1924_v56 = vadd.f32 %v1917_v50, %v1903_v32  ;;  %v1886_v57 = vmul.f32 %v7822_v43, %v8642_v0  ;;  %v7657_v43 = vld [vmem:[%s8420_s28 + $0x280] ss:$24 sps:$4 sm:$0xff]   ;;  %v7660_v48 = vld [vmem:[%s8420_s28 + $0x250] ss:$24 sps:$4 sm:$0xff]   ;;  %v7671_v32 = vld [vmem:[%s8420_s28 + $0x1c4] ss:$24 sps:$4 sm:$0xff]  }
 0x4df   : > { %v1885_v30 = vmul.f32 %v7824_v47, %v8659_v8  ;;  %v1884_v34 = vmul.f32 %v7824_v47, %v8656_v11  ;;  %v7662_v47 = vld [vmem:[%s8420_s28 + $0x254] ss:$24 sps:$4 sm:$0xff]  }
 0x4e0   : > { %v1908_v46 = vmul.f32 %v1900_v38, %v1887_v49  ;;  %v1907_v0 = vmul.f32 %v1896_v40, %v1886_v57  ;;  %v7663_v49 = vld [vmem:[%s8420_s28 + $0x220] ss:$24 sps:$4 sm:$0xff]  }
 0x4e1   : > { %v7826_v29 = vpop.eup %7825  ;;  %v1906_v22 = vmul.f32 %v1900_v38, %v1885_v30  ;;  %v1905_v45 = vmul.f32 %v1896_v40, %v1884_v34  ;;  %v7668_v30 = vld [vmem:[%s8420_s28 + $0x1f4] ss:$24 sps:$4 sm:$0xff]   ;;  %v7666_v34 = vld [vmem:[%s8420_s28 + $0x1f0] ss:$24 sps:$4 sm:$0xff]  }
 0x4e2   : > { %v7828_v15 = vpop.eup %7827  ;;  %v1889_v20 = vmul.f32 %v7826_v29, %v8665_v19  ;;  %v1888_v55 = vmul.f32 %v7826_v29, %v8662_v18  ;;  %v1929_v58 = vadd.f32 %v1921_v33, %v1908_v46  ;;  %v7632_v18 = vld [vmem:[%s8420_s28 + $0x134] ss:$24 sps:$4 sm:$0xff]   ;;  %v1928_v44 = vadd.f32 %v1917_v50, %v1907_v0 }
 0x4e3   : > { %v1927_v31 = vadd.f32 %v1921_v33, %v1906_v22  ;;  %v1926_v8 = vadd.f32 %v1917_v50, %v1905_v45  ;;  %v1891_v11 = vmul.f32 %v7828_v15, %v8679_v27  ;;  %v1890_v62 = vmul.f32 %v7828_v15, %v8676_v13  ;;  %v7636_v13 = vld [vmem:[%s8420_s28 + $0xd0] ss:$24 sps:$4 sm:$0xff]   ;;  %v7674_v29 = vld [vmem:[%s8420_s28 + $0x194] ss:$24 sps:$4 sm:$0xff]  }
 0x4e4   : > { %v1910_v42 = vmul.f32 %v1900_v38, %v1889_v20  ;;  %v1909_v53 = vmul.f32 %v1896_v40, %v1888_v55  ;;  %v7672_v22 = vld [vmem:[%s8420_s28 + $0x190] ss:$24 sps:$4 sm:$0xff]   ;;  %v8203_v45 = vmov 0.0  }
 0x4e5   : > { %v1935_v51 = vpack.c.bf16 %v1927_v31, %v1925_v23  ;;  %v8746_v41 = vpack.c.bf16 %v1926_v8, %v1924_v56  ;;  %v1912_v54 = vmul.f32 %v1900_v38, %v1891_v11  ;;  %v1911_v7 = vmul.f32 %v1896_v40, %v1890_v62  ;;  %v7651_v38 = vld [vmem:[%s8420_s28 + $0x2e0] ss:$24 sps:$4 sm:$0xff]   ;;  %v7659_v40 = vld [vmem:[%s8420_s28 + $0x284] ss:$24 sps:$4 sm:$0xff]   ;;  %7240 = vmatprep.subr.bf16.mxu1 %v8203_v45 }
 0x4e6   : > { %v1931_v19 = vadd.f32 %v1921_v33, %v1910_v42  ;;  %v1930_v61 = vadd.f32 %v1917_v50, %v1909_v53 }
 0x4e7   : > { %2548 = vmatprep.mubr.bf16.mxu0 %v1935_v51  ;;  %2609 = vmatprep.mubr.bf16.mxu1 %v1935_v51  ;;  %v1933_v63 = vadd.f32 %v1921_v33, %v1912_v54  ;;  %v1932_v6 = vadd.f32 %v1917_v50, %v1911_v7  ;;  %v7665_v33 = vld [vmem:[%s8420_s28 + $0x224] ss:$24 sps:$4 sm:$0xff]   ;;  %v7669_v50 = vld [vmem:[%s8420_s28 + $0x1c0] ss:$24 sps:$4 sm:$0xff]  }
 0x4e8   : > { %2549 = vmatmul.mubr.bf16.vlgmr.msra.gmra.mxu0 %v8746_v41  ;;  %2610 = vmatmul.mubr.bf16.vlgmr.msra.gmra.mxu1 %v8746_v41  ;;  %v8751_v27 = vpack.c.bf16 %v1931_v19, %v1929_v58  ;;  %v8759_v2 = vpack.c.bf16 %v1930_v61, %v1928_v44 }
 0x4e9   : > { %2639 = vmatpush1.bf16.msra.mxu0 %v7627_v52  ;;  %v8762_v4 = vpack.c.bf16 %v1933_v63, %v1933_v63  ;;  %v1938_v24 = vpack.c.bf16 %v1932_v6, %v1932_v6 }
 0x4ea   : > { %2558 = vmatprep.mubr.bf16.mxu0 %v8751_v27  ;;  %2619 = vmatprep.mubr.bf16.mxu1 %v8751_v27 }
 0x4eb   : > { %2640 = vmatprep.subr.bf16.mxu0 %v7632_v18 }
 0x4ed   : > { %2641 = vmatpush1.bf16.msra.mxu0 %v7630_v59 }
 0x4ee   : > { %2642 = vmatprep.subr.bf16.mxu0 %v7635_v60 }
 0x4f0   : > { %2559 = vmatmul.mubr.bf16.gmra.mxu0 %v8759_v2  ;;  %2620 = vmatmul.mubr.bf16.gmra.mxu1 %v8759_v2 }
 0x4f1   : > { %2643 = vmatpush1.bf16.msra.mxu0 %v7633_v1  ;;  %2568 = vmatprep.mubr.bf16.mxu0 %v8762_v4 }
 0x4f2   : > { %2629 = vmatprep.mubr.bf16.mxu1 %v8762_v4  ;;  %2644 = vmatprep.subr.bf16.mxu0 %v7638_v3 }
 0x4f5   : > { %2645 = vmatpush1.bf16.msra.mxu0 %v7636_v13 }
 0x4f6   : > { %2646 = vmatprep.subr.bf16.mxu0 %v7641_v5 }
 0x4f8   : > { %2569 = vmatmul.mubr.bf16.gmra.mxu0 %v1938_v24  ;;  %2630 = vmatmul.mubr.bf16.gmra.mxu1 %v1938_v24 }
 0x4f9   : > { %2647 = vmatpush1.bf16.msra.mxu0 %v7639_v21  ;;  %2670 = vmatprep.mubr.bf16.mxu0 %v1935_v51 }
 0x4fa   : > { %2648 = vmatprep.subr.bf16.mxu0 %v7644_v25  ;;  %7246 = vmatprep.mubr.msk.bf16.mxu1 %vm8204_vm4, %v8203_v45 }
 0x4fd   : > { %2649 = vmatpush1.bf16.msra.mxu0 %v7642_v26 }
 0x4fe   : > { %2650 = vmatprep.subr.bf16.mxu0 %v7647_v9 }
 0x501   : > { %2651 = vmatpush1.bf16.msra.mxu0 %v7645_v12 }
 0x502   : > { %2652 = vmatprep.subr.bf16.mxu0 %v7650_v35 }
 0x505   : > { %2653 = vmatpush1.bf16.msra.mxu0 %v7648_v37 }
 0x506   : > { %2654 = vmatprep.subr.bf16.mxu0 %v7653_v14 }
 0x509   : > { %2655 = vmatpush2.bf16.msra.mxu0 %v7651_v38 }
 0x50a   : > { %2656 = vmatprep.subr.bf16.mxu0 %v7656_v17 }
 0x50d   : > { %2657 = vmatpush2.bf16.msra.mxu0 %v7654_v39 }
 0x50e   : > { %2658 = vmatprep.subr.bf16.mxu0 %v7659_v40 }
 0x511   : > { %2659 = vmatpush2.bf16.msra.mxu0 %v7657_v43 }
 0x512   : > { %2660 = vmatprep.subr.bf16.mxu0 %v7662_v47 }
 0x515   : > { %2661 = vmatpush2.bf16.msra.mxu0 %v7660_v48 }
 0x516   : > { %2662 = vmatprep.subr.bf16.mxu0 %v7665_v33 }
 0x519   : > { %2663 = vmatpush2.bf16.msra.mxu0 %v7663_v49 }
 0x51a   : > { %2664 = vmatprep.subr.bf16.mxu0 %v7668_v30 }
 0x51d   : > { %2665 = vmatpush2.bf16.msra.mxu0 %v7666_v34  ;;  %v1774_v34 = vand.u32 127, %v1762_v16 }
 0x51e   : > { %2666 = vmatprep.subr.bf16.mxu0 %v7671_v32  ;;  %v1768_v32 = vcvt.s32.f32 %v8718_v10 }
 0x521   : > { %2667 = vmatpush2.bf16.msra.mxu0 %v7669_v50  ;;  %v1775_v50 = vcvt.s32.f32 %v1774_v34 }
 0x522   : > { %2668 = vmatprep.subr.bf16.mxu0 %v7674_v29  ;;  %v1764_v29 = vadd.s32 8, %v8718_v10 }
 0x525   : > { %2669 = vmatpush2.bf16.msra.mxu0 %v7672_v22  ;;  %v8850_v22 = vadd.f32 0.5, %v1768_v32 }
 0x526   : > { %7222 = vmatprep.subr.bf16.mxu0 %v8203_v45 }
 0x528   : > { %2671 = vmatmul.mubr.bf16.vlgmr.msra.gmra.mxu0 %v8746_v41 }
 0x529   : > { %2680 = vmatprep.mubr.bf16.mxu0 %v8751_v27 }
 0x530   : > { %2681 = vmatmul.mubr.bf16.gmra.mxu0 %v8759_v2 }
 0x531   : > { %2690 = vmatprep.mubr.bf16.mxu0 %v8762_v4 }
 0x538   : > { %2691 = vmatmul.mubr.bf16.gmra.mxu0 %v1938_v24 }
 0x539   : > { %7228 = vmatprep.mubr.msk.bf16.mxu0 %vm8204_vm4, %v8203_v45 }
 0x5a8   : > { %v2550_v15 = vpop.f32.mrf.mxu0  ;;  %v2611_v23 = vpop.f32.mrf.mxu1 }
 0x5aa   : > { %v8803_v20 = vpop.f32.mrf.mxu0  ;;  %v8805_v46 = vpop.f32.mrf.mxu1 }
 0x5ac   : > { %v2554_v55 = vpop.f32.mrf.mxu0  ;;  %v2615_v31 = vpop.f32.mrf.mxu1 }
 0x5ad   : > { %v2702_v7 = vpack.c.bf16 %v2615_v31, %v2611_v23  ;;  %v2699_v4 = vpack.c.bf16 %v2554_v55, %v2550_v15  ;;  %v1791_v15 = vadd.f32 0.5, %v1775_v50  ;;  %v1765_v23 = vadd.s32 16, %v8718_v10 }
 0x5ae   : > { %v8807_v56 = vpop.f32.mrf.mxu0  ;;  %v8809_v8 = vpop.f32.mrf.mxu1  ;;  %v1769_v55 = vcvt.s32.f32 %v1764_v29  ;;  %v1781_v31 = vmul.f32 0.11111111, %v8850_v22 }
 0x5af   : > { %v2903_v11 = vpack.c.bf16 %v8807_v56, %v8803_v20  ;;  %v2906_v42 = vpack.c.bf16 %v8809_v8, %v8805_v46 }
 0x5b0   : > { %v2560_v57 = vpop.f32.mrf.mxu0  ;;  %v2621_v51 = vpop.f32.mrf.mxu1 }
 0x5b2   : > { %v8815_v52 = vpop.f32.mrf.mxu0  ;;  %v8817_v41 = vpop.f32.mrf.mxu1 }
 0x5b4   : > { %v2564_v58 = vpop.f32.mrf.mxu0  ;;  %v2625_v19 = vpop.f32.mrf.mxu1 }
 0x5b5   : > { %v2703_v3 = vpack.c.bf16 %v2625_v19, %v2621_v51  ;;  %v2700_v13 = vpack.c.bf16 %v2564_v58, %v2560_v57  ;;  %v1792_v57 = vmul.f32 0.11111111, %v1791_v15  ;;  %v1770_v51 = vcvt.s32.f32 %v1765_v23 }
 0x5b6   : > { %v8819_v53 = vpop.f32.mrf.mxu0  ;;  %v8821_v18 = vpop.f32.mrf.mxu1  ;;  %v1777_v58 = vadd.f32 0.5, %v1769_v55  ;;  %v1766_v19 = vadd.s32 24, %v8718_v10 }
 0x5b7   : > { %v2904_v54 = vpack.c.bf16 %v8819_v53, %v8815_v52  ;;  %v2907_v27 = vpack.c.bf16 %v8821_v18, %v8817_v41  ;;  %v8855_v16 = vfloor.f32 %v1792_v57 }
 0x5b8   : > { %v2570_v0 = vpop.f32.mrf.mxu0  ;;  %v2631_v59 = vpop.f32.mrf.mxu1 }
 0x5b9   : > { %v2704_v60 = vpack.c.bf16 %v2631_v59, %v2631_v59  ;;  %v2701_v5 = vpack.c.bf16 %v2570_v0, %v2570_v0  ;;  %v1786_v0 = vfloor.f32 %v1781_v31  ;;  %v1778_v59 = vadd.f32 0.5, %v1770_v51 }
 0x5ba   : > { %v8827_v61 = vpop.f32.mrf.mxu0  ;;  %v8829_v62 = vpop.f32.mrf.mxu1 }
 0x5bb   : > { %7223 = vmatpush3.bf16.xpose.msra.mxu0 %v2704_v60  ;;  %v1782_v60 = vmul.f32 0.11111111, %v1777_v58  ;;  %vm1794_vm6 = vcmp.eq.f32.partialorder %v1786_v0, %v8855_v16  ;;  %v2905_v46 = vpack.c.bf16 %v8827_v61, %v8827_v61 }
 0x5bc   : > { %v2574_v63 = vpop.f32.mrf.mxu0  ;;  %v2635_v44 = vpop.f32.mrf.mxu1  ;;  %7224 = vmatprep.subr.bf16.mxu0 %v8203_v45 }
 0x5bd   : > { %v1771_v63 = vcvt.s32.f32 %v1766_v19  ;;  %v1767_v44 = vadd.s32 32, %v8718_v10 }
 0x5be   : > { %v2575_v1 = vpop.f32.mrf.mxu0  ;;  %v2636_v2 = vpop.f32.mrf.mxu1 }
 0x5bf   : > { %v1783_v1 = vmul.f32 0.11111111, %v1778_v59  ;;  %v1787_v2 = vfloor.f32 %v1782_v60 }
 0x5c1   : > { %vm1795_vm7 = vcmp.eq.f32.partialorder %v1787_v2, %v8855_v16 }
 0x5c3   : > { %7225 = vmatpush3.bf16.xpose.msra.mxu0 %v2703_v3  ;;  %v1779_v3 = vadd.f32 0.5, %v1771_v63 }
 0x5c4   : > { %7226 = vmatprep.subr.bf16.mxu0 %v8203_v45 }
 0x5cb   : > { %7227 = vmatpush3.bf16.xpose.msra.mxu0 %v2702_v7  ;;  %v1772_v7 = vcvt.s32.f32 %v1767_v44 }
 0x5cc   : > { %7276 = vmatprep.subr.bf16.mxu0 %v8203_v45 }
 0x5d2   : > { %7229 = vmatmul.mubr.bf16.vlgmr.msra.gmra.mxu0 %v2699_v4 }
 0x5d3   : > { %7232 = vmatprep.mubr.msk.bf16.mxu0 %vm8204_vm4, %v8203_v45 }
 0x5da   : > { %7233 = vmatmul.mubr.bf16.gmra.mxu0 %v2700_v13  ;;  %v8205_v13 = vmov -1e+30  }
 0x5db   : > { %7236 = vmatprep.mubr.msk.bf16.mxu0 %vm8204_vm4, %v8203_v45 }
 0x5e2   : > { %7237 = vmatmul.mubr.bf16.gmra.mxu0 %v2701_v5  ;;  %v8859_v5 = vsel %vm1794_vm6, 0.0, %v8205_v13 }
 0x5e3   : > { %7282 = vmatprep.mubr.msk.bf16.mxu0 %vm8204_vm4, %v8203_v45 }
 0x5e8   : > { %v2672_v6 = vpop.f32.mrf.mxu0 }
 0x5ea   : > { %v2674_v21 = vpop.f32.mrf.mxu0 }
 0x5ec   : > { %v2676_v24 = vpop.f32.mrf.mxu0 }
 0x5ed   : > { %v2705_v49 = vpack.c.bf16 %v2676_v24, %v2672_v6  ;;  %v1788_v6 = vfloor.f32 %v1783_v1  ;;  %v1784_v24 = vmul.f32 0.11111111, %v1779_v3 }
 0x5ee   : > { %v2678_v25 = vpop.f32.mrf.mxu0 }
 0x5ef   : > { %v2909_v30 = vpack.c.bf16 %v2678_v25, %v2674_v21  ;;  %v1780_v25 = vadd.f32 0.5, %v1772_v7  ;;  %vm1796_vm9 = vcmp.eq.f32.partialorder %v1788_v6, %v8855_v16 }
 0x5f0   : > { %v2682_v26 = vpop.f32.mrf.mxu0 }
 0x5f2   : > { %v2684_v9 = vpop.f32.mrf.mxu0 }
 0x5f4   : > { %v2686_v12 = vpop.f32.mrf.mxu0 }
 0x5f5   : > { %v2706_v47 = vpack.c.bf16 %v2686_v12, %v2682_v26  ;;  %v8863_v12 = vsel %vm1795_vm7, 0.0, %v8205_v13 }
 0x5f6   : > { %v2688_v35 = vpop.f32.mrf.mxu0 }
 0x5f7   : > { %v2910_v33 = vpack.c.bf16 %v2688_v35, %v2684_v9 }
 0x5f8   : > { %v2692_v37 = vpop.f32.mrf.mxu0 }
 0x5f9   : > { %v2707_v14 = vpack.c.bf16 %v2692_v37, %v2692_v37 }
 0x5fa   : > { %v2694_v38 = vpop.f32.mrf.mxu0 }
 0x5fb   : > { %v2845_v17 = vsel %vm2843_vm5, %v2707_v14, 0  ;;  %v2911_v39 = vpack.c.bf16 %v2694_v38, %v2694_v38  ;;  %v1789_v14 = vfloor.f32 %v1784_v24  ;;  %v1785_v38 = vmul.f32 0.11111111, %v1780_v25 }
 0x5fc   : > { %v2696_v40 = vpop.f32.mrf.mxu0  ;;  %7241 = vmatpush3.bf16.msra.mxu1 %v2845_v17 }
 0x5fd   : > { %v3046_v43 = vsel %vm2843_vm5, %v2911_v39, 0  ;;  %7242 = vmatprep.subr.bf16.mxu1 %v8203_v45  ;;  %vm1797_vm10 = vcmp.eq.f32.partialorder %v1789_v14, %v8855_v16 }
 0x5fe   : > { %v2697_v48 = vpop.f32.mrf.mxu0  ;;  %7277 = vmatpush3.bf16.msra.mxu0 %v3046_v43  ;;  %v8868_v43 = vsel %vm1796_vm9, 0.0, %v8205_v13  ;;  %v8873_v32 = vsel %vm1797_vm10, 0.0, %v8205_v13 }
 0x5ff   : > { %7278 = vmatprep.subr.bf16.mxu0 %v8203_v45 }
 0x600   : > { %7243 = vmatpush3.bf16.msra.mxu1 %v2706_v47 }
 0x601   : > { %7244 = vmatprep.subr.bf16.mxu1 %v8203_v45 }
 0x602   : > { %7279 = vmatpush3.bf16.msra.mxu0 %v2910_v33  ;;  %v1790_v33 = vfloor.f32 %v1785_v38 }
 0x603   : > { %7280 = vmatprep.subr.bf16.mxu0 %v8203_v45 }
 0x604   : > { %7245 = vmatpush3.bf16.msra.mxu1 %v2705_v49  ;;  %vm1798_vm11 = vcmp.eq.f32.partialorder %v1790_v33, %v8855_v16 }
 0x605   : > { %7258 = vmatprep.subr.bf16.mxu1 %v8203_v45  ;;  %v8878_v31 = vsel %vm1798_vm11, 0.0, %v8205_v13 }
 0x606   : > { %7281 = vmatpush3.bf16.msra.mxu0 %v2909_v30 }
 0x692   : > { %v2742_v4 = vpop.f32.mrf.mxu0 }
 0x693   : > { %v2764_v21 = vmul.f32 0.088388346, %v2742_v4 }
 0x694   : > { %v7230_v26 = vpop.f32.mrf.mxu0 }
 0x695   : > { %v2769_v10 = vadd.f32 %v2764_v21, %v8859_v5 }
 0x696   : > { %v2745_v9 = vpop.f32.mrf.mxu0 }
 0x697   : > { %v2765_v35 = vmul.f32 0.088388346, %v2745_v9  ;;  %v2775_v37 = vsel %vm2774_vm8, %v2769_v10, -inf }
 0x698   : > { %2776 = vmax.xlane.f32.xlu0 %v2775_v37  ;;  %v7231_v17 = vpop.f32.mrf.mxu0 }
 0x699   : > { %v2770_v39 = vadd.f32 %v2765_v35, %v8863_v12 }
 0x69a   : > { %v2750_v40 = vpop.f32.mrf.mxu0 }
 0x69b   : > { %v2766_v47 = vmul.f32 0.088388346, %v2750_v40  ;;  %v2778_v48 = vsel %vm2774_vm8, %v2770_v39, -inf }
 0x69c   : > { %2779 = vmax.xlane.f32.xlu1 %v2778_v48  ;;  %v7234_v49 = vpop.f32.mrf.mxu0 }
 0x69d   : > { %v2771_v30 = vadd.f32 %v2766_v47, %v8868_v43 }
 0x69e   : > { %v2753_v34 = vpop.f32.mrf.mxu0 }
 0x69f   : > { %v2767_v50 = vmul.f32 0.088388346, %v2753_v34  ;;  %v2781_v29 = vsel %vm2774_vm8, %v2771_v30, -inf }
 0x6a0   : > { %2782 = vmax.xlane.f32.xlu0 %v2781_v29  ;;  %v7235_v15 = vpop.f32.mrf.mxu0 }
 0x6a1   : > { %v2772_v23 = vadd.f32 %v2767_v50, %v8873_v32 }
 0x6a2   : > { %v2758_v55 = vpop.f32.mrf.mxu0 }
 0x6a3   : > { %v2768_v57 = vmul.f32 0.088388346, %v2758_v55  ;;  %v2784_v51 = vsel %vm2774_vm8, %v2772_v23, -inf }
 0x6a4   : > { %2785 = vmax.xlane.f32.xlu1 %v2784_v51  ;;  %v7238_v58 = vpop.f32.mrf.mxu0 }
 0x6a5   : > { %v2773_v19 = vadd.f32 %v2768_v57, %v8878_v31  ;;  %v2908_v58 = vpack.c.bf16 %v8829_v62, %v8829_v62 }
 0x6a6   : > { %v2761_v0 = vpop.f32.mrf.mxu0 }
 0x6a7   : > { %v2788_v59 = vsel %vm2787_vm12, %v2773_v19, -inf }
 0x6a8   : > { %2789 = vmax.xlane.f32.xlu0 %v2788_v59  ;;  %v7239_v60 = vpop.f32.mrf.mxu0 }
 0x721   : > { %v2777_v63 = vpop.xlane.xlu0 %2776 }
 0x722   : > { %v2791_v44 = vsub.f32 %v2769_v10, %v2777_v63 }
 0x724   : > { %v2796_v1 = vmul.f32 1.442695, %v2791_v44 }
 0x725   : > { %v2780_v2 = vpop.xlane.xlu1 %2779 }
 0x726   : > { %7829 = vpow2.f32 %v2796_v1  ;;  %v2792_v3 = vsub.f32 %v2770_v39, %v2780_v2 }
 0x728   : > { %v2798_v7 = vmul.f32 1.442695, %v2792_v3 }
 0x729   : > { %v2783_v4 = vpop.xlane.xlu0 %2782 }
 0x72a   : > { %7831 = vpow2.f32 %v2798_v7  ;;  %v2793_v13 = vsub.f32 %v2771_v30, %v2783_v4 }
 0x72c   : > { %v2800_v6 = vmul.f32 1.442695, %v2793_v13 }
 0x72d   : > { %v2786_v21 = vpop.xlane.xlu1 %2785 }
 0x72e   : > { %7833 = vpow2.f32 %v2800_v6  ;;  %v2794_v24 = vsub.f32 %v2772_v23, %v2786_v21 }
 0x730   : > { %v2802_v25 = vmul.f32 1.442695, %v2794_v24 }
 0x731   : > { %v2790_v26 = vpop.xlane.xlu0 %2789 }
 0x732   : > { %7835 = vpow2.f32 %v2802_v25  ;;  %v2795_v9 = vsub.f32 %v2773_v19, %v2790_v26 }
 0x733   : > { %v7830_v35 = vpop.eup %7829 }
 0x734   : > { %v2804_v37 = vmul.f32 1.442695, %v2795_v9  ;;  %v2806_v10 = vsel %vm2774_vm8, %v7830_v35, 0.0 }
 0x735   : > { %2807 = vadd.xlane.f32.xlu1 %v2806_v10 }
 0x736   : > { %7837 = vpow2.f32 %v2804_v37 }
 0x737   : > { %v7832_v14 = vpop.eup %7831 }
 0x738   : > { %v2809_v38 = vsel %vm2774_vm8, %v7832_v14, 0.0 }
 0x739   : > { %2810 = vadd.xlane.f32.xlu0 %v2809_v38 }
 0x73b   : > { %v7834_v17 = vpop.eup %7833 }
 0x73c   : > { %v2812_v39 = vsel %vm2774_vm8, %v7834_v17, 0.0 }
 0x73d   : > { %2813 = vadd.xlane.f32.xlu1 %v2812_v39 }
 0x73f   : > { %v7836_v40 = vpop.eup %7835 }
 0x740   : > { %v2815_v47 = vsel %vm2774_vm8, %v7836_v40, 0.0 }
 0x741   : > { %2816 = vadd.xlane.f32.xlu0 %v2815_v47 }
 0x743   : > { %v7838_v48 = vpop.eup %7837 }
 0x744   : > { %v2818_v33 = vsel %vm2787_vm12, %v7838_v48, 0.0 }
 0x745   : > { %2819 = vadd.xlane.f32.xlu1 %v2818_v33 }
 0x7be   : > { %v2808_v49 = vpop.xlane.xlu1 %2807 }
 0x7bf   : > { %7839 = vrcp.f32 %v2808_v49 }
 0x7c2   : > { %v2811_v30 = vpop.xlane.xlu0 %2810 }
 0x7c3   : > { %7841 = vrcp.f32 %v2811_v30 }
 0x7c6   : > { %v2814_v34 = vpop.xlane.xlu1 %2813 }
 0x7c7   : > { %7843 = vrcp.f32 %v2814_v34 }
 0x7ca   : > { %v2817_v50 = vpop.xlane.xlu0 %2816 }
 0x7cb   : > { %7845 = vrcp.f32 %v2817_v50 }
 0x7cc   : > { %v7840_v29 = vpop.eup %7839 }
 0x7cd   : > { %v2826_v55 = vmul.f32 %v7840_v29, %v7830_v35 }
 0x7ce   : > { %v2820_v15 = vpop.xlane.xlu1 %2819 }
 0x7cf   : > { %7847 = vrcp.f32 %v2820_v15 }
 0x7d0   : > { %v7842_v23 = vpop.eup %7841 }
 0x7d1   : > { %v2827_v57 = vmul.f32 %v7842_v23, %v7832_v14 }
 0x7d3   : > { %v2831_v51 = vpack.c.bf16 %v2827_v57, %v2826_v55 }
 0x7d4   : > { %v7844_v19 = vpop.eup %7843 }
 0x7d5   : > { %7247 = vmatmul.mubr.msk.bf16.vlgmr.msra.gmra.mxu1 %vm2774_vm8, %v2831_v51  ;;  %v2828_v59 = vmul.f32 %v7844_v19, %v7834_v17 }
 0x7d6   : > { %7259 = vmatpush3.bf16.xpose.msra.mxu1 %v2908_v58  ;;  %7250 = vmatprep.mubr.msk.bf16.mxu1 %vm8204_vm4, %v8203_v45 }
 0x7d7   : > { %7260 = vmatprep.subr.bf16.mxu1 %v8203_v45 }
 0x7d8   : > { %v7846_v0 = vpop.eup %7845 }
 0x7d9   : > { %v2829_v60 = vmul.f32 %v7846_v0, %v7836_v40 }
 0x7db   : > { %v2832_v63 = vpack.c.bf16 %v2829_v60, %v2828_v59 }
 0x7dc   : > { %v7848_v44 = vpop.eup %7847 }
 0x7dd   : > { %7251 = vmatmul.mubr.msk.bf16.gmra.mxu1 %vm2774_vm8, %v2832_v63  ;;  %v2830_v62 = vmul.f32 %v7848_v44, %v7838_v48 }
 0x7de   : > { %7261 = vmatpush3.bf16.xpose.msra.mxu1 %v2907_v27  ;;  %7254 = vmatprep.mubr.msk.bf16.mxu1 %vm8204_vm4, %v8203_v45 }
 0x7df   : > { %7262 = vmatprep.subr.bf16.mxu1 %v8203_v45  ;;  %v2833_v1 = vpack.c.bf16 %v2830_v62, %v2830_v62 }
 0x7e5   : > { %7255 = vmatmul.mubr.msk.bf16.gmra.mxu1 %vm2774_vm8, %v2833_v1 }
 0x7e6   : > { %7263 = vmatpush3.bf16.xpose.msra.mxu1 %v2906_v42  ;;  %7264 = vmatprep.mubr.msk.bf16.mxu1 %vm8204_vm4, %v8203_v45 }
 0x7ed   : > { %7265 = vmatmul.mubr.bf16.vlgmr.msra.gmra.mxu1 %v2903_v11 }
 0x7ee   : > { %7268 = vmatprep.mubr.msk.bf16.mxu1 %vm8204_vm4, %v8203_v45 }
 0x7f5   : > { %7269 = vmatmul.mubr.bf16.gmra.mxu1 %v2904_v54 }
 0x7f6   : > { %7272 = vmatprep.mubr.msk.bf16.mxu1 %vm8204_vm4, %v8203_v45 }
 0x7fd   : > { %7273 = vmatmul.mubr.bf16.gmra.mxu1 %v2905_v46 }
 0x895   : > { %v8919_v8 = vpop.f32.mrf.mxu1 }
 0x897   : > { %v7248_v42 = vpop.f32.mrf.mxu1 }
 0x899   : > { %v8921_v41 = vpop.f32.mrf.mxu1 }
 0x89a   : > { %v3104_v20 = vpack.c.bf16 %v8921_v41, %v8919_v8 }
 0x89b   : > { %v7249_v56 = vpop.f32.mrf.mxu1 }
 0x89d   : > { %v8925_v11 = vpop.f32.mrf.mxu1 }
 0x89f   : > { %v7252_v52 = vpop.f32.mrf.mxu1 }
 0x8a1   : > { %v8927_v53 = vpop.f32.mrf.mxu1 }
 0x8a2   : > { %v3106_v18 = vpack.c.bf16 %v8927_v53, %v8925_v11  ;;  %v7900_v53 = vld [vmem:[#allocation2 + $0x8] sm:$0xff] }
 0x8a3   : > { %v7253_v54 = vpop.f32.mrf.mxu1 }
 0x8a5   : > { %v8931_v27 = vpop.f32.mrf.mxu1 }
 0x8a6   : > { %v3108_v8 = vpack.c.bf16 %v8931_v27, %v8931_v27  ;;  %v7901_v27 = vld [vmem:[#allocation2 + $0x10] sm:$0xff] }
 0x8a7   : > { %v7256_v61 = vpop.f32.mrf.mxu1 }
 0x8a9   : > { %v2900_v2 = vpop.f32.mrf.mxu1 }
 0x8ab   : > { %v7257_v3 = vpop.f32.mrf.mxu1 }
 0x8ad   : > { %v2946_v7 = vpop.f32.mrf.mxu1 }
 0x8ae   : > { %v2968_v4 = vmul.f32 0.088388346, %v2946_v7  ;;  %v7675_v7 = vld [vmem:[%s8425_s3 + $0x70] ss:$8 sps:$4 sm:$0xff]  }
 0x8af   : > { %v7266_v13 = vpop.f32.mrf.mxu1 }
 0x8b0   : > { %v2973_v6 = vadd.f32 %v2968_v4, %v8859_v5  ;;  %v7677_v4 = vld [vmem:[%s8425_s3 + $0x74] ss:$8 sps:$4 sm:$0xff]   ;;  %v7680_v13 = vld [vmem:[%s8425_s3 + $0x64] ss:$8 sps:$4 sm:$0xff]  }
 0x8b1   : > { %v2949_v21 = vpop.f32.mrf.mxu1  ;;  %3302 = vmatprep.subr.bf16.mxu1 %v7677_v4 }
 0x8b2   : > { %v2969_v24 = vmul.f32 0.088388346, %v2949_v21  ;;  %v2978_v25 = vsel %vm2774_vm8, %v2973_v6, -inf  ;;  %3303 = vmatpush1.bf16.msra.mxu1 %v7675_v7  ;;  %v7683_v21 = vld [vmem:[%s8425_s3 + $0x54] ss:$8 sps:$4 sm:$0xff]  }
 0x8b3   : > { %2979 = vmax.xlane.f32.xlu0 %v2978_v25  ;;  %v7267_v26 = vpop.f32.mrf.mxu1  ;;  %3304 = vmatprep.subr.bf16.mxu1 %v7680_v13  ;;  %v7686_v25 = vld [vmem:[%s8425_s3 + $0x44] ss:$8 sps:$4 sm:$0xff]  }
 0x8b4   : > { %v2974_v9 = vadd.f32 %v2969_v24, %v8863_v12  ;;  %v7681_v24 = vld [vmem:[%s8425_s3 + $0x50] ss:$8 sps:$4 sm:$0xff]   ;;  %v7684_v26 = vld [vmem:[%s8425_s3 + $0x40] ss:$8 sps:$4 sm:$0xff]  }
 0x8b5   : > { %v2954_v35 = vpop.f32.mrf.mxu1 }
 0x8b6   : > { %v2970_v37 = vmul.f32 0.088388346, %v2954_v35  ;;  %v2981_v10 = vsel %vm2774_vm8, %v2974_v9, -inf  ;;  %v7687_v35 = vld [vmem:[%s8425_s3 + $0x30] ss:$8 sps:$4 sm:$0xff]  }
 0x8b7   : > { %2982 = vmax.xlane.f32.xlu1 %v2981_v10  ;;  %v7270_v14 = vpop.f32.mrf.mxu1  ;;  %v7690_v10 = vld [vmem:[%s8425_s3 + $0x20] ss:$8 sps:$4 sm:$0xff]  }
 0x8b8   : > { %v2975_v38 = vadd.f32 %v2970_v37, %v8868_v43  ;;  %v7692_v37 = vld [vmem:[%s8425_s3 + $0x24] ss:$8 sps:$4 sm:$0xff]   ;;  %v7695_v14 = vld [vmem:[%s8425_s3 + $0x14] ss:$8 sps:$4 sm:$0xff]  }
 0x8b9   : > { %v2957_v17 = vpop.f32.mrf.mxu1 }
 0x8ba   : > { %v2971_v39 = vmul.f32 0.088388346, %v2957_v17  ;;  %v2984_v5 = vsel %vm2774_vm8, %v2975_v38, -inf  ;;  %v7698_v17 = vld [vmem:[%s8425_s3 + $0x4] ss:$8 sps:$4 sm:$0xff]  }
 0x8bb   : > { %2985 = vmax.xlane.f32.xlu0 %v2984_v5  ;;  %v7271_v40 = vpop.f32.mrf.mxu1  ;;  %v7701_v5 = vld [vmem:[%s8425_s3 + $0xf4] ss:$8 sps:$4 sm:$0xff]  }
 0x8bc   : > { %v2976_v47 = vadd.f32 %v2971_v39, %v8873_v32  ;;  %v7696_v39 = vld [vmem:[%s8425_s3] ss:$8 sps:$4 sm:$0xff]   ;;  %v7699_v40 = vld [vmem:[%s8425_s3 + $0xf0] ss:$8 sps:$4 sm:$0xff]  }
 0x8bd   : > { %v2962_v48 = vpop.f32.mrf.mxu1 }
 0x8be   : > { %v2972_v33 = vmul.f32 0.088388346, %v2962_v48  ;;  %v2987_v12 = vsel %vm2774_vm8, %v2976_v47, -inf  ;;  %v7702_v48 = vld [vmem:[%s8425_s3 + $0xe0] ss:$8 sps:$4 sm:$0xff]  }
 0x8bf   : > { %2988 = vmax.xlane.f32.xlu1 %v2987_v12  ;;  %v7274_v49 = vpop.f32.mrf.mxu1  ;;  %v7705_v12 = vld [vmem:[%s8425_s3 + $0xd0] ss:$8 sps:$4 sm:$0xff]  }
 0x8c0   : > { %v2977_v30 = vadd.f32 %v2972_v33, %v8878_v31  ;;  %v7707_v33 = vld [vmem:[%s8425_s3 + $0xd4] ss:$8 sps:$4 sm:$0xff]   ;;  %v7710_v49 = vld [vmem:[%s8425_s3 + $0xc4] ss:$8 sps:$4 sm:$0xff]  }
 0x8c1   : > { %v2965_v34 = vpop.f32.mrf.mxu1 }
 0x8c2   : > { %v2990_v50 = vsel %vm2787_vm12, %v2977_v30, -inf  ;;  %v7713_v34 = vld [vmem:[%s8425_s3 + $0xb4] ss:$8 sps:$4 sm:$0xff]  }
 0x8c3   : > { %2991 = vmax.xlane.f32.xlu0 %v2990_v50  ;;  %v7275_v43 = vpop.f32.mrf.mxu1  ;;  %v7711_v50 = vld [vmem:[%s8425_s3 + $0xb0] ss:$8 sps:$4 sm:$0xff]  }
 0x8c4   : > { %v7716_v43 = vld [vmem:[%s8425_s3 + $0xa4] ss:$8 sps:$4 sm:$0xff]  }
 0x93c   : > { %v2980_v29 = vpop.xlane.xlu0 %2979 }
 0x93d   : > { %v2993_v15 = vsub.f32 %v2973_v6, %v2980_v29  ;;  %v7678_v6 = vld [vmem:[%s8425_s3 + $0x60] ss:$8 sps:$4 sm:$0xff]  }
 0x93e   : > { %3305 = vmatpush1.bf16.msra.mxu1 %v7678_v6  ;;  %v7714_v29 = vld [vmem:[%s8425_s3 + $0xa0] ss:$8 sps:$4 sm:$0xff]  }
 0x93f   : > { %v2998_v23 = vmul.f32 1.442695, %v2993_v15  ;;  %3306 = vmatprep.subr.bf16.mxu1 %v7683_v21 }
 0x940   : > { %v2983_v55 = vpop.xlane.xlu1 %2982 }
 0x941   : > { %7849 = vpow2.f32 %v2998_v23  ;;  %v2994_v57 = vsub.f32 %v2974_v9, %v2983_v55  ;;  %v7689_v9 = vld [vmem:[%s8425_s3 + $0x34] ss:$8 sps:$4 sm:$0xff]  }
 0x942   : > { %3307 = vmatpush1.bf16.msra.mxu1 %v7681_v24 }
 0x943   : > { %v3000_v32 = vmul.f32 1.442695, %v2994_v57  ;;  %3308 = vmatprep.subr.bf16.mxu1 %v7686_v25 }
 0x944   : > { %v2986_v51 = vpop.xlane.xlu0 %2985 }
 0x945   : > { %7851 = vpow2.f32 %v3000_v32  ;;  %v2995_v58 = vsub.f32 %v2975_v38, %v2986_v51  ;;  %v7693_v38 = vld [vmem:[%s8425_s3 + $0x10] ss:$8 sps:$4 sm:$0xff]  }
 0x946   : > { %3309 = vmatpush1.bf16.msra.mxu1 %v7684_v26 }
 0x947   : > { %v3002_v19 = vmul.f32 1.442695, %v2995_v58  ;;  %3310 = vmatprep.subr.bf16.mxu1 %v7689_v9 }
 0x948   : > { %v2989_v0 = vpop.xlane.xlu1 %2988 }
 0x949   : > { %7853 = vpow2.f32 %v3002_v19  ;;  %v2996_v59 = vsub.f32 %v2976_v47, %v2989_v0  ;;  %v7704_v47 = vld [vmem:[%s8425_s3 + $0xe4] ss:$8 sps:$4 sm:$0xff]  }
 0x94a   : > { %3311 = vmatpush1.bf16.msra.mxu1 %v7687_v35 }
 0x94b   : > { %v3004_v31 = vmul.f32 1.442695, %v2996_v59  ;;  %3312 = vmatprep.subr.bf16.mxu1 %v7692_v37 }
 0x94c   : > { %v2992_v60 = vpop.xlane.xlu0 %2991 }
 0x94d   : > { %7855 = vpow2.f32 %v3004_v31  ;;  %v2997_v63 = vsub.f32 %v2977_v30, %v2992_v60  ;;  %v7708_v30 = vld [vmem:[%s8425_s3 + $0xc0] ss:$8 sps:$4 sm:$0xff]  }
 0x94e   : > { %v8943_v44 = vpop.eup %7849  ;;  %3313 = vmatpush1.bf16.msra.mxu1 %v7690_v10 }
 0x94f   : > { %v3006_v62 = vmul.f32 1.442695, %v2997_v63  ;;  %v3008_v1 = vsel %vm2774_vm8, %v8943_v44, 0.0  ;;  %3314 = vmatprep.subr.bf16.mxu1 %v7695_v14  ;;  %v7899_v14 = vld [vmem:[#allocation2] sm:$0xff] }
 0x950   : > { %3009 = vadd.xlane.f32.xlu1 %v3008_v1 }
 0x951   : > { %7857 = vpow2.f32 %v3006_v62 }
 0x952   : > { %v8947_v46 = vpop.eup %7851  ;;  %3315 = vmatpush1.bf16.msra.mxu1 %v7693_v38 }
 0x953   : > { %v3011_v42 = vsel %vm2774_vm8, %v8947_v46, 0.0  ;;  %3316 = vmatprep.subr.bf16.mxu1 %v7698_v17 }
 0x954   : > { %3012 = vadd.xlane.f32.xlu0 %v3011_v42 }
 0x956   : > { %v8951_v56 = vpop.eup %7853  ;;  %3317 = vmatpush1.bf16.msra.mxu1 %v7696_v39 }
 0x957   : > { %v3014_v52 = vsel %vm2774_vm8, %v8951_v56, 0.0  ;;  %3318 = vmatprep.subr.bf16.mxu1 %v7701_v5 }
 0x958   : > { %3015 = vadd.xlane.f32.xlu1 %v3014_v52  ;;  %v7719_v52 = vld [vmem:[%s8425_s3 + $0x94] ss:$8 sps:$4 sm:$0xff]  }
 0x95a   : > { %v8955_v54 = vpop.eup %7855  ;;  %3319 = vmatpush2.bf16.msra.mxu1 %v7699_v40 }
 0x95b   : > { %v3017_v61 = vsel %vm2774_vm8, %v8955_v54, 0.0  ;;  %3320 = vmatprep.subr.bf16.mxu1 %v7704_v47 }
 0x95c   : > { %3018 = vadd.xlane.f32.xlu0 %v3017_v61  ;;  %v7717_v61 = vld [vmem:[%s8425_s3 + $0x90] ss:$8 sps:$4 sm:$0xff]  }
 0x95e   : > { %v8959_v2 = vpop.eup %7857  ;;  %3321 = vmatpush2.bf16.msra.mxu1 %v7702_v48 }
 0x95f   : > { %v3020_v3 = vsel %vm2787_vm12, %v8959_v2, 0.0  ;;  %3322 = vmatprep.subr.bf16.mxu1 %v7707_v33 }
 0x960   : > { %3021 = vadd.xlane.f32.xlu1 %v3020_v3  ;;  %v7722_v3 = vld [vmem:[%s8425_s3 + $0x84] ss:$8 sps:$4 sm:$0xff]  }
 0x962   : > { %3323 = vmatpush2.bf16.msra.mxu1 %v7705_v12  ;;  %v7902_v12 = vld [vmem:[#allocation2 + $0x18] sm:$0xff] }
 0x963   : > { %3324 = vmatprep.subr.bf16.mxu1 %v7710_v49 }
 0x966   : > { %3325 = vmatpush2.bf16.msra.mxu1 %v7708_v30 }
 0x967   : > { %3326 = vmatprep.subr.bf16.mxu1 %v7713_v34 }
 0x96a   : > { %3327 = vmatpush2.bf16.msra.mxu1 %v7711_v50 }
 0x96b   : > { %3328 = vmatprep.subr.bf16.mxu1 %v7716_v43 }
 0x96e   : > { %3329 = vmatpush2.bf16.msra.mxu1 %v7714_v29  ;;  %v7903_v29 = vld [vmem:[#allocation2 + $0x20] sm:$0xff] }
 0x96f   : > { %3330 = vmatprep.subr.bf16.mxu1 %v7719_v52 }
 0x972   : > { %3331 = vmatpush2.bf16.msra.mxu1 %v7717_v61 }
 0x973   : > { %3332 = vmatprep.subr.bf16.mxu1 %v7722_v3 }
 0x9d9   : > { %v3010_v15 = vpop.xlane.xlu1 %3009 }
 0x9da   : > { %7859 = vrcp.f32 %v3010_v15 }
 0x9dd   : > { %v3013_v23 = vpop.xlane.xlu0 %3012 }
 0x9de   : > { %7861 = vrcp.f32 %v3013_v23 }
 0x9e1   : > { %v3016_v55 = vpop.xlane.xlu1 %3015 }
 0x9e2   : > { %7863 = vrcp.f32 %v3016_v55  ;;  %v7904_v55 = vld [vmem:[#allocation2 + $0x28] sm:$0xff] }
 0x9e5   : > { %v3019_v57 = vpop.xlane.xlu0 %3018 }
 0x9e6   : > { %7865 = vrcp.f32 %v3019_v57 }
 0x9e7   : > { %v7860_v32 = vpop.eup %7859 }
 0x9e8   : > { %v3028_v19 = vmul.f32 %v7860_v32, %v8943_v44 }
 0x9e9   : > { %v3022_v51 = vpop.xlane.xlu1 %3021 }
 0x9ea   : > { %7867 = vrcp.f32 %v3022_v51 }
 0x9eb   : > { %v7862_v58 = vpop.eup %7861 }
 0x9ec   : > { %v3029_v0 = vmul.f32 %v7862_v58, %v8947_v46 }
 0x9ee   : > { %v3033_v59 = vpack.c.bf16 %v3029_v0, %v3028_v19  ;;  %v7905_v0 = vld [vmem:[#allocation2 + $0x30] sm:$0xff] }
 0x9ef   : > { %v7864_v31 = vpop.eup %7863 }
 0x9f0   : > { %7283 = vmatmul.mubr.msk.bf16.vlgmr.msra.gmra.mxu0 %vm2774_vm8, %v3033_v59  ;;  %v3030_v63 = vmul.f32 %v7864_v31, %v8951_v56  ;;  %v7720_v56 = vld [vmem:[%s8425_s3 + $0x80] ss:$8 sps:$4 sm:$0xff]  }
 0x9f1   : > { %7286 = vmatprep.mubr.msk.bf16.mxu0 %vm8204_vm4, %v8203_v45  ;;  %3333 = vmatpush2.bf16.msra.mxu1 %v7720_v56  ;;  %v7908_v56 = vld [vmem:[#allocation2 + $0x48] sm:$0xf] }
 0x9f3   : > { %v7866_v60 = vpop.eup %7865 }
 0x9f4   : > { %v3031_v62 = vmul.f32 %v7866_v60, %v8955_v54  ;;  %v7906_v60 = vld [vmem:[#allocation2 + $0x38] sm:$0xff] }
 0x9f6   : > { %v3034_v1 = vpack.c.bf16 %v3031_v62, %v3030_v63 }
 0x9f7   : > { %v7868_v44 = vpop.eup %7867 }
 0x9f8   : > { %7287 = vmatmul.mubr.msk.bf16.gmra.mxu0 %vm2774_vm8, %v3034_v1  ;;  %v3032_v46 = vmul.f32 %v7868_v44, %v8959_v2 }
 0x9f9   : > { %7290 = vmatprep.mubr.msk.bf16.mxu0 %vm8204_vm4, %v8203_v45 }
 0x9fa   : > { %v3035_v42 = vpack.c.bf16 %v3032_v46, %v3032_v46 }
 0xa00   : > { %7291 = vmatmul.mubr.msk.bf16.gmra.mxu0 %vm2774_vm8, %v3035_v42  ;;  %v7907_v42 = vld [vmem:[#allocation2 + $0x40] sm:$0xf] }
 0xab0   : > { %v3082_v54 = vpop.f32.mrf.mxu0 }
 0xab2   : > { %v7284_v7 = vpop.f32.mrf.mxu0 }
 0xab4   : > { %v3085_v4 = vpop.f32.mrf.mxu0 }
 0xab5   : > { %v3105_v13 = vpack.c.bf16 %v3085_v4, %v3082_v54 }
 0xab6   : > { %v7285_v6 = vpop.f32.mrf.mxu0 }
 0xab7   : > { %3334 = vmatprep.mubr.bf16.mxu1 %v3105_v13 }
 0xab8   : > { %v3090_v45 = vpop.f32.mrf.mxu0  ;;  %3335 = vmatmul.mubr.bf16.vlgmr.msra.gmra.mxu1 %v3104_v20  ;;  %v3373_v20 = vld [vmem:[%s1169_s1] sm:$0x3] }
 0xab9   : > { %v3378_v17 = vrot.slane %v3373_v20, %v8727_v36  ;;  %v3382_v39 = vrot.slane %v3373_v20, %v8721_v28  ;;  %v7737_v20 = vld [vmem:[%s8432_s29 + $0x34] ss:$8 sps:$4 sm:$0xff]  }
 0xaba   : > { %v7288_v2 = vpop.f32.mrf.mxu0 }
 0xabc   : > { %v3093_v21 = vpop.f32.mrf.mxu0 }
 0xabd   : > { %v3107_v24 = vpack.c.bf16 %v3093_v21, %v3090_v45 }
 0xabe   : > { %v7289_v25 = vpop.f32.mrf.mxu0 }
 0xabf   : > { %3344 = vmatprep.mubr.bf16.mxu1 %v3107_v24  ;;  %v7723_v24 = vld [vmem:[%s8432_s29 + $0x70] ss:$8 sps:$4 sm:$0xff]   ;;  %v7725_v25 = vld [vmem:[%s8432_s29 + $0x74] ss:$8 sps:$4 sm:$0xff]  }
 0xac0   : > { %v3098_v26 = vpop.f32.mrf.mxu0  ;;  %3345 = vmatmul.mubr.bf16.gmra.mxu1 %v3106_v18  ;;  %3733 = vmatprep.subr.bf16.mxu0 %v7725_v25 }
 0xac1   : > { %v3109_v9 = vpack.c.bf16 %v3098_v26, %v3098_v26  ;;  %v7728_v26 = vld [vmem:[%s8432_s29 + $0x64] ss:$8 sps:$4 sm:$0xff]   ;;  %3734 = vmatpush1.bf16.msra.mxu0 %v7723_v24 }
 0xac2   : > { %v7292_v35 = vpop.f32.mrf.mxu0  ;;  %3735 = vmatprep.subr.bf16.mxu0 %v7728_v26  ;;  %v7752_v24 = vld [vmem:[%s8432_s29 + $0xe4] ss:$8 sps:$4 sm:$0xff]  }
 0xac3   : > { %3354 = vmatprep.mubr.bf16.mxu1 %v3109_v9  ;;  %v7726_v9 = vld [vmem:[%s8432_s29 + $0x60] ss:$8 sps:$4 sm:$0xff]   ;;  %v7731_v35 = vld [vmem:[%s8432_s29 + $0x54] ss:$8 sps:$4 sm:$0xff]  }
 0xac4   : > { %v3101_v37 = vpop.f32.mrf.mxu0 }
 0xac5   : > { %3736 = vmatpush1.bf16.msra.mxu0 %v7726_v9  ;;  %v7729_v37 = vld [vmem:[%s8432_s29 + $0x50] ss:$8 sps:$4 sm:$0xff]   ;;  %v7750_v9 = vld [vmem:[%s8432_s29 + $0xe0] ss:$8 sps:$4 sm:$0xff]  }
 0xac6   : > { %v7293_v41 = vpop.f32.mrf.mxu0  ;;  %3737 = vmatprep.subr.bf16.mxu0 %v7731_v35 }
 0xac7   : > { %v7732_v41 = vld [vmem:[%s8432_s29 + $0x40] ss:$8 sps:$4 sm:$0xff]  }
 0xac8   : > { %3355 = vmatmul.mubr.bf16.gmra.mxu1 %v3108_v8  ;;  %v7734_v8 = vld [vmem:[%s8432_s29 + $0x44] ss:$8 sps:$4 sm:$0xff]  }
 0xac9   : > { %3738 = vmatpush1.bf16.msra.mxu0 %v7729_v37 }
 0xaca   : > { %3739 = vmatprep.subr.bf16.mxu0 %v7734_v8 }
 0xacd   : > { %3740 = vmatpush1.bf16.msra.mxu0 %v7732_v41  ;;  %v7755_v41 = vld [vmem:[%s8432_s29 + $0xd4] ss:$8 sps:$4 sm:$0xff]  }
 0xace   : > { %3741 = vmatprep.subr.bf16.mxu0 %v7737_v20  ;;  %v7753_v20 = vld [vmem:[%s8432_s29 + $0xd0] ss:$8 sps:$4 sm:$0xff]  }
 0xb78   : > { %v3336_v10 = vpop.f32.mrf.mxu1 }
 0xb79   : > { %v3363_v38 = vadd.f32 %v7899_v14, %v3336_v10  ;;  %v7735_v10 = vld [vmem:[%s8432_s29 + $0x30] ss:$8 sps:$4 sm:$0xff]   ;;  %v7740_v14 = vld [vmem:[%s8432_s29 + $0x24] ss:$8 sps:$4 sm:$0xff]  }
 0xb7a   : > { %v3338_v11 = vpop.f32.mrf.mxu1  ;;  %3742 = vmatpush1.bf16.msra.mxu0 %v7735_v10  ;;  %v7758_v10 = vld [vmem:[%s8432_s29 + $0xc4] ss:$8 sps:$4 sm:$0xff]  }
 0xb7b   : > { %v3364_v18 = vadd.f32 %v7900_v53, %v3338_v11  ;;  %v9020_v40 = vadd.f32 %v3378_v17, %v3363_v38  ;;  %v7738_v38 = vld [vmem:[%s8432_s29 + $0x20] ss:$8 sps:$4 sm:$0xff]   ;;  %3743 = vmatprep.subr.bf16.mxu0 %v7740_v14  ;;  %v7746_v11 = vld [vmem:[%s8432_s29 + $0x4] ss:$8 sps:$4 sm:$0xff]  }
 0xb7c   : > { %v3340_v5 = vpop.f32.mrf.mxu1  ;;  %v7744_v53 = vld [vmem:[%s8432_s29] ss:$8 sps:$4 sm:$0xff]  }
 0xb7d   : > { %v9022_v47 = vadd.f32 %v3382_v39, %v3364_v18  ;;  %v3365_v48 = vadd.f32 %v7901_v27, %v3340_v5  ;;  %v7749_v18 = vld [vmem:[%s8432_s29 + $0xf4] ss:$8 sps:$4 sm:$0xff]   ;;  %v7747_v5 = vld [vmem:[%s8432_s29 + $0xf0] ss:$8 sps:$4 sm:$0xff]   ;;  %v7756_v14 = vld [vmem:[%s8432_s29 + $0xc0] ss:$8 sps:$4 sm:$0xff]  }
 0xb7e   : > { %v3342_v33 = vpop.f32.mrf.mxu1  ;;  %3744 = vmatpush1.bf16.msra.mxu0 %v7738_v38  ;;  %v7761_v38 = vld [vmem:[%s8432_s29 + $0xb4] ss:$8 sps:$4 sm:$0xff]  }
 0xb7f   : > { %v3366_v49 = vadd.f32 %v7902_v12, %v3342_v33  ;;  %v3397_v30 = vadd.f32 %v9022_v47, %v9020_v40  ;;  %v9026_v50 = vadd.f32 %v3378_v17, %v3365_v48 }
 0xb80   : > { %v3346_v34 = vpop.f32.mrf.mxu1 }
 0xb81   : > { %v9028_v43 = vadd.f32 %v3382_v39, %v3366_v49  ;;  %v3367_v15 = vadd.f32 %v7903_v29, %v3346_v34  ;;  %3398 = vadd.xlane.f32.xlu0 %v3397_v30 }
 0xb82   : > { %v3348_v23 = vpop.f32.mrf.mxu1 }
 0xb83   : > { %v3368_v57 = vadd.f32 %v7904_v55, %v3348_v23  ;;  %v3400_v32 = vadd.f32 %v9028_v43, %v9026_v50  ;;  %v9032_v58 = vadd.f32 %v3378_v17, %v3367_v15 }
 0xb84   : > { %v3350_v51 = vpop.f32.mrf.mxu1 }
 0xb85   : > { %v9034_v19 = vadd.f32 %v3382_v39, %v3368_v57  ;;  %v3369_v59 = vadd.f32 %v7905_v0, %v3350_v51  ;;  %3401 = vadd.xlane.f32.xlu1 %v3400_v32 }
 0xb86   : > { %v3352_v31 = vpop.f32.mrf.mxu1 }
 0xb87   : > { %v3370_v63 = vadd.f32 %v7906_v60, %v3352_v31  ;;  %v3403_v62 = vadd.f32 %v9034_v19, %v9032_v58  ;;  %v9038_v44 = vadd.f32 %v3378_v17, %v3369_v59 }
 0xb88   : > { %v3356_v1 = vpop.f32.mrf.mxu1 }
 0xb89   : > { %v9040_v46 = vadd.f32 %v3382_v39, %v3370_v63  ;;  %v3371_v52 = vadd.f32 %v7907_v42, %v3356_v1  ;;  %3404 = vadd.xlane.f32.xlu0 %v3403_v62 }
 0xb8a   : > { %v3358_v61 = vpop.f32.mrf.mxu1 }
 0xb8b   : > { %v9042_v3 = vadd.f32 %v3378_v17, %v3371_v52  ;;  %v3372_v54 = vadd.f32 %v7908_v56, %v3358_v61  ;;  %v3406_v7 = vadd.f32 %v9040_v46, %v9038_v44  ;;  %v7743_v17 = vld [vmem:[%s8432_s29 + $0x14] ss:$8 sps:$4 sm:$0xff]  }
 0xb8c   : > { %v3360_v4 = vpop.f32.mrf.mxu1  ;;  %3745 = vmatprep.subr.bf16.mxu0 %v7743_v17  ;;  %v7759_v17 = vld [vmem:[%s8432_s29 + $0xb0] ss:$8 sps:$4 sm:$0xff]  }
 0xb8d   : > { %v9046_v13 = vadd.f32 %v3382_v39, %v3372_v54  ;;  %3407 = vadd.xlane.f32.xlu1 %v3406_v7  ;;  %v3409_v45 = vsel %vm1818_vm3, %v9042_v3, 0.0  ;;  %v7741_v39 = vld [vmem:[%s8432_s29 + $0x10] ss:$8 sps:$4 sm:$0xff]  }
 0xb8e   : > { %v3361_v6 = vpop.f32.mrf.mxu1  ;;  %3746 = vmatpush1.bf16.msra.mxu0 %v7741_v39  ;;  %v7764_v39 = vld [vmem:[%s8432_s29 + $0xa4] ss:$8 sps:$4 sm:$0xff]  }
 0xb8f   : > { %v3410_v2 = vsel %vm1818_vm3, %v9046_v13, 0.0  ;;  %3747 = vmatprep.subr.bf16.mxu0 %v7746_v11  ;;  %v7762_v11 = vld [vmem:[%s8432_s29 + $0xa0] ss:$8 sps:$4 sm:$0xff]  }
 0xb90   : > { %v3411_v21 = vadd.f32 %v3410_v2, %v3409_v45 }
 0xb92   : > { %3412 = vadd.xlane.f32.xlu0 %v3411_v21  ;;  %3748 = vmatpush1.bf16.msra.mxu0 %v7744_v53  ;;  %v7765_v53 = vld [vmem:[%s8432_s29 + $0x90] ss:$8 sps:$4 sm:$0xff]  }
 0xb93   : > { %3749 = vmatprep.subr.bf16.mxu0 %v7749_v18  ;;  %v7767_v18 = vld [vmem:[%s8432_s29 + $0x94] ss:$8 sps:$4 sm:$0xff]  }
 0xb96   : > { %3750 = vmatpush2.bf16.msra.mxu0 %v7747_v5  ;;  %v7770_v5 = vld [vmem:[%s8432_s29 + $0x84] ss:$8 sps:$4 sm:$0xff]  }
 0xb97   : > { %3751 = vmatprep.subr.bf16.mxu0 %v7752_v24 }
 0xb9a   : > { %3752 = vmatpush2.bf16.msra.mxu0 %v7750_v9  ;;  %v3395_v9 = vld [vmem:[%s1173_s17] sm:$0x3]  ;;  %s9728_s17 = sld [smem:[#allocation24_spill]] }
 0xb9b   : > { %3753 = vmatprep.subr.bf16.mxu0 %v7755_v41  ;;  %v3489_v41 = vrot.slane %v3395_v9, %v8721_v28 }
 0xb9e   : > { %3754 = vmatpush2.bf16.msra.mxu0 %v7753_v20 }
 0xb9f   : > { %3755 = vmatprep.subr.bf16.mxu0 %v7758_v10 }
 0xba0   : > { %p6835_p8 = scmp.ne.s32.totalorder %s9728_s17, 1 }
 0xba1   : > { %s9731_s3 = sld [smem:[#allocation14_spill]] (!%p6835_p8) }
 0xba2   : > { %3756 = vmatpush2.bf16.msra.mxu0 %v7756_v14  ;;  %v3396_v14 = vld [vmem:[%s1177_s21] sm:$0x3]  ;;  %s9729_s21 = sld [smem:[#allocation16_spill]] (!%p6835_p8) }
 0xba3   : > { %3757 = vmatprep.subr.bf16.mxu0 %v7761_v38  ;;  %s9733_s28 = sld [smem:[#allocation21_spill]] (!%p6835_p8) }
 0xba4   : > { %s9735_s1 = sld [smem:[#allocation18_spill]] (!%p6835_p8) }
 0xba5   : > { %s9739_s5 = sld [smem:[#allocation22_spill]] (!%p6835_p8) }
 0xba6   : > { %3758 = vmatpush2.bf16.msra.mxu0 %v7759_v17  ;;  %s9740_s26 = sld [smem:[#allocation23_spill]] (!%p6835_p8) }
 0xba7   : > { %3759 = vmatprep.subr.bf16.mxu0 %v7764_v39 }
 0xba9   : > { %s9734_s0 = smov (!%p6835_p8), %s9733_s28 }
 0xbaa   : > { %3760 = vmatpush2.bf16.msra.mxu0 %v7762_v11  ;;  %s9736_s11 = smov (!%p6835_p8), %s9735_s1 }
 0xbab   : > { %3761 = vmatprep.subr.bf16.mxu0 %v7767_v18  ;;  %v3510_v18 = vrot.slane %v3396_v14, %v8721_v28 }
 0xbac   : > { %s9741_s15 = smov (!%p6835_p8), %s9740_s26 }
 0xbae   : > { %3762 = vmatpush2.bf16.msra.mxu0 %v7765_v53  ;;  %v3506_v53 = vrot.slane %v3396_v14, %v8727_v36  ;;  %v7798_v14 = vld [vmem:[%s8437_s7 + $0xe0] ss:$8 sps:$4 sm:$0xff]  }
 0xbaf   : > { %3763 = vmatprep.subr.bf16.mxu0 %v7770_v5 }
 0xc0a   : > { %v3399_v27 = vpop.xlane.xlu0 %3398 }
 0xc0b   : > { %v3414_v48 = vmul.f32 0.00390625, %v3399_v27  ;;  %v7768_v27 = vld [vmem:[%s8432_s29 + $0x80] ss:$8 sps:$4 sm:$0xff]   ;;  %s9730_s29 = sld [smem:[#allocation20_spill]] (!%p6835_p8) }
 0xc0c   : > { %3764 = vmatpush2.bf16.msra.mxu0 %v7768_v27 }
 0xc0d   : > { %v9071_v33 = vsub.f32 %v9020_v40, %v3414_v48  ;;  %v9074_v12 = vsub.f32 %v9022_v47, %v3414_v48  ;;  %v7771_v48 = vld [vmem:[%s8437_s7 + $0x70] ss:$8 sps:$4 sm:$0xff]  }
 0xc0e   : > { %v3402_v49 = vpop.xlane.xlu1 %3401 }
 0xc0f   : > { %v3415_v30 = vmul.f32 0.00390625, %v3402_v49  ;;  %v3429_v34 = vmul.f32 %v9071_v33, %v9071_v33  ;;  %v3430_v29 = vmul.f32 %v9074_v12, %v9074_v12  ;;  %v7773_v49 = vld [vmem:[%s8437_s7 + $0x74] ss:$8 sps:$4 sm:$0xff]  }
 0xc10   : > { %4082 = vmatprep.subr.bf16.mxu1 %v7773_v49 }
 0xc11   : > { %v9081_v15 = vsub.f32 %v9026_v50, %v3415_v30  ;;  %v9084_v23 = vsub.f32 %v9028_v43, %v3415_v30  ;;  %v3439_v55 = vadd.f32 %v3430_v29, %v3429_v34  ;;  %v7776_v30 = vld [vmem:[%s8437_s7 + $0x64] ss:$8 sps:$4 sm:$0xff]   ;;  %4083 = vmatpush1.bf16.msra.mxu1 %v7771_v48  ;;  %v7774_v34 = vld [vmem:[%s8437_s7 + $0x60] ss:$8 sps:$4 sm:$0xff]   ;;  %v7779_v29 = vld [vmem:[%s8437_s7 + $0x54] ss:$8 sps:$4 sm:$0xff]  }
 0xc12   : > { %v3405_v57 = vpop.xlane.xlu0 %3404  ;;  %4084 = vmatprep.subr.bf16.mxu1 %v7776_v30 }
 0xc13   : > { %v3416_v32 = vmul.f32 0.00390625, %v3405_v57  ;;  %3440 = vadd.xlane.f32.xlu1 %v3439_v55  ;;  %v3431_v51 = vmul.f32 %v9081_v15, %v9081_v15  ;;  %v3432_v0 = vmul.f32 %v9084_v23, %v9084_v23  ;;  %v7777_v55 = vld [vmem:[%s8437_s7 + $0x50] ss:$8 sps:$4 sm:$0xff]   ;;  %v7782_v57 = vld [vmem:[%s8437_s7 + $0x44] ss:$8 sps:$4 sm:$0xff]  }
 0xc15   : > { %v9091_v59 = vsub.f32 %v9032_v58, %v3416_v32  ;;  %v9094_v31 = vsub.f32 %v9034_v19, %v3416_v32  ;;  %v3442_v60 = vadd.f32 %v3432_v0, %v3431_v51  ;;  %4085 = vmatpush1.bf16.msra.mxu1 %v7774_v34  ;;  %v7780_v32 = vld [vmem:[%s8437_s7 + $0x40] ss:$8 sps:$4 sm:$0xff]   ;;  %v7785_v51 = vld [vmem:[%s8437_s7 + $0x34] ss:$8 sps:$4 sm:$0xff]   ;;  %v7783_v0 = vld [vmem:[%s8437_s7 + $0x30] ss:$8 sps:$4 sm:$0xff]  }
 0xc16   : > { %v3408_v63 = vpop.xlane.xlu1 %3407  ;;  %4086 = vmatprep.subr.bf16.mxu1 %v7779_v29 }
 0xc17   : > { %v3417_v62 = vmul.f32 0.00390625, %v3408_v63  ;;  %3443 = vadd.xlane.f32.xlu0 %v3442_v60  ;;  %v3433_v1 = vmul.f32 %v9091_v59, %v9091_v59  ;;  %v3434_v42 = vmul.f32 %v9094_v31, %v9094_v31  ;;  %v7788_v60 = vld [vmem:[%s8437_s7 + $0x24] ss:$8 sps:$4 sm:$0xff]   ;;  %v7786_v63 = vld [vmem:[%s8437_s7 + $0x20] ss:$8 sps:$4 sm:$0xff]  }
 0xc19   : > { %v9101_v52 = vsub.f32 %v9038_v44, %v3417_v62  ;;  %v9104_v61 = vsub.f32 %v9040_v46, %v3417_v62  ;;  %v3445_v56 = vadd.f32 %v3434_v42, %v3433_v1  ;;  %4087 = vmatpush1.bf16.msra.mxu1 %v7777_v55 }
 0xc1a   : > { %4088 = vmatprep.subr.bf16.mxu1 %v7782_v57 }
 0xc1b   : > { %3446 = vadd.xlane.f32.xlu1 %v3445_v56  ;;  %v3413_v54 = vpop.xlane.xlu0 %3412  ;;  %v3435_v7 = vmul.f32 %v9101_v52, %v9101_v52  ;;  %v3436_v4 = vmul.f32 %v9104_v61, %v9104_v61 }
 0xc1c   : > { %v3418_v6 = vmul.f32 0.00390625, %v3413_v54 }
 0xc1d   : > { %v3448_v45 = vadd.f32 %v3436_v4, %v3435_v7  ;;  %4089 = vmatpush1.bf16.msra.mxu1 %v7780_v32 }
 0xc1e   : > { %v9111_v2 = vsub.f32 %v9042_v3, %v3418_v6  ;;  %v9114_v21 = vsub.f32 %v9046_v13, %v3418_v6  ;;  %4090 = vmatprep.subr.bf16.mxu1 %v7785_v51 }
 0xc1f   : > { %3449 = vadd.xlane.f32.xlu0 %v3448_v45 }
 0xc20   : > { %v3437_v25 = vmul.f32 %v9111_v2, %v9111_v2  ;;  %v3438_v26 = vmul.f32 %v9114_v21, %v9114_v21 }
 0xc21   : > { %4091 = vmatpush1.bf16.msra.mxu1 %v7783_v0 }
 0xc22   : > { %v3451_v35 = vsel %vm1818_vm3, %v3437_v25, 0.0  ;;  %v3452_v37 = vsel %vm1818_vm3, %v3438_v26, 0.0  ;;  %4092 = vmatprep.subr.bf16.mxu1 %v7788_v60 }
 0xc23   : > { %v3453_v8 = vadd.f32 %v3452_v37, %v3451_v35 }
 0xc25   : > { %3454 = vadd.xlane.f32.xlu1 %v3453_v8  ;;  %4093 = vmatpush1.bf16.msra.mxu1 %v7786_v63  ;;  %v3485_v8 = vrot.slane %v3395_v9, %v8727_v36 }
 0xc9c   : > { %v3441_v62 = vpop.xlane.xlu1 %3440 }
 0xc9d   : > { %v3456_v1 = vmul.f32 0.00390625, %v3441_v62 }
 0xc9f   : > { %v3461_v42 = vadd.f32 1e-05, %v3456_v1 }
 0xca0   : > { %v3444_v56 = vpop.xlane.xlu0 %3443 }
 0xca1   : > { %7869 = vrsqrt.f32 %v3461_v42  ;;  %v3457_v54 = vmul.f32 0.00390625, %v3444_v56 }
 0xca3   : > { %v3462_v7 = vadd.f32 1e-05, %v3457_v54 }
 0xca4   : > { %v3447_v4 = vpop.xlane.xlu1 %3446 }
 0xca5   : > { %7871 = vrsqrt.f32 %v3462_v7  ;;  %v3458_v6 = vmul.f32 0.00390625, %v3447_v4 }
 0xca7   : > { %v3463_v45 = vadd.f32 1e-05, %v3458_v6 }
 0xca8   : > { %v3450_v24 = vpop.xlane.xlu0 %3449 }
 0xca9   : > { %7873 = vrsqrt.f32 %v3463_v45  ;;  %v3459_v25 = vmul.f32 0.00390625, %v3450_v24 }
 0xcab   : > { %v3464_v26 = vadd.f32 1e-05, %v3459_v25 }
 0xcad   : > { %7875 = vrsqrt.f32 %v3464_v26 }
 0xcae   : > { %v7870_v35 = vpop.eup %7869  ;;  %v3455_v37 = vpop.xlane.xlu1 %3454 }
 0xcaf   : > { %v3471_v20 = vmul.f32 %v7870_v35, %v9071_v33  ;;  %v3460_v10 = vmul.f32 0.00390625, %v3455_v37  ;;  %v3472_v38 = vmul.f32 %v7870_v35, %v9074_v12  ;;  %v7791_v37 = vld [vmem:[%s8437_s7 + $0x14] ss:$8 sps:$4 sm:$0xff]  }
 0xcb0   : > { %4094 = vmatprep.subr.bf16.mxu1 %v7791_v37 }
 0xcb1   : > { %v3465_v17 = vadd.f32 1e-05, %v3460_v10  ;;  %v3493_v11 = vmul.f32 %v3489_v41, %v3472_v38  ;;  %v3492_v5 = vmul.f32 %v3485_v8, %v3471_v20  ;;  %v7795_v20 = vld [vmem:[%s8437_s7 + $0xf0] ss:$8 sps:$4 sm:$0xff]   ;;  %v7800_v10 = vld [vmem:[%s8437_s7 + $0xe4] ss:$8 sps:$4 sm:$0xff]  }
 0xcb2   : > { %v7872_v39 = vpop.eup %7871  ;;  %v7803_v38 = vld [vmem:[%s8437_s7 + $0xd4] ss:$8 sps:$4 sm:$0xff]  }
 0xcb3   : > { %v3473_v27 = vmul.f32 %v7872_v39, %v9081_v15  ;;  %7877 = vrsqrt.f32 %v3465_v17  ;;  %v3474_v48 = vmul.f32 %v7872_v39, %v9084_v23  ;;  %v3514_v34 = vadd.f32 %v3510_v18, %v3493_v11  ;;  %v7801_v17 = vld [vmem:[%s8437_s7 + $0xd0] ss:$8 sps:$4 sm:$0xff]   ;;  %v7806_v39 = vld [vmem:[%s8437_s7 + $0xc4] ss:$8 sps:$4 sm:$0xff]   ;;  %v7804_v11 = vld [vmem:[%s8437_s7 + $0xc0] ss:$8 sps:$4 sm:$0xff]  }
 0xcb4   : > { %v3513_v29 = vadd.f32 %v3506_v53, %v3492_v5  ;;  %v7812_v5 = vld [vmem:[%s8437_s7 + $0xa4] ss:$8 sps:$4 sm:$0xff]  }
 0xcb5   : > { %v3495_v49 = vmul.f32 %v3489_v41, %v3474_v48  ;;  %v3494_v33 = vmul.f32 %v3485_v8, %v3473_v27  ;;  %v7810_v27 = vld [vmem:[%s8437_s7 + $0xa0] ss:$8 sps:$4 sm:$0xff]   ;;  %v7815_v48 = vld [vmem:[%s8437_s7 + $0x94] ss:$8 sps:$4 sm:$0xff]  }
 0xcb6   : > { %v7874_v30 = vpop.eup %7873 }
 0xcb7   : > { %v3516_v55 = vadd.f32 %v3510_v18, %v3495_v49  ;;  %v3515_v12 = vadd.f32 %v3506_v53, %v3494_v33  ;;  %v3476_v57 = vmul.f32 %v7874_v30, %v9094_v31  ;;  %v3475_v32 = vmul.f32 %v7874_v30, %v9091_v59  ;;  %v7813_v49 = vld [vmem:[%s8437_s7 + $0x90] ss:$8 sps:$4 sm:$0xff]   ;;  %v7818_v33 = vld [vmem:[%s8437_s7 + $0x84] ss:$8 sps:$4 sm:$0xff]   ;;  %v7816_v30 = vld [vmem:[%s8437_s7 + $0x80] ss:$8 sps:$4 sm:$0xff]  }
 0xcb9   : > { %v3524_v51 = vpack.c.bf16 %v3516_v55, %v3514_v34  ;;  %v3523_v0 = vpack.c.bf16 %v3515_v12, %v3513_v29  ;;  %v3497_v63 = vmul.f32 %v3489_v41, %v3476_v57  ;;  %v3496_v62 = vmul.f32 %v3485_v8, %v3475_v32  ;;  %v3561_v34 = vld [vmem:[%s1186_s22] sm:$0x3]  ;;  %s9732_s22 = sld [smem:[#allocation15_spill]] (!%p6835_p8) }
 0xcba   : > { %v7876_v60 = vpop.eup %7875  ;;  %v3566_v29 = vrot.slane %v3561_v34, %v8727_v36  ;;  %v3570_v55 = vrot.slane %v3561_v34, %v8721_v28 }
 0xcbb   : > { %3765 = vmatprep.mubr.bf16.mxu0 %v3524_v51  ;;  %v3478_v15 = vmul.f32 %v7876_v60, %v9104_v61  ;;  %v3477_v23 = vmul.f32 %v7876_v60, %v9101_v52  ;;  %v3518_v56 = vadd.f32 %v3510_v18, %v3497_v63  ;;  %v3517_v7 = vadd.f32 %v3506_v53, %v3496_v62 }
 0xcbc   : > { %3766 = vmatmul.mubr.bf16.vlgmr.msra.gmra.mxu0 %v3523_v0 }
 0xcbd   : > { %v3499_v1 = vmul.f32 %v3489_v41, %v3478_v15  ;;  %v3498_v42 = vmul.f32 %v3485_v8, %v3477_v23 }
 0xcbf   : > { %v3520_v54 = vadd.f32 %v3510_v18, %v3499_v1  ;;  %v3519_v4 = vadd.f32 %v3506_v53, %v3498_v42 }
 0xcc0   : > { %v7878_v31 = vpop.eup %7877 }
 0xcc1   : > { %v3526_v59 = vpack.c.bf16 %v3520_v54, %v3518_v56  ;;  %v3525_v6 = vpack.c.bf16 %v3519_v4, %v3517_v7  ;;  %v3480_v45 = vmul.f32 %v7878_v31, %v9114_v21  ;;  %v3479_v61 = vmul.f32 %v7878_v31, %v9111_v2  ;;  %v7789_v21 = vld [vmem:[%s8437_s7 + $0x10] ss:$8 sps:$4 sm:$0xff]   ;;  %v7794_v2 = vld [vmem:[%s8437_s7 + $0x4] ss:$8 sps:$4 sm:$0xff]  }
 0xcc2   : > { %4095 = vmatpush1.bf16.msra.mxu1 %v7789_v21 }
 0xcc3   : > { %3775 = vmatprep.mubr.bf16.mxu0 %v3526_v59  ;;  %v3501_v52 = vmul.f32 %v3489_v41, %v3480_v45  ;;  %v3500_v24 = vmul.f32 %v3485_v8, %v3479_v61  ;;  %v7792_v8 = vld [vmem:[%s8437_s7] ss:$8 sps:$4 sm:$0xff]   ;;  %4096 = vmatprep.subr.bf16.mxu1 %v7794_v2  ;;  %v7797_v41 = vld [vmem:[%s8437_s7 + $0xf4] ss:$8 sps:$4 sm:$0xff]  }
 0xcc4   : > { %3776 = vmatmul.mubr.bf16.gmra.mxu0 %v3525_v6 }
 0xcc5   : > { %v3522_v25 = vadd.f32 %v3510_v18, %v3501_v52  ;;  %v3521_v26 = vadd.f32 %v3506_v53, %v3500_v24  ;;  %v7807_v53 = vld [vmem:[%s8437_s7 + $0xb0] ss:$8 sps:$4 sm:$0xff]   ;;  %v7809_v18 = vld [vmem:[%s8437_s7 + $0xb4] ss:$8 sps:$4 sm:$0xff]   ;;  %s9738_s7 = sld [smem:[#allocation17_spill]] (!%p6835_p8) }
 0xcc6   : > { %4097 = vmatpush1.bf16.msra.mxu1 %v7792_v8 }
 0xcc7   : > { %v3528_v9 = vpack.c.bf16 %v3522_v25, %v3522_v25  ;;  %v3527_v35 = vpack.c.bf16 %v3521_v26, %v3521_v26  ;;  %4098 = vmatprep.subr.bf16.mxu1 %v7797_v41 }
 0xcc9   : > { %3785 = vmatprep.mubr.bf16.mxu0 %v3528_v9 }
 0xcca   : > { %4099 = vmatpush2.bf16.msra.mxu1 %v7795_v20 }
 0xccb   : > { %4100 = vmatprep.subr.bf16.mxu1 %v7800_v10 }
 0xccc   : > { %3786 = vmatmul.mubr.bf16.gmra.mxu0 %v3527_v35 }
 0xcce   : > { %4101 = vmatpush2.bf16.msra.mxu1 %v7798_v14 }
 0xccf   : > { %4102 = vmatprep.subr.bf16.mxu1 %v7803_v38 }
 0xcd2   : > { %4103 = vmatpush2.bf16.msra.mxu1 %v7801_v17 }
 0xcd3   : > { %4104 = vmatprep.subr.bf16.mxu1 %v7806_v39 }
 0xcd6   : > { %4105 = vmatpush2.bf16.msra.mxu1 %v7804_v11 }
 0xcd7   : > { %4106 = vmatprep.subr.bf16.mxu1 %v7809_v18 }
 0xcda   : > { %4107 = vmatpush2.bf16.msra.mxu1 %v7807_v53 }
 0xcdb   : > { %4108 = vmatprep.subr.bf16.mxu1 %v7812_v5 }
 0xcde   : > { %4109 = vmatpush2.bf16.msra.mxu1 %v7810_v27 }
 0xcdf   : > { %4110 = vmatprep.subr.bf16.mxu1 %v7815_v48 }
 0xce2   : > { %4111 = vmatpush2.bf16.msra.mxu1 %v7813_v49 }
 0xce3   : > { %4112 = vmatprep.subr.bf16.mxu1 %v7818_v33 }
 0xce6   : > { %4113 = vmatpush2.bf16.msra.mxu1 %v7816_v30 }
 0xd7c   : > { %v3767_v12 = vpop.f32.mrf.mxu0 }
 0xd7d   : > { %v9193_v57 = vadd.f32 %v3767_v12, %v3566_v29 }
 0xd7e   : > { %v3769_v32 = vpop.f32.mrf.mxu0 }
 0xd7f   : > { %v3804_v51 = vmul.f32 0.044715, %v9193_v57  ;;  %v9196_v0 = vadd.f32 %v3769_v32, %v3570_v55 }
 0xd80   : > { %v3771_v60 = vpop.f32.mrf.mxu0 }
 0xd81   : > { %v3814_v15 = vmul.f32 %v3804_v51, %v9193_v57  ;;  %v3805_v63 = vmul.f32 0.044715, %v9196_v0  ;;  %v9200_v23 = vadd.f32 %v3771_v60, %v3566_v29 }
 0xd82   : > { %v3773_v62 = vpop.f32.mrf.mxu0 }
 0xd83   : > { %v3824_v1 = vmul.f32 %v3814_v15, %v9193_v57  ;;  %v3815_v42 = vmul.f32 %v3805_v63, %v9196_v0  ;;  %v3806_v56 = vmul.f32 0.044715, %v9200_v23  ;;  %v9205_v54 = vadd.f32 %v3773_v62, %v3570_v55 }
 0xd84   : > { %v3777_v7 = vpop.f32.mrf.mxu0 }
 0xd85   : > { %v3834_v4 = vadd.f32 %v3824_v1, %v9193_v57  ;;  %v3825_v31 = vmul.f32 %v3815_v42, %v9196_v0  ;;  %v3816_v59 = vmul.f32 %v3806_v56, %v9200_v23  ;;  %v9210_v6 = vadd.f32 %v3777_v7, %v3566_v29 }
 0xd86   : > { %v3807_v45 = vmul.f32 0.044715, %v9205_v54  ;;  %v3779_v61 = vpop.f32.mrf.mxu0 }
 0xd87   : > { %v3844_v52 = vmul.f32 0.7978846, %v3834_v4  ;;  %v3826_v24 = vmul.f32 %v3816_v59, %v9200_v23  ;;  %v3808_v25 = vmul.f32 0.044715, %v9210_v6  ;;  %v9215_v26 = vadd.f32 %v3779_v61, %v3570_v55 }
 0xd88   : > { %v3817_v9 = vmul.f32 %v3807_v45, %v9205_v54  ;;  %v3781_v35 = vpop.f32.mrf.mxu0  ;;  %v3835_v37 = vadd.f32 %v3825_v31, %v9196_v0 }
 0xd89   : > { %v3836_v21 = vadd.f32 %v3826_v24, %v9200_v23  ;;  %v3818_v2 = vmul.f32 %v3808_v25, %v9210_v6  ;;  %v3809_v8 = vmul.f32 0.044715, %v9215_v26  ;;  %7879 = vtanh.f32 %v3844_v52 }
 0xd8a   : > { %v3827_v41 = vmul.f32 %v3817_v9, %v9205_v54  ;;  %v9223_v20 = vadd.f32 %v3781_v35, %v3566_v29  ;;  %v3783_v10 = vpop.f32.mrf.mxu0  ;;  %v3845_v14 = vmul.f32 0.7978846, %v3835_v37 }
 0xd8b   : > { %v3846_v38 = vmul.f32 0.7978846, %v3836_v21  ;;  %v3828_v17 = vmul.f32 %v3818_v2, %v9210_v6  ;;  %v3819_v39 = vmul.f32 %v3809_v8, %v9215_v26  ;;  %v9227_v11 = vadd.f32 %v3783_v10, %v3570_v55 }
 0xd8c   : > { %v3810_v53 = vmul.f32 0.044715, %v9223_v20  ;;  %v3787_v18 = vpop.f32.mrf.mxu0  ;;  %v3837_v5 = vadd.f32 %v3827_v41, %v9205_v54  ;;  %7881 = vtanh.f32 %v3845_v14 }
 0xd8d   : > { %7883 = vtanh.f32 %v3846_v38  ;;  %v3829_v27 = vmul.f32 %v3819_v39, %v9215_v26  ;;  %v3811_v48 = vmul.f32 0.044715, %v9227_v11  ;;  %v9233_v49 = vadd.f32 %v3787_v18, %v3566_v29 }
 0xd8e   : > { %v3820_v33 = vmul.f32 %v3810_v53, %v9223_v20  ;;  %v3789_v30 = vpop.f32.mrf.mxu0  ;;  %v3847_v34 = vmul.f32 0.7978846, %v3837_v5  ;;  %v3838_v12 = vadd.f32 %v3828_v17, %v9210_v6  ;;  %v3796_v38 = vmul.f32 0.5, %v9200_v23 }
 0xd8f   : > { %v3821_v32 = vmul.f32 %v3811_v48, %v9227_v11  ;;  %v3812_v51 = vmul.f32 0.044715, %v9233_v49  ;;  %v9239_v60 = vadd.f32 %v3789_v30, %v3570_v55  ;;  %v3839_v15 = vadd.f32 %v3829_v27, %v9215_v26 }
 0xd90   : > { %v3830_v63 = vmul.f32 %v3820_v33, %v9223_v20  ;;  %v3791_v62 = vpop.f32.mrf.mxu0  ;;  %7885 = vtanh.f32 %v3847_v34  ;;  %v3848_v29 = vmul.f32 0.7978846, %v3838_v12  ;;  %v3795_v39 = vmul.f32 0.5, %v9196_v0 }
 0xd91   : > { %v3831_v1 = vmul.f32 %v3821_v32, %v9227_v11  ;;  %v3822_v42 = vmul.f32 %v3812_v51, %v9233_v49  ;;  %v3813_v56 = vmul.f32 0.044715, %v9239_v60  ;;  %v3849_v7 = vmul.f32 0.7978846, %v3839_v15 }
 0xd92   : > { %v3792_v4 = vpop.f32.mrf.mxu0  ;;  %v3840_v31 = vadd.f32 %v3830_v63, %v9223_v20  ;;  %v3797_v53 = vmul.f32 0.5, %v9205_v54  ;;  %v3794_v5 = vmul.f32 0.5, %v9193_v57  ;;  %v3799_v23 = vmul.f32 0.5, %v9215_v26 }
 0xd93   : > { %v3823_v55 = vmul.f32 %v3813_v56, %v9239_v60  ;;  %v3841_v59 = vadd.f32 %v3831_v1, %v9227_v11  ;;  %7887 = vtanh.f32 %v3849_v7  ;;  %v3832_v45 = vmul.f32 %v3822_v42, %v9233_v49 }
 0xd94   : > { %v3850_v61 = vmul.f32 0.7978846, %v3840_v31  ;;  %7889 = vtanh.f32 %v3848_v29  ;;  %v3801_v54 = vmul.f32 0.5, %v9227_v11  ;;  %v3800_v57 = vmul.f32 0.5, %v9223_v20 }
 0xd95   : > { %v3851_v52 = vmul.f32 0.7978846, %v3841_v59  ;;  %v3833_v24 = vmul.f32 %v3823_v55, %v9239_v60  ;;  %v3842_v25 = vadd.f32 %v3832_v45, %v9233_v49  ;;  %v3798_v4 = vmul.f32 0.5, %v9210_v6 }
 0xd96   : > { %7891 = vtanh.f32 %v3850_v61  ;;  %v7880_v9 = vpop.eup %7879  ;;  %v3803_v26 = vmul.f32 0.5, %v9239_v60 }
 0xd97   : > { %7893 = vtanh.f32 %v3851_v52  ;;  %v3843_v35 = vadd.f32 %v3833_v24, %v9239_v60  ;;  %v3852_v37 = vmul.f32 0.7978846, %v3842_v25  ;;  %v3864_v17 = vadd.f32 1.0, %v7880_v9 }
 0xd98   : > { %v3802_v25 = vmul.f32 0.5, %v9233_v49 }
 0xd99   : > { %v7882_v21 = vpop.eup %7881  ;;  %v3853_v2 = vmul.f32 0.7978846, %v3843_v35  ;;  %7895 = vtanh.f32 %v3852_v37  ;;  %v3874_v34 = vmul.f32 %v3864_v17, %v3794_v5  ;;  %v4153_v35 = vld [vmem:[%s1195_s18] sm:$0x3]  ;;  %s9737_s18 = sld [smem:[#allocation19_spill]] (!%p6835_p8) }
 0xd9a   : > { %v7884_v8 = vpop.eup %7883  ;;  %v3865_v10 = vadd.f32 1.0, %v7882_v21  ;;  %v4158_v37 = vrot.slane %v4153_v35, %v8727_v36 }
 0xd9b   : > { %v3866_v41 = vadd.f32 1.0, %v7884_v8  ;;  %7897 = vtanh.f32 %v3853_v2  ;;  %v4162_v2 = vrot.slane %v4153_v35, %v8721_v28 }
 0xd9c   : > { %v3875_v33 = vmul.f32 %v3865_v10, %v3795_v39 }
 0xd9d   : > { %v7886_v14 = vpop.eup %7885  ;;  %v3876_v27 = vmul.f32 %v3866_v41, %v3796_v38 }
 0xd9e   : > { %v3867_v18 = vadd.f32 1.0, %v7886_v14 }
 0xd9f   : > { %v3884_v15 = vpack.c.bf16 %v3876_v27, %v3874_v34 }
 0xda0   : > { %v7888_v48 = vpop.eup %7887  ;;  %v3877_v30 = vmul.f32 %v3867_v18, %v3797_v53 }
 0xda1   : > { %v7890_v12 = vpop.eup %7889  ;;  %v3869_v63 = vadd.f32 1.0, %v7888_v48 }
 0xda2   : > { %v3885_v32 = vpack.c.bf16 %v3877_v30, %v3875_v33  ;;  %v3868_v1 = vadd.f32 1.0, %v7890_v12 }
 0xda3   : > { %v7892_v51 = vpop.eup %7891  ;;  %v3879_v56 = vmul.f32 %v3869_v63, %v3799_v23 }
 0xda4   : > { %v7894_v62 = vpop.eup %7893  ;;  %4114 = vmatprep.mubr.bf16.mxu1 %v3885_v32  ;;  %v3870_v0 = vadd.f32 1.0, %v7892_v51  ;;  %v3878_v45 = vmul.f32 %v3868_v1, %v3798_v4 }
 0xda5   : > { %4115 = vmatmul.mubr.bf16.vlgmr.msra.gmra.mxu1 %v3884_v15  ;;  %v3871_v29 = vadd.f32 1.0, %v7894_v62 }
 0xda6   : > { %v7896_v42 = vpop.eup %7895  ;;  %v3880_v31 = vmul.f32 %v3870_v0, %v3800_v57 }
 0xda7   : > { %v3881_v7 = vmul.f32 %v3871_v29, %v3801_v54  ;;  %v3872_v24 = vadd.f32 1.0, %v7896_v42 }
 0xda8   : > { %v7898_v55 = vpop.eup %7897  ;;  %v3886_v11 = vpack.c.bf16 %v3880_v31, %v3878_v45 }
 0xda9   : > { %v3887_v59 = vpack.c.bf16 %v3881_v7, %v3879_v56  ;;  %v3873_v61 = vadd.f32 1.0, %v7898_v55  ;;  %v3882_v9 = vmul.f32 %v3872_v24, %v3802_v25 }
 0xdab   : > { %4124 = vmatprep.mubr.bf16.mxu1 %v3887_v59  ;;  %v3883_v52 = vmul.f32 %v3873_v61, %v3803_v26  ;;  %v3888_v6 = vpack.c.bf16 %v3882_v9, %v3882_v9 }
 0xdad   : > { %4125 = vmatmul.mubr.bf16.gmra.mxu1 %v3886_v11  ;;  %v3889_v20 = vpack.c.bf16 %v3883_v52, %v3883_v52 }
 0xdaf   : > { %4134 = vmatprep.mubr.bf16.mxu1 %v3889_v20 }
 0xdb5   : > { %4135 = vmatmul.mubr.bf16.gmra.mxu1 %v3888_v6 }
 0xe65   : > { %v4116_v21 = vpop.f32.mrf.mxu1 }
 0xe66   : > { %v4143_v60 = vadd.f32 %v4116_v21, %v9020_v40 }
 0xe67   : > { %v4118_v8 = vpop.f32.mrf.mxu1 }
 0xe68   : > { %v4165_v41 = vadd.f32 %v4158_v37, %v4143_v60  ;;  %v4144_v10 = vadd.f32 %v4118_v8, %v9022_v47 }
 0xe69   : > { %v4120_v14 = vpop.f32.mrf.mxu1 }
 0xe6a   : > { %4175 = vst [vmem:[#allocation2] sm:$0xff] %v4165_v41  ;;  %v4166_v49 = vadd.f32 %v4162_v2, %v4144_v10  ;;  %v4145_v38 = vadd.f32 %v4120_v14, %v9026_v50 }
 0xe6b   : > { %v4122_v17 = vpop.f32.mrf.mxu1 }
 0xe6c   : > { %4176 = vst [vmem:[#allocation2 + $0x8] sm:$0xff] %v4166_v49  ;;  %v9271_v39 = vadd.f32 %v4158_v37, %v4145_v38  ;;  %v4146_v53 = vadd.f32 %v4122_v17, %v9028_v43 }
 0xe6d   : > { %v4126_v18 = vpop.f32.mrf.mxu1 }
 0xe6e   : > { %4177 = vst [vmem:[#allocation2 + $0x10] sm:$0xff] %v9271_v39  ;;  %v9275_v40 = vadd.f32 %v4162_v2, %v4146_v53  ;;  %v4147_v5 = vadd.f32 %v4126_v18, %v9032_v58 }
 0xe6f   : > { %v4128_v27 = vpop.f32.mrf.mxu1 }
 0xe70   : > { %4178 = vst [vmem:[#allocation2 + $0x18] sm:$0xff] %v9275_v40  ;;  %v4169_v47 = vadd.f32 %v4158_v37, %v4147_v5  ;;  %v4148_v48 = vadd.f32 %v4128_v27, %v9034_v19 }
 0xe71   : > { %v4130_v50 = vpop.f32.mrf.mxu1 }
 0xe72   : > { %4179 = vst [vmem:[#allocation2 + $0x20] sm:$0xff] %v4169_v47  ;;  %v4170_v33 = vadd.f32 %v4162_v2, %v4148_v48  ;;  %v4149_v30 = vadd.f32 %v4130_v50, %v9038_v44 }
 0xe73   : > { %v4132_v34 = vpop.f32.mrf.mxu1 }
 0xe74   : > { %4180 = vst [vmem:[#allocation2 + $0x28] sm:$0xff] %v4170_v33  ;;  %v4171_v43 = vadd.f32 %v4158_v37, %v4149_v30  ;;  %v4150_v12 = vadd.f32 %v4132_v34, %v9040_v46 }
 0xe75   : > { %v4136_v32 = vpop.f32.mrf.mxu1 }
 0xe76   : > { %4181 = vst [vmem:[#allocation2 + $0x30] sm:$0xff] %v4171_v43  ;;  %v4172_v51 = vadd.f32 %v4162_v2, %v4150_v12  ;;  %v4151_v58 = vadd.f32 %v4136_v32, %v9042_v3 }
 0xe77   : > { %v4138_v15 = vpop.f32.mrf.mxu1 }
 0xe78   : > { %4182 = vst [vmem:[#allocation2 + $0x38] sm:$0xff] %v4172_v51  ;;  %v4173_v63 = vadd.f32 %v4158_v37, %v4151_v58  ;;  %v4152_v19 = vadd.f32 %v4138_v15, %v9046_v13  ;;  %4188 = sbr.rel (%p6835_p8) target bundleno = 6880 (0x1ae0), region = 152 }
 0xe79   : > { %v4140_v62 = vpop.f32.mrf.mxu1 }
 0xe7a   : > { %4183 = vst [vmem:[#allocation2 + $0x40] sm:$0xf] %v4173_v63  ;;  %v4174_v23 = vadd.f32 %v4162_v2, %v4152_v19 }
 0xe7b   : > { %v4141_v0 = vpop.f32.mrf.mxu1 }
 0xe7c   : > { %4184 = vst [vmem:[#allocation2 + $0x48] sm:$0xf] %v4174_v23 }
 0xe7d   : > { %v4191_v44 = vadd.f32 %v4166_v49, %v4165_v41  ;;  %v4197_v46 = vadd.f32 %v4170_v33, %v4169_v47  ;;  %v4203_v54 = vsel %vm1818_vm3, %v4173_v63, 0.0  ;;  %v4204_v3 = vsel %vm1818_vm3, %v4174_v23, 0.0  ;;  %v7909_v1 = vld [vmem:[%s9729_s21 + $0x78] sm:$0xff]   ;;  %v6853_v31 = vld [vmem:[%s8415_s2 + $0x10] sm:$0x1]  ;;  %v7913_v0 = vld [vmem:[%s9729_s21 + $0x68] sm:$0xff]  }
 0xe7e   : > { %v4194_v13 = vadd.f32 %v9275_v40, %v9271_v39  ;;  %v4200_v29 = vadd.f32 %v4172_v51, %v4171_v43  ;;  %v4205_v57 = vadd.f32 %v4204_v3, %v4203_v54  ;;  %7112 = vmatprep.subr.bf16.mxu0 %v7909_v1  ;;  %v4527_v52 = vrot.slane %v6853_v31, 7  ;;  %v4519_v6 = vld [vmem:[%s8415_s2] sm:$0x1]  ;;  %v7910_v19 = vld [vmem:[%s9729_s21 + $0x38] sm:$0xff]   ;;  %v7911_v62 = vld [vmem:[%s9729_s21 + $0x70] sm:$0xff]  }
 0xe7f   : > { %4192 = vadd.xlane.f32.xlu0 %v4191_v44  ;;  %4198 = vadd.xlane.f32.xlu1 %v4197_v46  ;;  %vm4535_vm13 = vcmask 1040384   ;;  %v6854_v35 = vld [vmem:[%s8415_s2 + $0x20] sm:$0x1]  ;;  %vm4538_vm14 = vcmask 1042432   ;;  %v7914_v44 = vld [vmem:[%s9729_s21 + $0x28] sm:$0xff]   ;;  %v7917_v3 = vld [vmem:[%s9729_s21 + $0x58] sm:$0xff]  }
 0xe80   : > { %v4530_v38 = vrot.slane %v6854_v35, 6  ;;  %v4536_v17 = vsel %vm4535_vm13, %v4519_v6, %v4527_v52  ;;  %7113 = vmatpush3.bf16.msra.mxu0 %v7910_v19  ;;  %v7915_v46 = vld [vmem:[%s9729_s21 + $0x60] sm:$0xff]   ;;  %v7921_v1 = vld [vmem:[%s9729_s21 + $0x48] sm:$0xff]   ;;  %v7927_v31 = vld [vmem:[%s9730_s29 + $0x70] ss:$8 sps:$4 sm:$0xff]   ;;  %vm8208_vm15 = vmmov 0  }
 0xe81   : > { %7114 = vmatprep.subr.bf16.mxu0 %v7911_v62  ;;  %v7916_v54 = vld [vmem:[%s9729_s21 + $0x20] sm:$0xff]  }
 0xe82   : > { %v4537_v30 = vsel %vm2843_vm5, %v4536_v17, %v4530_v38 }
 0xe83   : > { %4195 = vadd.xlane.f32.xlu0 %v4194_v13  ;;  %4201 = vadd.xlane.f32.xlu1 %v4200_v29  ;;  %v7918_v13 = vld [vmem:[%s9729_s21 + $0x18] sm:$0xff]   ;;  %v7919_v29 = vld [vmem:[%s9729_s21 + $0x50] sm:$0xff]  }
 0xe87   : > { %4206 = vadd.xlane.f32.xlu0 %v4205_v57  ;;  %v7920_v57 = vld [vmem:[%s9729_s21 + $0x10] sm:$0xff]  }
 0xf08   : > { %v4193_v42 = vpop.xlane.xlu0 %4192  ;;  %v4199_v56 = vpop.xlane.xlu1 %4198 }
 0xf09   : > { %v4208_v7 = vmul.f32 0.00390625, %v4193_v42  ;;  %v4210_v4 = vmul.f32 0.00390625, %v4199_v56  ;;  %v7922_v42 = vld [vmem:[%s9729_s21 + $0x8] sm:$0xff]   ;;  %v7923_v56 = vld [vmem:[%s9729_s21 + $0x40] sm:$0xff]  }
 0xf0b   : > { %v9291_v55 = vsub.f32 %v4165_v41, %v4208_v7  ;;  %v9293_v59 = vsub.f32 %v4166_v49, %v4208_v7  ;;  %v9295_v45 = vsub.f32 %v4169_v47, %v4210_v4  ;;  %v9297_v26 = vsub.f32 %v4170_v33, %v4210_v4  ;;  %v6855_v49 = vld [vmem:[%s8415_s2 + $0x30] sm:$0x1]  ;;  %v7924_v7 = vld [vmem:[%s9729_s21] sm:$0xff]   ;;  %v7925_v4 = vld [vmem:[%s9730_s29 + $0x74] ss:$8 sps:$4 sm:$0xff]  }
 0xf0c   : > { %v4196_v61 = vpop.xlane.xlu0 %4195  ;;  %v4202_v11 = vpop.xlane.xlu1 %4201  ;;  %v4533_v33 = vrot.slane %v6855_v49, 5  ;;  %4674 = vmatprep.subr.bf16.mxu1 %v7925_v4 }
 0xf0d   : > { %v4209_v24 = vmul.f32 0.00390625, %v4196_v61  ;;  %v4211_v20 = vmul.f32 0.00390625, %v4202_v11  ;;  %v4223_v25 = vmul.f32 %v9291_v55, %v9291_v55  ;;  %v4224_v9 = vmul.f32 %v9293_v59, %v9293_v59  ;;  %v7928_v61 = vld [vmem:[%s9730_s29 + $0x64] ss:$8 sps:$4 sm:$0xff]   ;;  %4675 = vmatpush1.bf16.msra.mxu1 %v7927_v31  ;;  %v7930_v11 = vld [vmem:[%s9730_s29 + $0x60] ss:$8 sps:$4 sm:$0xff]  }
 0xf0e   : > { %v4227_v37 = vmul.f32 %v9295_v45, %v9295_v45  ;;  %v4228_v21 = vmul.f32 %v9297_v26, %v9297_v26  ;;  %v9340_v58 = vsel %vm4538_vm14, %v4537_v30, %v4533_v33  ;;  %4676 = vmatprep.subr.bf16.mxu1 %v7928_v61 }
 0xf0f   : > { %v9310_v60 = vsub.f32 %v9271_v39, %v4209_v24  ;;  %v9313_v2 = vsub.f32 %v9275_v40, %v4209_v24  ;;  %v9315_v8 = vsub.f32 %v4171_v43, %v4211_v20  ;;  %v9317_v41 = vsub.f32 %v4172_v51, %v4211_v20 }
 0xf10   : > { %v4207_v10 = vpop.xlane.xlu0 %4206  ;;  %v4233_v14 = vadd.f32 %v4224_v9, %v4223_v25  ;;  %v4239_v5 = vadd.f32 %v4228_v21, %v4227_v37 }
 0xf11   : > { %v4212_v53 = vmul.f32 0.00390625, %v4207_v10  ;;  %v4225_v18 = vmul.f32 %v9310_v60, %v9310_v60  ;;  %v4226_v39 = vmul.f32 %v9313_v2, %v9313_v2  ;;  %v4229_v40 = vmul.f32 %v9315_v8, %v9315_v8  ;;  %4677 = vmatpush1.bf16.msra.mxu1 %v7930_v11 }
 0xf12   : > { %4234 = vadd.xlane.f32.xlu1 %v4233_v14  ;;  %v4230_v27 = vmul.f32 %v9317_v41, %v9317_v41 }
 0xf13   : > { %v9329_v47 = vsub.f32 %v4173_v63, %v4212_v53  ;;  %v9331_v48 = vsub.f32 %v4174_v23, %v4212_v53  ;;  %v4236_v50 = vadd.f32 %v4226_v39, %v4225_v18  ;;  %v4545_v63 = vsel %vm1818_vm3, %v9340_v58, 0.0  ;;  %v7912_v23 = vld [vmem:[%s9729_s21 + $0x30] sm:$0xff]  }
 0xf14   : > { %v4242_v34 = vadd.f32 %v4230_v27, %v4229_v40  ;;  %7115 = vmatpush3.bf16.msra.mxu0 %v7912_v23 }
 0xf15   : > { %4237 = vadd.xlane.f32.xlu0 %v4236_v50  ;;  %v4231_v43 = vmul.f32 %v9329_v47, %v9329_v47  ;;  %v4232_v12 = vmul.f32 %v9331_v48, %v9331_v48  ;;  %7116 = vmatprep.subr.bf16.mxu0 %v7913_v0 }
 0xf16   : > { %4240 = vadd.xlane.f32.xlu1 %v4239_v5  ;;  %v4189_v5 = vld [vmem:[%s9731_s3] sm:$0x3] }
 0xf17   : > { %v4245_v32 = vsel %vm1818_vm3, %v4231_v43, 0.0  ;;  %v4246_v51 = vsel %vm1818_vm3, %v4232_v12, 0.0  ;;  %v4279_v50 = vrot.slane %v4189_v5, %v8727_v36  ;;  %v4283_v33 = vrot.slane %v4189_v5, %v8721_v28  ;;  %v4190_v43 = vld [vmem:[%s9732_s22] sm:$0x3] }
 0xf18   : > { %v4247_v15 = vadd.f32 %v4246_v51, %v4245_v32  ;;  %7117 = vmatpush3.bf16.msra.mxu0 %v7914_v44  ;;  %v4304_v19 = vrot.slane %v4190_v43, %v8721_v28  ;;  %v7948_v5 = vld [vmem:[%s9730_s29] ss:$8 sps:$4 sm:$0xff]  }
 0xf19   : > { %4243 = vadd.xlane.f32.xlu0 %v4242_v34  ;;  %7118 = vmatprep.subr.bf16.mxu0 %v7915_v46 }
 0xf1a   : > { %4248 = vadd.xlane.f32.xlu1 %v4247_v15 }
 0xf1c   : > { %7119 = vmatpush3.bf16.msra.mxu0 %v7916_v54 }
 0xf1d   : > { %4546 = vadd.xlane.f32.xlu0 %v4545_v63  ;;  %7120 = vmatprep.subr.bf16.mxu0 %v7917_v3  ;;  %v4300_v63 = vrot.slane %v4190_v43, %v8727_v36  ;;  %v7955_v43 = vld [vmem:[%s9734_s0 + $0xc0] ss:$16 sps:$4 sm:$0xff]  }
 0xf20   : > { %7121 = vmatpush3.bf16.msra.mxu0 %v7918_v13 }
 0xf21   : > { %7122 = vmatprep.subr.bf16.mxu0 %v7919_v29 }
 0xf24   : > { %7123 = vmatpush3.bf16.msra.mxu0 %v7920_v57 }
 0xf25   : > { %7124 = vmatprep.subr.bf16.mxu0 %v7921_v1 }
 0xf28   : > { %7125 = vmatpush3.bf16.msra.mxu0 %v7922_v42 }
 0xf29   : > { %7126 = vmatprep.subr.bf16.mxu0 %v7923_v56 }
 0xf2c   : > { %7127 = vmatpush3.bf16.msra.mxu0 %v7924_v7 }
 0xf9b   : > { %v4235_v52 = vpop.xlane.xlu1 %4234 }
 0xf9c   : > { %v4250_v24 = vmul.f32 0.00390625, %v4235_v52  ;;  %v7931_v52 = vld [vmem:[%s9730_s29 + $0x54] ss:$8 sps:$4 sm:$0xff]  }
 0xf9d   : > { %4678 = vmatprep.subr.bf16.mxu1 %v7931_v52  ;;  %v7982_v52 = vld [vmem:[%s9734_s0 + $0x48] ss:$16 sps:$4 sm:$0xff]  }
 0xf9e   : > { %v4255_v20 = vadd.f32 1e-05, %v4250_v24  ;;  %v4238_v25 = vpop.xlane.xlu0 %4237 }
 0xf9f   : > { %v4241_v9 = vpop.xlane.xlu1 %4240  ;;  %v4251_v6 = vmul.f32 0.00390625, %v4238_v25  ;;  %v7934_v25 = vld [vmem:[%s9730_s29 + $0x44] ss:$8 sps:$4 sm:$0xff]  }
 0xfa0   : > { %8101 = vrsqrt.f32 %v4255_v20  ;;  %v4252_v35 = vmul.f32 0.00390625, %v4241_v9 }
 0xfa1   : > { %v4256_v37 = vadd.f32 1e-05, %v4251_v6  ;;  %v7936_v6 = vld [vmem:[%s9730_s29 + $0x40] ss:$8 sps:$4 sm:$0xff]  }
 0xfa2   : > { %v4257_v21 = vadd.f32 1e-05, %v4252_v35  ;;  %v4244_v10 = vpop.xlane.xlu0 %4243 }
 0xfa3   : > { %8103 = vrsqrt.f32 %v4256_v37  ;;  %v4253_v14 = vmul.f32 0.00390625, %v4244_v10  ;;  %v4249_v49 = vpop.xlane.xlu1 %4248  ;;  %v7937_v10 = vld [vmem:[%s9730_s29 + $0x34] ss:$8 sps:$4 sm:$0xff]  }
 0xfa4   : > { %8105 = vrsqrt.f32 %v4257_v21  ;;  %v4254_v38 = vmul.f32 0.00390625, %v4249_v49  ;;  %v7940_v49 = vld [vmem:[%s9730_s29 + $0x24] ss:$8 sps:$4 sm:$0xff]  }
 0xfa5   : > { %v4258_v17 = vadd.f32 1e-05, %v4253_v14  ;;  %v7939_v14 = vld [vmem:[%s9730_s29 + $0x30] ss:$8 sps:$4 sm:$0xff]  }
 0xfa6   : > { %v4259_v53 = vadd.f32 1e-05, %v4254_v38  ;;  %v4547_v18 = vpop.xlane.xlu0 %4546  ;;  %v7942_v38 = vld [vmem:[%s9730_s29 + $0x20] ss:$8 sps:$4 sm:$0xff]  }
 0xfa7   : > { %8107 = vrsqrt.f32 %v4258_v17  ;;  %v4549_v39 = vmul.f32 0.0078125, %v4547_v18  ;;  %v7945_v18 = vld [vmem:[%s9730_s29 + $0x10] ss:$8 sps:$4 sm:$0xff]  }
 0xfa8   : > { %8109 = vrsqrt.f32 %v4259_v53  ;;  %v7943_v53 = vld [vmem:[%s9730_s29 + $0x14] ss:$8 sps:$4 sm:$0xff]  }
 0xfa9   : > { %v9364_v40 = vsub.f32 %v9340_v58, %v4549_v39  ;;  %v7946_v39 = vld [vmem:[%s9730_s29 + $0x4] ss:$8 sps:$4 sm:$0xff]  }
 0xfab   : > { %v4551_v27 = vmul.f32 %v9364_v40, %v9364_v40 }
 0xfad   : > { %v8102_v30 = vpop.eup %8101  ;;  %v4552_v34 = vsel %vm1818_vm3, %v4551_v27, 0.0  ;;  %v8206_v27 = vmov 0  }
 0xfae   : > { %4553 = vadd.xlane.f32.xlu1 %v4552_v34  ;;  %v4266_v12 = vmul.f32 %v8102_v30, %v9293_v59  ;;  %v4265_v32 = vmul.f32 %v8102_v30, %v9291_v55  ;;  %4706 = vmatprep.mubr.bf16.mxu1 %v8206_v27  ;;  %v7954_v30 = vld [vmem:[%s9734_s0 + $0xec] ss:$16 sps:$4 sm:$0xff]   ;;  %v7957_v34 = vld [vmem:[%s9734_s0 + $0xc4] ss:$16 sps:$4 sm:$0xff]  }
 0xfb0   : > { %v8104_v51 = vpop.eup %8103  ;;  %v4287_v15 = vmul.f32 %v4283_v33, %v4266_v12  ;;  %v4286_v62 = vmul.f32 %v4279_v50, %v4265_v32  ;;  %v7963_v12 = vld [vmem:[%s9734_s0 + $0xa4] ss:$16 sps:$4 sm:$0xff]   ;;  %v7961_v32 = vld [vmem:[%s9734_s0 + $0xa0] ss:$16 sps:$4 sm:$0xff]  }
 0xfb1   : > { %v8106_v23 = vpop.eup %8105  ;;  %v4268_v0 = vmul.f32 %v8104_v51, %v9313_v2  ;;  %v4267_v44 = vmul.f32 %v8104_v51, %v9310_v60  ;;  %v7969_v51 = vld [vmem:[%s9734_s0 + $0x84] ss:$16 sps:$4 sm:$0xff]  }
 0xfb2   : > { %v4270_v46 = vmul.f32 %v8106_v23, %v9297_v26  ;;  %v4308_v59 = vadd.f32 %v4304_v19, %v4287_v15  ;;  %v4307_v29 = vadd.f32 %v4300_v63, %v4286_v62  ;;  %v4269_v2 = vmul.f32 %v8106_v23, %v9295_v45  ;;  %v7967_v15 = vld [vmem:[%s9734_s0 + $0x80] ss:$16 sps:$4 sm:$0xff]   ;;  %v7981_v62 = vld [vmem:[%s9734_s0 + $0x44] ss:$16 sps:$4 sm:$0xff]  }
 0xfb3   : > { %v4289_v54 = vmul.f32 %v4283_v33, %v4268_v0  ;;  %v4288_v3 = vmul.f32 %v4279_v50, %v4267_v44  ;;  %v7979_v23 = vld [vmem:[%s9734_s0 + $0x40] ss:$16 sps:$4 sm:$0xff]   ;;  %v7987_v0 = vld [vmem:[%s9734_s0 + $0x24] ss:$16 sps:$4 sm:$0xff]  }
 0xfb4   : > { %v8108_v13 = vpop.eup %8107  ;;  %v4291_v55 = vmul.f32 %v4283_v33, %v4270_v46  ;;  %v4290_v24 = vmul.f32 %v4279_v50, %v4269_v2  ;;  %v7985_v44 = vld [vmem:[%s9734_s0 + $0x20] ss:$16 sps:$4 sm:$0xff]   ;;  %v7993_v46 = vld [vmem:[%s9734_s0 + $0x4] ss:$16 sps:$4 sm:$0xff]  }
 0xfb5   : > { %v8110_v57 = vpop.eup %8109  ;;  %v4310_v1 = vadd.f32 %v4304_v19, %v4289_v54  ;;  %v4309_v36 = vadd.f32 %v4300_v63, %v4288_v3  ;;  %v4272_v28 = vmul.f32 %v8108_v13, %v9317_v41  ;;  %v4271_v42 = vmul.f32 %v8108_v13, %v9315_v8  ;;  %v7933_v41 = vld [vmem:[%s9730_s29 + $0x50] ss:$8 sps:$4 sm:$0xff]  }
 0xfb6   : > { %v4274_v60 = vmul.f32 %v8110_v57, %v9331_v48  ;;  %v4312_v31 = vadd.f32 %v4304_v19, %v4291_v55  ;;  %v4273_v48 = vmul.f32 %v8110_v57, %v9329_v47  ;;  %4679 = vmatpush1.bf16.msra.mxu1 %v7933_v41  ;;  %v4311_v9 = vadd.f32 %v4300_v63, %v4290_v24  ;;  %v7991_v54 = vld [vmem:[%s9734_s0] ss:$16 sps:$4 sm:$0xff]   ;;  %v7990_v24 = vld [vmem:[%s9734_s0 + $0x2c] ss:$16 sps:$4 sm:$0xff]   ;;  %v7988_v41 = vld [vmem:[%s9734_s0 + $0x28] ss:$16 sps:$4 sm:$0xff]  }
 0xfb7   : > { %v4318_v26 = vpack.c.bf16 %v4310_v1, %v4308_v59  ;;  %v4317_v56 = vpack.c.bf16 %v4309_v36, %v4307_v29  ;;  %v4293_v7 = vmul.f32 %v4283_v33, %v4272_v28  ;;  %v4292_v4 = vmul.f32 %v4279_v50, %v4271_v42  ;;  %4680 = vmatprep.subr.bf16.mxu1 %v7934_v25  ;;  %v6856_v55 = vld [vmem:[%s9735_s1] ss:$0 sm:$0xff]  ;;  %v7952_v42 = vld [vmem:[%s9734_s0 + $0xe8] ss:$16 sps:$4 sm:$0xff]  }
 0xfb8   : > { %v4295_v11 = vmul.f32 %v4283_v33, %v4274_v60  ;;  %v4294_v37 = vmul.f32 %v4279_v50, %v4273_v48  ;;  %v7949_v50 = vld [vmem:[%s9733_s28 + $0xe0] ss:$16 sps:$4 sm:$0xff]   ;;  %v7951_v33 = vld [vmem:[%s9734_s0 + $0xe4] ss:$16 sps:$4 sm:$0xff]   ;;  %v7960_v60 = vld [vmem:[%s9734_s0 + $0xcc] ss:$16 sps:$4 sm:$0xff]  }
 0xfb9   : > { %4490 = vmatprep.mubr.bf16.mxu0 %v4318_v26  ;;  %v4314_v61 = vadd.f32 %v4304_v19, %v4293_v7  ;;  %v4313_v45 = vadd.f32 %v4300_v63, %v4292_v4  ;;  %4915 = vmatprep.subr.bf16.mxu0 %v7951_v33  ;;  %v6857_v1 = vld [vmem:[%s9737_s18] ss:$0 sm:$0xff]  ;;  %v7958_v26 = vld [vmem:[%s9734_s0 + $0xc8] ss:$16 sps:$4 sm:$0xff]   ;;  %v7972_v7 = vld [vmem:[%s9734_s0 + $0x8c] ss:$16 sps:$4 sm:$0xff]  }
 0xfba   : > { %4491 = vmatmul.mubr.bf16.vlgmr.msra.gmra.mxu0 %v4317_v56  ;;  %v4316_v20 = vadd.f32 %v4304_v19, %v4295_v11  ;;  %4681 = vmatpush1.bf16.msra.mxu1 %v7936_v6  ;;  %v4315_v47 = vadd.f32 %v4300_v63, %v4294_v37  ;;  %v7975_v63 = vld [vmem:[%s9734_s0 + $0x64] ss:$16 sps:$4 sm:$0xff]   ;;  %v7973_v19 = vld [vmem:[%s9734_s0 + $0x60] ss:$16 sps:$4 sm:$0xff]   ;;  %v7966_v56 = vld [vmem:[%s9734_s0 + $0xac] ss:$16 sps:$4 sm:$0xff]  }
 0xfbb   : > { %v4320_v8 = vpack.c.bf16 %v4314_v61, %v4312_v31  ;;  %v4319_v35 = vpack.c.bf16 %v4313_v45, %v4311_v9  ;;  %4682 = vmatprep.subr.bf16.mxu1 %v7937_v10  ;;  %4916 = vmatpush1.bf16.msra.mxu0 %v7949_v50  ;;  %v7970_v4 = vld [vmem:[%s9734_s0 + $0x88] ss:$16 sps:$4 sm:$0xff]   ;;  %v7978_v31 = vld [vmem:[%s9734_s0 + $0x6c] ss:$16 sps:$4 sm:$0xff]  }
 0xfbc   : > { %v4322_v21 = vpack.c.bf16 %v4316_v20, %v4316_v20  ;;  %v4321_v17 = vpack.c.bf16 %v4315_v47, %v4315_v47  ;;  %4917 = vmatprep.subr.bf16.mxu0 %v7957_v34  ;;  %v7976_v61 = vld [vmem:[%s9734_s0 + $0x68] ss:$16 sps:$4 sm:$0xff]   ;;  %v7984_v11 = vld [vmem:[%s9734_s0 + $0x4c] ss:$16 sps:$4 sm:$0xff]   ;;  %v6836_v20 = vld [vmem:[%s9738_s7] ss:$0 sm:$0xff] }
 0xfbd   : > { %4498 = vmatprep.mubr.bf16.mxu0 %v4320_v8  ;;  %v7996_v8 = vld [vmem:[%s9734_s0 + $0xc] ss:$16 sps:$4 sm:$0xff]   ;;  %v7994_v45 = vld [vmem:[%s9734_s0 + $0x8] ss:$16 sps:$4 sm:$0xff]  }
 0xfbe   : > { %4683 = vmatpush1.bf16.msra.mxu1 %v7939_v14 }
 0xfbf   : > { %4684 = vmatprep.subr.bf16.mxu1 %v7940_v49  ;;  %4918 = vmatpush1.bf16.msra.mxu0 %v7955_v43 }
 0xfc0   : > { %4919 = vmatprep.subr.bf16.mxu0 %v7963_v12 }
 0xfc2   : > { %4499 = vmatmul.mubr.bf16.gmra.mxu0 %v4319_v35  ;;  %4685 = vmatpush1.bf16.msra.mxu1 %v7942_v38 }
 0xfc3   : > { %4506 = vmatprep.mubr.bf16.mxu0 %v4322_v21  ;;  %4686 = vmatprep.subr.bf16.mxu1 %v7943_v53 }
 0xfc4   : > { %4920 = vmatpush1.bf16.msra.mxu0 %v7961_v32 }
 0xfc5   : > { %4921 = vmatprep.subr.bf16.mxu0 %v7969_v51 }
 0xfc6   : > { %4687 = vmatpush1.bf16.msra.mxu1 %v7945_v18 }
 0xfc7   : > { %4688 = vmatprep.subr.bf16.mxu1 %v7946_v39 }
 0xfc8   : > { %4922 = vmatpush1.bf16.msra.mxu0 %v7967_v15 }
 0xfc9   : > { %4923 = vmatprep.subr.bf16.mxu0 %v7975_v63 }
 0xfca   : > { %4507 = vmatmul.mubr.bf16.gmra.mxu0 %v4321_v17  ;;  %4689 = vmatpush1.bf16.msra.mxu1 %v7948_v5 }
 0xfcb   : > { %4947 = vmatprep.mubr.bf16.mxu0 %v8206_v27  ;;  %4976 = vmatprep.subr.bf16.mxu1 %v7954_v30 }
 0xfcc   : > { %4924 = vmatpush1.bf16.msra.mxu0 %v7973_v19 }
 0xfcd   : > { %4925 = vmatprep.subr.bf16.mxu0 %v7981_v62 }
 0xfd0   : > { %4926 = vmatpush1.bf16.msra.mxu0 %v7979_v23 }
 0xfd1   : > { %4927 = vmatprep.subr.bf16.mxu0 %v7987_v0  ;;  %v8207_v0 = vmov 0.0  }
 0xfd4   : > { %4928 = vmatpush1.bf16.msra.mxu0 %v7985_v44 }
 0xfd5   : > { %4929 = vmatprep.subr.bf16.mxu0 %v7993_v46 }
 0xfd8   : > { %4930 = vmatpush1.bf16.msra.mxu0 %v7991_v54 }
 0xfd9   : > { %7314 = vmatprep.subr.bf16.mxu0 %v8207_v0 }
0x1037   : > { %v4554_v3 = vpop.xlane.xlu1 %4553 }
0x1038   : > { %v4555_v13 = vmul.f32 0.0078125, %v4554_v3 }
0x103a   : > { %v4556_v59 = vadd.f32 1e-05, %v4555_v13 }
0x103c   : > { %8111 = vrsqrt.f32 %v4556_v59 }
0x1049   : > { %v8112_v29 = vpop.eup %8111 }
0x104a   : > { %v4558_v57 = vmul.f32 %v8112_v29, %v9364_v40  ;;  %v7964_v40 = vld [vmem:[%s9734_s0 + $0xa8] ss:$16 sps:$4 sm:$0xff]  }
0x104c   : > { %v4565_v36 = vmul.f32 %v6856_v55, %v4558_v57 }
0x104e   : > { %v4572_v28 = vadd.f32 %v6857_v1, %v4565_v36 }
0x1050   : > { %v4577_v2 = vpack.c.bf16 %v4572_v28, %v4572_v28 }
0x1052   : > { %4707 = vmatmul.mubr.bf16.vlgmr.msra.gmra.mxu1 %v4577_v2 }
0x1053   : > { %4977 = vmatpush1.bf16.msra.mxu1 %v7952_v42  ;;  %5008 = vmatprep.mubr.bf16.mxu1 %v8206_v27 }
0x1054   : > { %4978 = vmatprep.subr.bf16.mxu1 %v7960_v60 }
0x1057   : > { %4979 = vmatpush1.bf16.msra.mxu1 %v7958_v26 }
0x1058   : > { %4980 = vmatprep.subr.bf16.mxu1 %v7966_v56 }
0x105b   : > { %4981 = vmatpush1.bf16.msra.mxu1 %v7964_v40 }
0x105c   : > { %4982 = vmatprep.subr.bf16.mxu1 %v7972_v7 }
0x105f   : > { %4983 = vmatpush1.bf16.msra.mxu1 %v7970_v4 }
0x1060   : > { %4984 = vmatprep.subr.bf16.mxu1 %v7978_v31 }
0x1063   : > { %4985 = vmatpush1.bf16.msra.mxu1 %v7976_v61 }
0x1064   : > { %4986 = vmatprep.subr.bf16.mxu1 %v7984_v11 }
0x1067   : > { %4987 = vmatpush1.bf16.msra.mxu1 %v7982_v52 }
0x1068   : > { %4988 = vmatprep.subr.bf16.mxu1 %v7990_v24 }
0x106b   : > { %4989 = vmatpush1.bf16.msra.mxu1 %v7988_v41 }
0x106c   : > { %4990 = vmatprep.subr.bf16.mxu1 %v7996_v8 }
0x106f   : > { %4991 = vmatpush1.bf16.msra.mxu1 %v7994_v45 }
0x1070   : > { %7294 = vmatprep.subr.bf16.mxu1 %v8207_v0 }
0x107a   : > { %v7128_v48 = vpop.f32.mrf.mxu0 }
0x107c   : > { %v7129_v25 = vpop.f32.mrf.mxu0 }
0x107d   : > { %v7130_v9 = vadd.f32 %v7129_v25, %v7128_v48 }
0x107e   : > { %v7131_v6 = vpop.f32.mrf.mxu0 }
0x107f   : > { %v4493_v35 = vadd.f32 %v7130_v9, %v6836_v20 }
0x1080   : > { %v7132_v37 = vpop.f32.mrf.mxu0 }
0x1081   : > { %4514 = vst [vmem:[#allocation3 + $0x8] sm:$0xff] %v4493_v35  ;;  %v7133_v21 = vadd.f32 %v7132_v37, %v7131_v6 }
0x1082   : > { %4573 = vst [vmem:[#allocation3 + $0x8] sm:$0x1] %v4572_v28  ;;  %v7134_v10 = vpop.f32.mrf.mxu0 }
0x1083   : > { %v4496_v14 = vadd.f32 %v7133_v21, %v6836_v20 }
0x1084   : > { %v7135_v47 = vpop.f32.mrf.mxu0 }
0x1085   : > { %4515 = vst [vmem:[#allocation3] sm:$0xff] %v4496_v14  ;;  %v7136_v49 = vadd.f32 %v7135_v47, %v7134_v10 }
0x1086   : > { %4574 = vst [vmem:[#allocation3] sm:$0x2] %v4572_v28  ;;  %v7137_v38 = vpop.f32.mrf.mxu0 }
0x1087   : > { %v4501_v17 = vadd.f32 %v7136_v49, %v6836_v20 }
0x1088   : > { %v7138_v53 = vpop.f32.mrf.mxu0 }
0x1089   : > { %4516 = vst [vmem:[#allocation3 + $0x20] sm:$0xff] %v4501_v17  ;;  %v7139_v18 = vadd.f32 %v7138_v53, %v7137_v38  ;;  %v4715_v30 = vld [vmem:[#allocation3 + $0x8] sm:$0xff]  ;;  %v4540_v53 = vfloor.f32 %v8850_v22 }
0x108a   : > { %4575 = vst [vmem:[#allocation3 + $0x20] sm:$0x4] %v4572_v28  ;;  %v7140_v39 = vpop.f32.mrf.mxu0 }
0x108b   : > { %v4504_v5 = vadd.f32 %v7139_v18, %v6836_v20  ;;  %vm4541_vm0 = vcmp.eq.f32.partialorder %v4540_v53, %v8855_v16 }
0x108c   : > { %v7141_v50 = vpop.f32.mrf.mxu0 }
0x108d   : > { %4517 = vst [vmem:[#allocation3 + $0x10] sm:$0xff] %v4504_v5  ;;  %v7142_v33 = vadd.f32 %v7141_v50, %v7140_v39  ;;  %v4716_v34 = vld [vmem:[#allocation3] sm:$0xff]  ;;  %v8209_v39 = vmov -1e+30  }
0x108e   : > { %4576 = vst [vmem:[#allocation3 + $0x10] sm:$0x8] %v4572_v28  ;;  %v7143_v43 = vpop.f32.mrf.mxu0  ;;  %v4720_v12 = vpack.c.bf16 %v4716_v34, %v4715_v30  ;;  %v9474_v5 = vsel %vm4541_vm0, 0.0, %v8209_v39 }
0x108f   : > { %v4509_v32 = vadd.f32 %v7142_v33, %v6836_v20 }
0x1090   : > { %v7144_v51 = vpop.f32.mrf.mxu0  ;;  %4948 = vmatmul.mubr.bf16.vlgmr.msra.gmra.mxu0 %v4720_v12  ;;  %5009 = vmatmul.mubr.bf16.vlgmr.msra.gmra.mxu1 %v4720_v12 }
0x1091   : > { %4518 = vst [vmem:[#allocation3 + $0x18] sm:$0xf] %v4509_v32  ;;  %4957 = vmatprep.mubr.bf16.mxu0 %v8206_v27  ;;  %5018 = vmatprep.mubr.bf16.mxu1 %v8206_v27  ;;  %v4717_v15 = vld [vmem:[#allocation3 + $0x20] sm:$0xff] }
0x1095   : > { %v4718_v63 = vld [vmem:[#allocation3 + $0x10] sm:$0xff] }
0x1096   : > { %v4721_v19 = vpack.c.bf16 %v4718_v63, %v4717_v15 }
0x1098   : > { %4958 = vmatmul.mubr.bf16.gmra.mxu0 %v4721_v19  ;;  %5019 = vmatmul.mubr.bf16.gmra.mxu1 %v4721_v19  ;;  %v4719_v62 = vld [vmem:[#allocation3 + $0x18] sm:$0xf] }
0x1099   : > { %4967 = vmatprep.mubr.bf16.mxu0 %v8206_v27  ;;  %5028 = vmatprep.mubr.bf16.mxu1 %v8206_v27  ;;  %v4722_v23 = vpack.c.bf16 %v4719_v62, %v4719_v62 }
0x10a0   : > { %4968 = vmatmul.mubr.bf16.gmra.mxu0 %v4722_v23  ;;  %5029 = vmatmul.mubr.bf16.gmra.mxu1 %v4722_v23 }
0x10a1   : > { %7300 = vmatprep.mubr.msk.bf16.mxu1 %vm8208_vm15, %v8207_v0  ;;  %7320 = vmatprep.mubr.msk.bf16.mxu0 %vm8208_vm15, %v8207_v0 }
0x1112   : > { %v4708_v44 = vpop.f32.mrf.mxu1 }
0x1113   : > { %v5037_v14 = vpack.c.bf16 %v4708_v44, %v4708_v44 }
0x1114   : > { %v4710_v46 = vpop.f32.mrf.mxu1 }
0x1115   : > { %v5144_v47 = vpack.c.bf16 %v4710_v46, %v4710_v46 }
0x1116   : > { %v4712_v54 = vpop.f32.mrf.mxu1 }
0x1118   : > { %v4713_v3 = vpop.f32.mrf.mxu1 }
0x1150   : > { %v4949_v13 = vpop.f32.mrf.mxu0  ;;  %v5010_v59 = vpop.f32.mrf.mxu1 }
0x1152   : > { %v4951_v29 = vpop.f32.mrf.mxu0  ;;  %v9446_v55 = vpop.f32.mrf.mxu1 }
0x1154   : > { %v4953_v57 = vpop.f32.mrf.mxu0  ;;  %v5014_v1 = vpop.f32.mrf.mxu1 }
0x1155   : > { %v5038_v37 = vpack.c.bf16 %v4953_v57, %v4949_v13  ;;  %v5041_v17 = vpack.c.bf16 %v5014_v1, %v5010_v59 }
0x1156   : > { %v4955_v36 = vpop.f32.mrf.mxu0  ;;  %v9448_v28 = vpop.f32.mrf.mxu1 }
0x1157   : > { %v5148_v42 = vpack.c.bf16 %v9448_v28, %v9446_v55  ;;  %v5145_v21 = vpack.c.bf16 %v4955_v36, %v4951_v29  ;;  %v8003_v55 = vld [vmem:[%s9739_s5 + $0x60] sm:$0xff]  }
0x1158   : > { %v4959_v2 = vpop.f32.mrf.mxu0  ;;  %v5020_v60 = vpop.f32.mrf.mxu1  ;;  %v8004_v28 = vld [vmem:[%s9739_s5 + $0x20] sm:$0xff]  }
0x115a   : > { %v4961_v26 = vpop.f32.mrf.mxu0  ;;  %v9452_v56 = vpop.f32.mrf.mxu1 }
0x115c   : > { %v4963_v40 = vpop.f32.mrf.mxu0  ;;  %v5024_v7 = vpop.f32.mrf.mxu1 }
0x115d   : > { %v5039_v6 = vpack.c.bf16 %v4963_v40, %v4959_v2  ;;  %v5042_v38 = vpack.c.bf16 %v5024_v7, %v5020_v60 }
0x115e   : > { %v4965_v4 = vpop.f32.mrf.mxu0  ;;  %v9454_v31 = vpop.f32.mrf.mxu1 }
0x115f   : > { %v5149_v61 = vpack.c.bf16 %v9454_v31, %v9452_v56  ;;  %v5146_v35 = vpack.c.bf16 %v4965_v4, %v4961_v26  ;;  %v8000_v56 = vld [vmem:[%s9739_s5 + $0x30] sm:$0xff]   ;;  %v8001_v31 = vld [vmem:[%s9739_s5 + $0x68] sm:$0xff]  }
0x1160   : > { %v4969_v11 = vpop.f32.mrf.mxu0  ;;  %v5030_v52 = vpop.f32.mrf.mxu1 }
0x1161   : > { %v5040_v24 = vpack.c.bf16 %v4969_v11, %v4969_v11  ;;  %v5043_v10 = vpack.c.bf16 %v5030_v52, %v5030_v52  ;;  %v7997_v52 = vld [vmem:[%s9739_s5 + $0x78] sm:$0xff]  }
0x1162   : > { %v4971_v41 = vpop.f32.mrf.mxu0  ;;  %v9458_v8 = vpop.f32.mrf.mxu1 }
0x1163   : > { %v5147_v45 = vpack.c.bf16 %v4971_v41, %v4971_v41  ;;  %7295 = vmatpush3.bf16.xpose.msra.mxu1 %v5040_v24  ;;  %v5102_v49 = vsel %vm2843_vm5, %v5043_v10, 0  ;;  %v5150_v60 = vpack.c.bf16 %v9458_v8, %v9458_v8  ;;  %v7998_v24 = vld [vmem:[%s9739_s5 + $0x38] sm:$0xff]   ;;  %v7999_v8 = vld [vmem:[%s9739_s5 + $0x70] sm:$0xff]  }
0x1164   : > { %v4973_v48 = vpop.f32.mrf.mxu0  ;;  %v5034_v20 = vpop.f32.mrf.mxu1  ;;  %7296 = vmatprep.subr.bf16.mxu1 %v8207_v0 }
0x1165   : > { %7315 = vmatpush3.bf16.xpose.msra.mxu0 %v5147_v45  ;;  %v5209_v7 = vsel %vm2843_vm5, %v5150_v60, 0  ;;  %v8006_v45 = vld [vmem:[%s9739_s5 + $0x18] sm:$0xff]   ;;  %v8007_v48 = vld [vmem:[%s9739_s5 + $0x50] sm:$0xff]  }
0x1166   : > { %v4974_v25 = vpop.f32.mrf.mxu0  ;;  %v5035_v9 = vpop.f32.mrf.mxu1  ;;  %7316 = vmatprep.subr.bf16.mxu0 %v8207_v0  ;;  %v8008_v20 = vld [vmem:[%s9739_s5 + $0x10] sm:$0xff]  }
0x1167   : > { %v8009_v25 = vld [vmem:[%s9739_s5 + $0x48] sm:$0xff]   ;;  %v8036_v60 = vld [vmem:[%s9734_s0 + $0x1a4] ss:$16 sps:$4 sm:$0xff]  }
0x1168   : > { %v8010_v9 = vld [vmem:[%s9739_s5 + $0x8] sm:$0xff]  }
0x116b   : > { %7297 = vmatpush3.bf16.xpose.msra.mxu1 %v5039_v6  ;;  %v8011_v6 = vld [vmem:[%s9739_s5 + $0x40] sm:$0xff]  }
0x116c   : > { %7298 = vmatprep.subr.bf16.mxu1 %v8207_v0 }
0x116d   : > { %7317 = vmatpush3.bf16.xpose.msra.mxu0 %v5146_v35  ;;  %v8012_v35 = vld [vmem:[%s9739_s5] sm:$0xff]  }
0x116e   : > { %7318 = vmatprep.subr.bf16.mxu0 %v8207_v0 }
0x1173   : > { %7299 = vmatpush3.bf16.xpose.msra.mxu1 %v5038_v37 }
0x1174   : > { %7304 = vmatprep.subr.bf16.mxu1 %v8207_v0 }
0x1175   : > { %7319 = vmatpush3.bf16.xpose.msra.mxu0 %v5145_v21 }
0x117a   : > { %7301 = vmatmul.mubr.bf16.vlgmr.msra.gmra.mxu1 %v5037_v14 }
0x117b   : > { %7305 = vmatpush3.bf16.msra.mxu1 %v5102_v49  ;;  %7310 = vmatprep.mubr.msk.bf16.mxu1 %vm8208_vm15, %v8207_v0 }
0x117c   : > { %7321 = vmatmul.mubr.bf16.vlgmr.msra.gmra.mxu0 %v5144_v47  ;;  %7306 = vmatprep.subr.bf16.mxu1 %v8207_v0 }
0x117d   : > { %5595 = vmatprep.mubr.bf16.mxu0 %v8206_v27 }
0x117f   : > { %7307 = vmatpush3.bf16.msra.mxu1 %v5042_v38 }
0x1180   : > { %7308 = vmatprep.subr.bf16.mxu1 %v8207_v0 }
0x1183   : > { %7309 = vmatpush3.bf16.msra.mxu1 %v5041_v17 }
0x1184   : > { %7324 = vmatprep.subr.bf16.mxu1 %v8207_v0 }
0x123a   : > { %v5078_v18 = vpop.f32.mrf.mxu1 }
0x123b   : > { %v5084_v50 = vmul.f32 0.088388346, %v5078_v18 }
0x123c   : > { %v7302_v33 = vpop.f32.mrf.mxu1  ;;  %v5185_v30 = vpop.f32.mrf.mxu0 }
0x123d   : > { %v5191_v34 = vmul.f32 0.088388346, %v5185_v30  ;;  %v5085_v43 = vadd.f32 %v5084_v50, %v9474_v5  ;;  %v6924_v30 = vld [vmem:[%s9740_s26] ss:$0 sm:$0xff] }
0x123e   : > { %v5081_v12 = vpop.f32.mrf.mxu1  ;;  %v7322_v32 = vpop.f32.mrf.mxu0 }
0x123f   : > { %v5086_v51 = vsel %vm2787_vm12, %v5085_v43, -inf  ;;  %v5192_v15 = vadd.f32 %v5191_v34, %v9474_v5 }
0x1240   : > { %5087 = vmax.xlane.f32.xlu0 %v5086_v51  ;;  %v7303_v22 = vpop.f32.mrf.mxu1  ;;  %v5188_v63 = vpop.f32.mrf.mxu0 }
0x1241   : > { %v5193_v16 = vsel %vm2787_vm12, %v5192_v15, -inf  ;;  %v8015_v22 = vld [vmem:[%s9730_s29 + $0xf4] ss:$8 sps:$4 sm:$0xff]   ;;  %v8018_v63 = vld [vmem:[%s9730_s29 + $0xe4] ss:$8 sps:$4 sm:$0xff]  }
0x1242   : > { %5194 = vmax.xlane.f32.xlu1 %v5193_v16  ;;  %v7323_v19 = vpop.f32.mrf.mxu0  ;;  %5563 = vmatprep.subr.bf16.mxu0 %v8015_v22  ;;  %v8016_v16 = vld [vmem:[%s9730_s29 + $0xe0] ss:$8 sps:$4 sm:$0xff]  }
0x1243   : > { %v8073_v22 = vld [vmem:[%s9734_s0 + $0x168] ss:$16 sps:$4 sm:$0xff]  }
0x12c9   : > { %v5088_v62 = vpop.xlane.xlu0 %5087 }
0x12ca   : > { %v5089_v23 = vsub.f32 %v5085_v43, %v5088_v62 }
0x12cb   : > { %v5195_v44 = vpop.xlane.xlu1 %5194 }
0x12cc   : > { %v5090_v46 = vmul.f32 1.442695, %v5089_v23  ;;  %v5196_v54 = vsub.f32 %v5192_v15, %v5195_v44  ;;  %v8013_v15 = vld [vmem:[%s9730_s29 + $0xf0] ss:$8 sps:$4 sm:$0xff]  }
0x12cd   : > { %5564 = vmatpush1.bf16.msra.mxu0 %v8013_v15 }
0x12ce   : > { %8113 = vpow2.f32 %v5090_v46  ;;  %v5197_v3 = vmul.f32 1.442695, %v5196_v54  ;;  %5565 = vmatprep.subr.bf16.mxu0 %v8018_v63  ;;  %v8021_v46 = vld [vmem:[%s9730_s29 + $0xd4] ss:$8 sps:$4 sm:$0xff]   ;;  %v8019_v54 = vld [vmem:[%s9730_s29 + $0xd0] ss:$8 sps:$4 sm:$0xff]  }
0x12d0   : > { %8115 = vpow2.f32 %v5197_v3  ;;  %v8024_v3 = vld [vmem:[%s9734_s0 + $0x1e4] ss:$16 sps:$4 sm:$0xff]  }
0x12d1   : > { %5566 = vmatpush1.bf16.msra.mxu0 %v8016_v16  ;;  %v8078_v16 = vld [vmem:[%s9734_s0 + $0x14c] ss:$16 sps:$4 sm:$0xff]  }
0x12d2   : > { %5567 = vmatprep.subr.bf16.mxu0 %v8021_v46  ;;  %v8084_v46 = vld [vmem:[%s9734_s0 + $0x10c] ss:$16 sps:$4 sm:$0xff]  }
0x12d5   : > { %5568 = vmatpush1.bf16.msra.mxu0 %v8019_v54  ;;  %v8082_v54 = vld [vmem:[%s9734_s0 + $0x108] ss:$16 sps:$4 sm:$0xff]  }
0x12db   : > { %v8114_v13 = vpop.eup %8113 }
0x12dc   : > { %v5092_v59 = vsel %vm2787_vm12, %v8114_v13, 0.0 }
0x12dd   : > { %v8116_v29 = vpop.eup %8115  ;;  %5093 = vadd.xlane.f32.xlu0 %v5092_v59  ;;  %v8027_v59 = vld [vmem:[%s9730_s29 + $0xc4] ss:$8 sps:$4 sm:$0xff]  }
0x12de   : > { %v5199_v57 = vsel %vm2787_vm12, %v8116_v29, 0.0  ;;  %5569 = vmatprep.subr.bf16.mxu0 %v8027_v59 }
0x12df   : > { %5200 = vadd.xlane.f32.xlu1 %v5199_v57  ;;  %v8030_v57 = vld [vmem:[%s9734_s0 + $0x1c4] ss:$16 sps:$4 sm:$0xff]  }
0x1366   : > { %v5094_v1 = vpop.xlane.xlu0 %5093 }
0x1367   : > { %8117 = vrcp.f32 %v5094_v1  ;;  %v8028_v1 = vld [vmem:[%s9734_s0 + $0x1c0] ss:$16 sps:$4 sm:$0xff]  }
0x1368   : > { %v5201_v36 = vpop.xlane.xlu1 %5200 }
0x1369   : > { %8119 = vrcp.f32 %v5201_v36  ;;  %v8033_v36 = vld [vmem:[%s9730_s29 + $0xb4] ss:$8 sps:$4 sm:$0xff]  }
0x1374   : > { %v8118_v2 = vpop.eup %8117 }
0x1375   : > { %v5096_v26 = vmul.f32 %v8118_v2, %v8114_v13  ;;  %v8022_v13 = vld [vmem:[%s9734_s0 + $0x1e0] ss:$16 sps:$4 sm:$0xff]  }
0x1376   : > { %v8120_v4 = vpop.eup %8119  ;;  %v8031_v2 = vld [vmem:[%s9730_s29 + $0xb0] ss:$8 sps:$4 sm:$0xff]  }
0x1377   : > { %v5097_v40 = vpack.c.bf16 %v5096_v26, %v5096_v26  ;;  %v5203_v11 = vmul.f32 %v8120_v4, %v8116_v29  ;;  %v8025_v29 = vld [vmem:[%s9730_s29 + $0xc0] ss:$8 sps:$4 sm:$0xff]   ;;  %v8042_v4 = vld [vmem:[%s9734_s0 + $0x184] ss:$16 sps:$4 sm:$0xff]  }
0x1378   : > { %5570 = vmatpush1.bf16.msra.mxu0 %v8025_v29  ;;  %v8034_v26 = vld [vmem:[%s9734_s0 + $0x1a0] ss:$16 sps:$4 sm:$0xff]  }
0x1379   : > { %7311 = vmatmul.mubr.msk.bf16.vlgmr.msra.gmra.mxu1 %vm2774_vm8, %v5097_v40  ;;  %v5204_v41 = vpack.c.bf16 %v5203_v11, %v5203_v11  ;;  %5571 = vmatprep.subr.bf16.mxu0 %v8033_v36  ;;  %v8039_v40 = vld [vmem:[%s9730_s29 + $0xa4] ss:$8 sps:$4 sm:$0xff]   ;;  %v8040_v11 = vld [vmem:[%s9734_s0 + $0x180] ss:$16 sps:$4 sm:$0xff]  }
0x137a   : > { %7325 = vmatpush3.bf16.msra.mxu1 %v5209_v7  ;;  %7330 = vmatprep.mubr.msk.bf16.mxu1 %vm8208_vm15, %v8207_v0  ;;  %v8037_v7 = vld [vmem:[%s9730_s29 + $0xa0] ss:$8 sps:$4 sm:$0xff]  }
0x137b   : > { %7326 = vmatprep.subr.bf16.mxu1 %v8207_v0 }
0x137c   : > { %5572 = vmatpush1.bf16.msra.mxu0 %v8031_v2 }
0x137d   : > { %5573 = vmatprep.subr.bf16.mxu0 %v8039_v40 }
0x137e   : > { %7327 = vmatpush3.bf16.msra.mxu1 %v5149_v61  ;;  %v8002_v61 = vld [vmem:[%s9739_s5 + $0x28] sm:$0xff]  }
0x137f   : > { %7328 = vmatprep.subr.bf16.mxu1 %v8207_v0 }
0x1380   : > { %5574 = vmatpush1.bf16.msra.mxu0 %v8037_v7 }
0x1382   : > { %7329 = vmatpush3.bf16.msra.mxu1 %v5148_v42  ;;  %v8005_v42 = vld [vmem:[%s9739_s5 + $0x58] sm:$0xff]  }
0x1383   : > { %7162 = vmatprep.subr.bf16.mxu1 %v7997_v52  ;;  %v8045_v52 = vld [vmem:[%s9730_s29 + $0x94] ss:$8 sps:$4 sm:$0xff]  }
0x1384   : > { %5575 = vmatprep.subr.bf16.mxu0 %v8045_v52 }
0x1385   : > { %7331 = vmatmul.mubr.msk.bf16.vlgmr.msra.gmra.mxu1 %vm2774_vm8, %v5204_v41  ;;  %v8048_v41 = vld [vmem:[%s9734_s0 + $0x164] ss:$16 sps:$4 sm:$0xff]  }
0x1386   : > { %7163 = vmatpush3.bf16.msra.mxu1 %v7998_v24  ;;  %v8043_v24 = vld [vmem:[%s9730_s29 + $0x90] ss:$8 sps:$4 sm:$0xff]  }
0x1387   : > { %7164 = vmatprep.subr.bf16.mxu1 %v7999_v8  ;;  %v8046_v8 = vld [vmem:[%s9734_s0 + $0x160] ss:$16 sps:$4 sm:$0xff]   ;;  %5576 = vmatpush1.bf16.msra.mxu0 %v8043_v24 }
0x138a   : > { %7165 = vmatpush3.bf16.msra.mxu1 %v8000_v56  ;;  %v8051_v56 = vld [vmem:[%s9730_s29 + $0x84] ss:$8 sps:$4 sm:$0xff]  }
0x138b   : > { %7166 = vmatprep.subr.bf16.mxu1 %v8001_v31  ;;  %v8049_v31 = vld [vmem:[%s9730_s29 + $0x80] ss:$8 sps:$4 sm:$0xff]   ;;  %5577 = vmatprep.subr.bf16.mxu0 %v8051_v56 }
0x138c   : > { %5578 = vmatpush1.bf16.msra.mxu0 %v8049_v31 }
0x138e   : > { %7167 = vmatpush3.bf16.msra.mxu1 %v8002_v61  ;;  %v8054_v61 = vld [vmem:[%s9734_s0 + $0x144] ss:$16 sps:$4 sm:$0xff]  }
0x138f   : > { %7168 = vmatprep.subr.bf16.mxu1 %v8003_v55  ;;  %v8052_v55 = vld [vmem:[%s9734_s0 + $0x140] ss:$16 sps:$4 sm:$0xff]  }
0x1392   : > { %7169 = vmatpush3.bf16.msra.mxu1 %v8004_v28  ;;  %v8057_v28 = vld [vmem:[%s9734_s0 + $0x1ec] ss:$16 sps:$4 sm:$0xff]  }
0x1393   : > { %7170 = vmatprep.subr.bf16.mxu1 %v8005_v42  ;;  %v8060_v42 = vld [vmem:[%s9734_s0 + $0x124] ss:$16 sps:$4 sm:$0xff]   ;;  %5866 = vmatprep.subr.bf16.mxu0 %v8057_v28 }
0x1396   : > { %7171 = vmatpush3.bf16.msra.mxu1 %v8006_v45  ;;  %v8058_v45 = vld [vmem:[%s9734_s0 + $0x120] ss:$16 sps:$4 sm:$0xff]  }
0x1397   : > { %7172 = vmatprep.subr.bf16.mxu1 %v8007_v48  ;;  %v8064_v48 = vld [vmem:[%s9734_s0 + $0x100] ss:$16 sps:$4 sm:$0xff]  }
0x139a   : > { %7173 = vmatpush3.bf16.msra.mxu1 %v8008_v20  ;;  %v8066_v20 = vld [vmem:[%s9734_s0 + $0x104] ss:$16 sps:$4 sm:$0xff]  }
0x139b   : > { %7174 = vmatprep.subr.bf16.mxu1 %v8009_v25 }
0x139e   : > { %7175 = vmatpush3.bf16.msra.mxu1 %v8010_v9 }
0x139f   : > { %7176 = vmatprep.subr.bf16.mxu1 %v8011_v6 }
0x13a2   : > { %7177 = vmatpush3.bf16.msra.mxu1 %v8012_v35 }
0x13a3   : > { %5805 = vmatprep.subr.bf16.mxu1 %v8024_v3 }
0x1439   : > { %v5138_v37 = vpop.f32.mrf.mxu1 }
0x143a   : > { %v5251_v38 = vpack.c.bf16 %v5138_v37, %v5138_v37  ;;  %v6927_v37 = vld [vmem:[%s9736_s11 + $0x1] ss:$0 sm:$0xff] }
0x143b   : > { %v7312_v21 = vpop.f32.mrf.mxu1 }
0x143d   : > { %v5141_v10 = vpop.f32.mrf.mxu1 }
0x143e   : > { %v6928_v10 = vld [vmem:[%s9737_s18 + $0x1] ss:$0 sm:$0xff] }
0x143f   : > { %v7313_v14 = vpop.f32.mrf.mxu1 }
0x1445   : > { %v5245_v47 = vpop.f32.mrf.mxu1 }
0x1446   : > { %v5252_v49 = vpack.c.bf16 %v5245_v47, %v5245_v47 }
0x1447   : > { %v7332_v17 = vpop.f32.mrf.mxu1 }
0x1448   : > { %5413 = vmatprep.mubr.bf16.mxu1 %v5252_v49  ;;  %v8055_v49 = vld [vmem:[%s9734_s0 + $0x1e8] ss:$16 sps:$4 sm:$0xff]   ;;  %v8063_v17 = vld [vmem:[%s9734_s0 + $0x1cc] ss:$16 sps:$4 sm:$0xff]  }
0x1449   : > { %v5248_v53 = vpop.f32.mrf.mxu1  ;;  %5414 = vmatmul.mubr.bf16.vlgmr.msra.gmra.mxu1 %v5251_v38 }
0x144a   : > { %5837 = vmatprep.mubr.bf16.mxu1 %v8206_v27  ;;  %5806 = vmatpush1.bf16.msra.mxu1 %v8022_v13  ;;  %v8061_v53 = vld [vmem:[%s9734_s0 + $0x1c8] ss:$16 sps:$4 sm:$0xff]  }
0x144b   : > { %v7333_v18 = vpop.f32.mrf.mxu1  ;;  %5807 = vmatprep.subr.bf16.mxu1 %v8030_v57 }
0x144c   : > { %v8069_v18 = vld [vmem:[%s9734_s0 + $0x1ac] ss:$16 sps:$4 sm:$0xff]  }
0x144e   : > { %5808 = vmatpush1.bf16.msra.mxu1 %v8028_v1 }
0x144f   : > { %5809 = vmatprep.subr.bf16.mxu1 %v8036_v60 }
0x1452   : > { %5810 = vmatpush1.bf16.msra.mxu1 %v8034_v26 }
0x1453   : > { %5811 = vmatprep.subr.bf16.mxu1 %v8042_v4 }
0x1456   : > { %5812 = vmatpush1.bf16.msra.mxu1 %v8040_v11 }
0x1457   : > { %5813 = vmatprep.subr.bf16.mxu1 %v8048_v41 }
0x145a   : > { %5814 = vmatpush1.bf16.msra.mxu1 %v8046_v8 }
0x145b   : > { %5815 = vmatprep.subr.bf16.mxu1 %v8054_v61 }
0x145e   : > { %5816 = vmatpush1.bf16.msra.mxu1 %v8052_v55 }
0x145f   : > { %5817 = vmatprep.subr.bf16.mxu1 %v8060_v42 }
0x1462   : > { %5818 = vmatpush1.bf16.msra.mxu1 %v8058_v45 }
0x1463   : > { %5819 = vmatprep.subr.bf16.mxu1 %v8066_v20 }
0x1466   : > { %5820 = vmatpush1.bf16.msra.mxu1 %v8064_v48 }
0x1467   : > { %7334 = vmatprep.subr.bf16.mxu1 %v8207_v0 }
0x1509   : > { %v7178_v39 = vpop.f32.mrf.mxu1 }
0x150b   : > { %v7179_v50 = vpop.f32.mrf.mxu1 }
0x150c   : > { %v7180_v33 = vadd.f32 %v7179_v50, %v7178_v39  ;;  %v8067_v39 = vld [vmem:[%s9734_s0 + $0x1a8] ss:$16 sps:$4 sm:$0xff]  }
0x150d   : > { %v7181_v34 = vpop.f32.mrf.mxu1 }
0x150e   : > { %v5421_v43 = vadd.f32 %v7180_v33, %v9340_v58  ;;  %v8072_v34 = vld [vmem:[%s9734_s0 + $0x18c] ss:$16 sps:$4 sm:$0xff]  }
0x150f   : > { %v7182_v12 = vpop.f32.mrf.mxu1 }
0x1510   : > { %v9516_v32 = vadd.f32 %v6924_v30, %v5421_v43  ;;  %v8070_v43 = vld [vmem:[%s9734_s0 + $0x188] ss:$16 sps:$4 sm:$0xff]   ;;  %v8075_v12 = vld [vmem:[%s9734_s0 + $0x16c] ss:$16 sps:$4 sm:$0xff]  }
0x1512   : > { %v5434_v51 = vsel %vm1818_vm3, %v9516_v32, 0.0 }
0x1513   : > { %5435 = vadd.xlane.f32.xlu0 %v5434_v51 }
0x159c   : > { %v5436_v58 = vpop.xlane.xlu0 %5435 }
0x159d   : > { %v5437_v19 = vmul.f32 0.0078125, %v5436_v58  ;;  %v8076_v58 = vld [vmem:[%s9734_s0 + $0x148] ss:$16 sps:$4 sm:$0xff]  }
0x159f   : > { %v9525_v62 = vsub.f32 %v9516_v32, %v5437_v19  ;;  %v8081_v19 = vld [vmem:[%s9734_s0 + $0x12c] ss:$16 sps:$4 sm:$0xff]  }
0x15a1   : > { %v5439_v23 = vmul.f32 %v9525_v62, %v9525_v62 }
0x15a3   : > { %v5440_v44 = vsel %vm1818_vm3, %v5439_v23, 0.0  ;;  %v8079_v23 = vld [vmem:[%s9734_s0 + $0x128] ss:$16 sps:$4 sm:$0xff]  }
0x15a4   : > { %5441 = vadd.xlane.f32.xlu1 %v5440_v44 }
0x162d   : > { %v5442_v25 = vpop.xlane.xlu1 %5441 }
0x162e   : > { %v5443_v9 = vmul.f32 0.0078125, %v5442_v25 }
0x1630   : > { %v5444_v6 = vadd.f32 1e-05, %v5443_v9 }
0x1632   : > { %8121 = vrsqrt.f32 %v5444_v6 }
0x163f   : > { %v8122_v35 = vpop.eup %8121 }
0x1640   : > { %v5446_v21 = vmul.f32 %v8122_v35, %v9525_v62  ;;  %v5608_v62 = vld [vmem:[#allocation3 + $0x18] sm:$0xf] }
0x1641   : > { %v5611_v44 = vpack.c.bf16 %v5608_v62, %v5608_v62 }
0x1642   : > { %v5453_v14 = vmul.f32 %v6927_v37, %v5446_v21 }
0x1644   : > { %v5460_v47 = vadd.f32 %v6928_v10, %v5453_v14 }
0x1646   : > { %5461 = vst [vmem:[#allocation3 + $0x8] sm:$0x1] %v5460_v47  ;;  %5462 = vst [vmem:[#allocation3] sm:$0x2] %v5460_v47  ;;  %v5465_v38 = vpack.c.bf16 %v5460_v47, %v5460_v47 }
0x1647   : > { %5463 = vst [vmem:[#allocation3 + $0x20] sm:$0x4] %v5460_v47  ;;  %5464 = vst [vmem:[#allocation3 + $0x10] sm:$0x8] %v5460_v47 }
0x1648   : > { %5596 = vmatmul.mubr.bf16.vlgmr.msra.gmra.mxu0 %v5465_v38 }
0x1649   : > { %5867 = vmatpush1.bf16.msra.mxu0 %v8055_v49  ;;  %5898 = vmatprep.mubr.bf16.mxu0 %v8206_v27 }
0x164a   : > { %5868 = vmatprep.subr.bf16.mxu0 %v8063_v17 }
0x164d   : > { %5869 = vmatpush1.bf16.msra.mxu0 %v8061_v53  ;;  %v5604_v50 = vld [vmem:[#allocation3 + $0x8] sm:$0xff]  ;;  %v5605_v33 = vld [vmem:[#allocation3] sm:$0xff] }
0x164e   : > { %5870 = vmatprep.subr.bf16.mxu0 %v8069_v18  ;;  %v5609_v30 = vpack.c.bf16 %v5605_v33, %v5604_v50  ;;  %v5606_v51 = vld [vmem:[#allocation3 + $0x20] sm:$0xff]  ;;  %v5607_v15 = vld [vmem:[#allocation3 + $0x10] sm:$0xff] }
0x164f   : > { %v5610_v63 = vpack.c.bf16 %v5607_v15, %v5606_v51 }
0x1650   : > { %5838 = vmatmul.mubr.bf16.vlgmr.msra.gmra.mxu1 %v5609_v30 }
0x1651   : > { %5871 = vmatpush1.bf16.msra.mxu0 %v8067_v39  ;;  %5847 = vmatprep.mubr.bf16.mxu1 %v8206_v27 }
0x1652   : > { %5872 = vmatprep.subr.bf16.mxu0 %v8072_v34 }
0x1655   : > { %5873 = vmatpush1.bf16.msra.mxu0 %v8070_v43 }
0x1656   : > { %5874 = vmatprep.subr.bf16.mxu0 %v8075_v12 }
0x1658   : > { %5848 = vmatmul.mubr.bf16.gmra.mxu1 %v5610_v63 }
0x1659   : > { %5875 = vmatpush1.bf16.msra.mxu0 %v8073_v22  ;;  %5857 = vmatprep.mubr.bf16.mxu1 %v8206_v27 }
0x165a   : > { %5876 = vmatprep.subr.bf16.mxu0 %v8078_v16 }
0x165d   : > { %5877 = vmatpush1.bf16.msra.mxu0 %v8076_v58 }
0x165e   : > { %5878 = vmatprep.subr.bf16.mxu0 %v8081_v19 }
0x1660   : > { %5858 = vmatmul.mubr.bf16.gmra.mxu1 %v5611_v44 }
0x1661   : > { %5879 = vmatpush1.bf16.msra.mxu0 %v8079_v23  ;;  %7340 = vmatprep.mubr.msk.bf16.mxu1 %vm8208_vm15, %v8207_v0 }
0x1662   : > { %5880 = vmatprep.subr.bf16.mxu0 %v8084_v46 }
0x1665   : > { %5881 = vmatpush1.bf16.msra.mxu0 %v8082_v54 }
0x1666   : > { %7344 = vmatprep.subr.bf16.mxu0 %v8207_v0 }
0x1668   : > { %5899 = vmatmul.mubr.bf16.vlgmr.msra.gmra.mxu0 %v5609_v30 }
0x1669   : > { %5908 = vmatprep.mubr.bf16.mxu0 %v8206_v27 }
0x1670   : > { %5909 = vmatmul.mubr.bf16.gmra.mxu0 %v5610_v63 }
0x1671   : > { %5918 = vmatprep.mubr.bf16.mxu0 %v8206_v27 }
0x1678   : > { %5919 = vmatmul.mubr.bf16.gmra.mxu0 %v5611_v44 }
0x1679   : > { %7350 = vmatprep.mubr.msk.bf16.mxu0 %vm8208_vm15, %v8207_v0 }
0x1708   : > { %v5597_v3 = vpop.f32.mrf.mxu0 }
0x1709   : > { %v5927_v9 = vpack.c.bf16 %v5597_v3, %v5597_v3 }
0x170a   : > { %v5599_v13 = vpop.f32.mrf.mxu0 }
0x170b   : > { %v6034_v18 = vpack.c.bf16 %v5599_v13, %v5599_v13 }
0x170c   : > { %v5601_v59 = vpop.f32.mrf.mxu0 }
0x170e   : > { %v5602_v29 = vpop.f32.mrf.mxu0 }
0x1710   : > { %v5839_v57 = vpop.f32.mrf.mxu1 }
0x1712   : > { %v5841_v1 = vpop.f32.mrf.mxu1 }
0x1714   : > { %v5843_v36 = vpop.f32.mrf.mxu1 }
0x1715   : > { %v5928_v42 = vpack.c.bf16 %v5843_v36, %v5839_v57 }
0x1716   : > { %v5845_v2 = vpop.f32.mrf.mxu1 }
0x1717   : > { %v6035_v53 = vpack.c.bf16 %v5845_v2, %v5841_v1 }
0x1718   : > { %v5849_v60 = vpop.f32.mrf.mxu1 }
0x171a   : > { %v5851_v26 = vpop.f32.mrf.mxu1 }
0x171c   : > { %v5853_v40 = vpop.f32.mrf.mxu1 }
0x171d   : > { %v5929_v8 = vpack.c.bf16 %v5853_v40, %v5849_v60 }
0x171e   : > { %v5855_v7 = vpop.f32.mrf.mxu1 }
0x171f   : > { %v6036_v38 = vpack.c.bf16 %v5855_v7, %v5851_v26  ;;  %v8085_v7 = vld [vmem:[%s9739_s5 + $0xf8] sm:$0xff]  }
0x1720   : > { %v5859_v4 = vpop.f32.mrf.mxu1 }
0x1721   : > { %v5930_v11 = vpack.c.bf16 %v5859_v4, %v5859_v4 }
0x1722   : > { %v5861_v52 = vpop.f32.mrf.mxu1 }
0x1723   : > { %7335 = vmatpush3.bf16.xpose.msra.mxu1 %v5930_v11  ;;  %v6037_v35 = vpack.c.bf16 %v5861_v52, %v5861_v52  ;;  %v8086_v52 = vld [vmem:[%s9739_s5 + $0xb8] sm:$0xff]  }
0x1724   : > { %v5863_v27 = vpop.f32.mrf.mxu1  ;;  %7336 = vmatprep.subr.bf16.mxu1 %v8207_v0 }
0x1726   : > { %v5864_v24 = vpop.f32.mrf.mxu1 }
0x1727   : > { %v8087_v24 = vld [vmem:[%s9739_s5 + $0xf0] sm:$0xff]  }
0x1728   : > { %v5900_v41 = vpop.f32.mrf.mxu0 }
0x172a   : > { %v9589_v56 = vpop.f32.mrf.mxu0 }
0x172b   : > { %7337 = vmatpush3.bf16.xpose.msra.mxu1 %v5929_v8  ;;  %v8090_v8 = vld [vmem:[%s9739_s5 + $0xa8] sm:$0xff]  }
0x172c   : > { %v5904_v31 = vpop.f32.mrf.mxu0  ;;  %7338 = vmatprep.subr.bf16.mxu1 %v8207_v0 }
0x172d   : > { %v5931_v17 = vpack.c.bf16 %v5904_v31, %v5900_v41  ;;  %v8089_v41 = vld [vmem:[%s9739_s5 + $0xe8] sm:$0xff]   ;;  %v8092_v31 = vld [vmem:[%s9739_s5 + $0xa0] sm:$0xff]  }
0x172e   : > { %v9592_v61 = vpop.f32.mrf.mxu0 }
0x172f   : > { %v6038_v55 = vpack.c.bf16 %v9592_v61, %v9589_v56  ;;  %v8091_v56 = vld [vmem:[%s9739_s5 + $0xe0] sm:$0xff]   ;;  %v8093_v61 = vld [vmem:[%s9739_s5 + $0xd8] sm:$0xff]  }
0x1730   : > { %v5910_v28 = vpop.f32.mrf.mxu0 }
0x1732   : > { %v9596_v45 = vpop.f32.mrf.mxu0 }
0x1733   : > { %7339 = vmatpush3.bf16.xpose.msra.mxu1 %v5928_v42  ;;  %v8096_v42 = vld [vmem:[%s9739_s5 + $0x90] sm:$0xff]  }
0x1734   : > { %v5914_v48 = vpop.f32.mrf.mxu0  ;;  %7354 = vmatprep.subr.bf16.mxu1 %v8207_v0 }
0x1735   : > { %v5932_v47 = vpack.c.bf16 %v5914_v48, %v5910_v28  ;;  %v8095_v28 = vld [vmem:[%s9739_s5 + $0xd0] sm:$0xff]   ;;  %v8098_v48 = vld [vmem:[%s9739_s5 + $0x88] sm:$0xff]  }
0x1736   : > { %v9599_v20 = vpop.f32.mrf.mxu0 }
0x1737   : > { %v6039_v25 = vpack.c.bf16 %v9599_v20, %v9596_v45  ;;  %v8097_v45 = vld [vmem:[%s9739_s5 + $0xc8] sm:$0xff]   ;;  %v8099_v20 = vld [vmem:[%s9739_s5 + $0xc0] sm:$0xff]  }
0x1738   : > { %v5920_v6 = vpop.f32.mrf.mxu0 }
0x1739   : > { %v5933_v37 = vpack.c.bf16 %v5920_v6, %v5920_v6 }
0x173a   : > { %v5922_v21 = vpop.f32.mrf.mxu0  ;;  %7341 = vmatmul.mubr.bf16.vlgmr.msra.gmra.mxu1 %v5927_v9 }
0x173b   : > { %v5992_v10 = vsel %vm2843_vm5, %v5933_v37, 0  ;;  %7355 = vmatpush3.bf16.xpose.msra.mxu1 %v6037_v35  ;;  %7360 = vmatprep.mubr.msk.bf16.mxu1 %vm8208_vm15, %v8207_v0  ;;  %v6040_v36 = vpack.c.bf16 %v5922_v21, %v5922_v21 }
0x173c   : > { %v5924_v14 = vpop.f32.mrf.mxu0  ;;  %7345 = vmatpush3.bf16.msra.mxu0 %v5992_v10  ;;  %7356 = vmatprep.subr.bf16.mxu1 %v8207_v0 }
0x173d   : > { %7346 = vmatprep.subr.bf16.mxu0 %v8207_v0  ;;  %v6099_v26 = vsel %vm2843_vm5, %v6040_v36, 0 }
0x173e   : > { %v5925_v49 = vpop.f32.mrf.mxu0 }
0x1740   : > { %7347 = vmatpush3.bf16.msra.mxu0 %v5932_v47 }
0x1741   : > { %7348 = vmatprep.subr.bf16.mxu0 %v8207_v0 }
0x1743   : > { %7357 = vmatpush3.bf16.xpose.msra.mxu1 %v6036_v38 }
0x1744   : > { %7349 = vmatpush3.bf16.msra.mxu0 %v5931_v17  ;;  %7358 = vmatprep.subr.bf16.mxu1 %v8207_v0  ;;  %v6322_v17 = vld [vmem:[%s8415_s2 + $0x1] sm:$0xff] }
0x1745   : > { %7364 = vmatprep.subr.bf16.mxu0 %v8207_v0  ;;  %6326 = vst [vmem:[%s8442_s19 + $0x1] sm:$0xff] %v6322_v17 }
0x174b   : > { %7359 = vmatpush3.bf16.xpose.msra.mxu1 %v6035_v53  ;;  %v6323_v53 = vld [vmem:[%s8415_s2 + $0x11] sm:$0xff] }
0x174c   : > { %6327 = vst [vmem:[%s8442_s19 + $0x11] sm:$0xff] %v6323_v53 }
0x1752   : > { %7361 = vmatmul.mubr.bf16.vlgmr.msra.gmra.mxu1 %v6034_v18  ;;  %v6324_v18 = vld [vmem:[%s8415_s2 + $0x21] sm:$0xff] }
0x1753   : > { %6328 = vst [vmem:[%s8442_s19 + $0x21] sm:$0xff] %v6324_v18 }
0x17fa   : > { %v5968_v39 = vpop.f32.mrf.mxu1 }
0x17fb   : > { %v5974_v50 = vmul.f32 0.088388346, %v5968_v39  ;;  %v6325_v39 = vld [vmem:[%s8415_s2 + $0x31] sm:$0xff] }
0x17fc   : > { %v7342_v33 = vpop.f32.mrf.mxu1  ;;  %6329 = vst [vmem:[%s8442_s19 + $0x31] sm:$0xff] %v6325_v39 }
0x17fd   : > { %v5975_v30 = vadd.f32 %v5974_v50, %v9474_v5 }
0x17fe   : > { %v5971_v34 = vpop.f32.mrf.mxu1 }
0x17ff   : > { %v5976_v43 = vsel %vm2787_vm12, %v5975_v30, -inf  ;;  %v7076_v34 = vld [vmem:[%s9741_s15 + $0x1] ss:$0 sm:$0xff] }
0x1800   : > { %5977 = vmax.xlane.f32.xlu0 %v5976_v43  ;;  %v7343_v12 = vpop.f32.mrf.mxu1 }
0x1812   : > { %v6075_v51 = vpop.f32.mrf.mxu1 }
0x1813   : > { %v6081_v15 = vmul.f32 0.088388346, %v6075_v51 }
0x1814   : > { %v7362_v22 = vpop.f32.mrf.mxu1 }
0x1815   : > { %v6082_v63 = vadd.f32 %v6081_v15, %v9474_v5 }
0x1816   : > { %v6078_v16 = vpop.f32.mrf.mxu1 }
0x1817   : > { %v6083_v58 = vsel %vm2787_vm12, %v6082_v63, -inf }
0x1818   : > { %6084 = vmax.xlane.f32.xlu1 %v6083_v58  ;;  %v7363_v19 = vpop.f32.mrf.mxu1 }
0x1889   : > { %v5978_v62 = vpop.xlane.xlu0 %5977 }
0x188a   : > { %v5979_v23 = vsub.f32 %v5975_v30, %v5978_v62 }
0x188c   : > { %v5980_v44 = vmul.f32 1.442695, %v5979_v23 }
0x188e   : > { %8123 = vpow2.f32 %v5980_v44 }
0x189b   : > { %v8124_v46 = vpop.eup %8123 }
0x189c   : > { %v5982_v54 = vsel %vm2787_vm12, %v8124_v46, 0.0 }
0x189d   : > { %5983 = vadd.xlane.f32.xlu0 %v5982_v54 }
0x18a1   : > { %v6085_v3 = vpop.xlane.xlu1 %6084 }
0x18a2   : > { %v6086_v13 = vsub.f32 %v6082_v63, %v6085_v3 }
0x18a4   : > { %v6087_v59 = vmul.f32 1.442695, %v6086_v13 }
0x18a6   : > { %8125 = vpow2.f32 %v6087_v59 }
0x18b3   : > { %v8126_v29 = vpop.eup %8125 }
0x18b4   : > { %v6089_v5 = vsel %vm2787_vm12, %v8126_v29, 0.0 }
0x18b5   : > { %6090 = vadd.xlane.f32.xlu1 %v6089_v5 }
0x1926   : > { %v5984_v57 = vpop.xlane.xlu0 %5983 }
0x1927   : > { %8127 = vrcp.f32 %v5984_v57 }
0x1934   : > { %v8128_v1 = vpop.eup %8127 }
0x1935   : > { %v5986_v2 = vmul.f32 %v8128_v1, %v8124_v46 }
0x1937   : > { %v5987_v60 = vpack.c.bf16 %v5986_v2, %v5986_v2 }
0x1939   : > { %7351 = vmatmul.mubr.msk.bf16.vlgmr.msra.gmra.mxu0 %vm2774_vm8, %v5987_v60 }
0x193a   : > { %7365 = vmatpush3.bf16.msra.mxu0 %v6099_v26  ;;  %7370 = vmatprep.mubr.msk.bf16.mxu0 %vm8208_vm15, %v8207_v0 }
0x193b   : > { %7366 = vmatprep.subr.bf16.mxu0 %v8207_v0 }
0x193e   : > { %7367 = vmatpush3.bf16.msra.mxu0 %v6039_v25  ;;  %v6091_v40 = vpop.xlane.xlu1 %6090  ;;  %v8100_v25 = vld [vmem:[%s9739_s5 + $0x80] sm:$0xff]  }
0x193f   : > { %8129 = vrcp.f32 %v6091_v40  ;;  %7368 = vmatprep.subr.bf16.mxu0 %v8207_v0  ;;  %v8088_v0 = vld [vmem:[%s9739_s5 + $0xb0] sm:$0xff]  }
0x1942   : > { %7369 = vmatpush3.bf16.msra.mxu0 %v6038_v55  ;;  %v8094_v55 = vld [vmem:[%s9739_s5 + $0x98] sm:$0xff]  }
0x1943   : > { %7200 = vmatprep.subr.bf16.mxu0 %v8085_v7 }
0x194c   : > { %v8130_v4 = vpop.eup %8129 }
0x194d   : > { %v6093_v11 = vmul.f32 %v8130_v4, %v8126_v29 }
0x194f   : > { %v6094_v27 = vpack.c.bf16 %v6093_v11, %v6093_v11 }
0x1951   : > { %7371 = vmatmul.mubr.msk.bf16.vlgmr.msra.gmra.mxu0 %vm2774_vm8, %v6094_v27 }
0x1952   : > { %7201 = vmatpush3.bf16.msra.mxu0 %v8086_v52 }
0x1953   : > { %7202 = vmatprep.subr.bf16.mxu0 %v8087_v24 }
0x1956   : > { %7203 = vmatpush3.bf16.msra.mxu0 %v8088_v0 }
0x1957   : > { %7204 = vmatprep.subr.bf16.mxu0 %v8089_v41 }
0x195a   : > { %7205 = vmatpush3.bf16.msra.mxu0 %v8090_v8 }
0x195b   : > { %7206 = vmatprep.subr.bf16.mxu0 %v8091_v56 }
0x195e   : > { %7207 = vmatpush3.bf16.msra.mxu0 %v8092_v31 }
0x195f   : > { %7208 = vmatprep.subr.bf16.mxu0 %v8093_v61 }
0x1962   : > { %7209 = vmatpush3.bf16.msra.mxu0 %v8094_v55 }
0x1963   : > { %7210 = vmatprep.subr.bf16.mxu0 %v8095_v28 }
0x1966   : > { %7211 = vmatpush3.bf16.msra.mxu0 %v8096_v42 }
0x1967   : > { %7212 = vmatprep.subr.bf16.mxu0 %v8097_v45 }
0x196a   : > { %7213 = vmatpush3.bf16.msra.mxu0 %v8098_v48 }
0x196b   : > { %7214 = vmatprep.subr.bf16.mxu0 %v8099_v20 }
0x196e   : > { %7215 = vmatpush3.bf16.msra.mxu0 %v8100_v25 }
0x19f9   : > { %v6028_v9 = vpop.f32.mrf.mxu0 }
0x19fa   : > { %v6141_v14 = vpack.c.bf16 %v6028_v9, %v6028_v9 }
0x19fb   : > { %v7352_v6 = vpop.f32.mrf.mxu0 }
0x19fd   : > { %v6031_v35 = vpop.f32.mrf.mxu0 }
0x19ff   : > { %v7353_v37 = vpop.f32.mrf.mxu0 }
0x1a11   : > { %v6135_v21 = vpop.f32.mrf.mxu0 }
0x1a12   : > { %v6142_v10 = vpack.c.bf16 %v6135_v21, %v6135_v21 }
0x1a13   : > { %v7372_v47 = vpop.f32.mrf.mxu0 }
0x1a14   : > { %6304 = vmatprep.mubr.bf16.mxu0 %v6142_v10 }
0x1a15   : > { %v6138_v49 = vpop.f32.mrf.mxu0  ;;  %6305 = vmatmul.mubr.bf16.vlgmr.msra.gmra.mxu0 %v6141_v14 }
0x1a17   : > { %v7373_v38 = vpop.f32.mrf.mxu0 }
0x1ad5   : > { %v7216_v50 = vpop.f32.mrf.mxu0 }
0x1ad7   : > { %v7217_v33 = vpop.f32.mrf.mxu0 }
0x1ad8   : > { %v7218_v30 = vadd.f32 %v7217_v33, %v7216_v50 }
0x1ad9   : > { %v7219_v43 = vpop.f32.mrf.mxu0 }
0x1ada   : > { %v6312_v12 = vadd.f32 %v7218_v30, %v9516_v32 }
0x1adb   : > { %v7220_v51 = vpop.f32.mrf.mxu0 }
0x1adc   : > { %v6321_v15 = vadd.f32 %v7076_v34, %v6312_v12 }
0x1ade   : > { %6330 = vst [vmem:[%s8442_s19] sm:$0x1] %v6321_v15  ;;  %7077 = vst [vmem:[%s8442_s19 + $0xf] sm:$0x2] %v6321_v15 }
0x1adf   : > { %7078 = vst [vmem:[%s8442_s19 + $0x1e] sm:$0x4] %v6321_v15  ;;  %7079 = vst [vmem:[%s8442_s19 + $0x2d] sm:$0x8] %v6321_v15 }
0x1ae0 PF: > { %s9742_s2 = sld [smem:[#allocation27_spill]] }
0x1ae1   : > { %s9743_s22 = sld [smem:[#allocation25_spill]] }
0x1ae2   : > { %s9744_s23 = sld [smem:[#allocation26_spill]] }
0x1ae3   : > { %s9745_s26 = sld [smem:[#allocation28_spill]] }
0x1ae4   : > { %s9746_s28 = sld [smem:[#allocation29_spill]] }
0x1ae6   : > { %s73_s1 = sadd.s32 1, %s9742_s2  }
0x1ae7   : > { %p70_p9 = scmp.ge.s32.totalorder %s73_s1, 6  }
0x1ae9   :  { %72 = sbr.rel (!%p70_p9) target bundleno = 60 (0x3c), region = 264 }

</bundles_post_ra>
